<compile_context>
chip_gen: v5e
topology: v5e:2x2
jax: 0.10.0
libtpu: 0.0.40
codegen_flags: <defaults>
</compile_context>

<pallas_src>
import functools

import jax
import jax.numpy as jnp
import numpy as np
from jax.experimental import pallas as pl
from jax.experimental.pallas import tpu as pltpu


def _share_bottom_kernel(x_ref,
                         w1, t1, w2, t2, w3, t3, w4, t4,
                         out_ref,
                         stats_s,
                         *, n_total, tn):
    k = pl.program_id(1)
    num_k = pl.num_programs(1)
    c_out = out_ref.shape[-1]

    @pl.when(k == 0)
    def _():
        stats_s[0:1, :] = jnp.full((1, c_out), -jnp.inf, jnp.float32)   # running max
        stats_s[1:2, :] = jnp.full((1, c_out), jnp.inf, jnp.float32)    # running min
        stats_s[2:4, :] = jnp.zeros((2, c_out), jnp.float32)            # sum / sum-of-squares

    x = x_ref[0]                                   # (TN, 3) f32

    # conv1 (K=3) + folded BN1 + ReLU: three broadcast FMAs on the VPU
    # (a 3-wide contraction would run the MXU at ~2% utilization).
    w1v = w1[...]                                  # (3, 64)
    h = (x[:, 0:1] * w1v[0:1, :]
         + x[:, 1:2] * w1v[1:2, :]
         + x[:, 2:3] * w1v[2:3, :])
    h = jnp.maximum(h + t1[...], 0.0)              # (TN, 64)

    # conv2 + folded BN2 + ReLU (bf16 MXU, f32 accumulation)
    h = jnp.dot(h.astype(jnp.bfloat16), w2[...],
                preferred_element_type=jnp.float32)
    h = jnp.maximum(h + t2[...], 0.0)              # (TN, 128)

    # conv3 + folded BN3 + ReLU (bf16 MXU, f32 accumulation)
    h = jnp.dot(h.astype(jnp.bfloat16), w3[...],
                preferred_element_type=jnp.float32)
    h = jnp.maximum(h + t3[...], 0.0)              # (TN, 512)

    # conv4 + folded BN4 (no ReLU)
    z = jnp.dot(h.astype(jnp.bfloat16), w4[...],
                preferred_element_type=jnp.float32)
    z = z + t4[...]                                # (TN, 1024)

    def _accumulate(z_mx, z_mn, z_sm):
        stats_s[0:1, :] = jnp.maximum(stats_s[0:1, :],
                                      jnp.max(z_mx, axis=0, keepdims=True))
        stats_s[1:2, :] = jnp.minimum(stats_s[1:2, :],
                                      jnp.min(z_mn, axis=0, keepdims=True))
        stats_s[2:3, :] = stats_s[2:3, :] + jnp.sum(z_sm, axis=0, keepdims=True)
        stats_s[3:4, :] = stats_s[3:4, :] + jnp.sum(z_sm * z_sm, axis=0,
                                                    keepdims=True)

    if n_total % tn == 0:
        # No partial tile anywhere in the grid: always accumulate unmasked.
        _accumulate(z, z, z)
    else:
        # Interior tiles: unmasked accumulate (no iota / selects on the hot path).
        @pl.when(k != num_k - 1)
        def _():
            _accumulate(z, z, z)

        # Final (partial) tile only: mask padded rows.  jnp.where is a bitwise
        # select, so garbage/NaN rows past the end of x cannot leak into stats.
        @pl.when(k == num_k - 1)
        def _():
            row = jax.lax.broadcasted_iota(jnp.int32, (tn, 1), 0)
            valid = (k * tn + row) < n_total
            _accumulate(jnp.where(valid, z, -jnp.inf),
                        jnp.where(valid, z, jnp.inf),
                        jnp.where(valid, z, 0.0))

    @pl.when(k == num_k - 1)
    def _():
        s = stats_s[2:3, :]
        mean = s * (1.0 / n_total)
        if n_total > 1:
            # Unbiased variance (torch.std default), one-pass form, clamped >= 0.
            var = (stats_s[3:4, :] - s * mean) * (1.0 / (n_total - 1))
            std = jnp.sqrt(jnp.maximum(var, 0.0))
        else:
            std = jnp.full_like(s, jnp.nan)   # torch.std of a single element is nan
        out_ref[0, 0:1, :] = stats_s[0:1, :]   # max
        out_ref[0, 1:2, :] = mean              # mean
        out_ref[0, 2:3, :] = stats_s[1:2, :]   # min
        out_ref[0, 3:4, :] = std               # std


def share_bottom_pallas(x, params, *, tn_target=1024):
    """x: (B, N, 3) float32.  params: folded weights (see make_params).

    Returns (max, mean, min, std), each (B, 1024) float32.
    """
    B, N, C_in = x.shape
    C_OUT = params["w4"].shape[1]

    # N tile: full N when small (always a legal block); otherwise tn_target
    # (multiple of 8).  A partial last tile is masked inside the kernel.
    tn = N if N <= tn_target else tn_target
    num_k = pl.cdiv(N, tn)

    const2d = lambda b, k: (0, 0)
    weight_args, weight_specs = [], []
    for i in (1, 2, 3, 4):
        w, t = params[f"w{i}"], params[f"t{i}"]
        weight_args += [w, t]
        # Constant index_map -> single buffer; double-buffering weights is dead VMEM.
        weight_specs += [
            pl.BlockSpec(w.shape, const2d, pipeline_mode=pl.Buffered(1)),
            pl.BlockSpec(t.shape, const2d, pipeline_mode=pl.Buffered(1)),
        ]

    kernel = functools.partial(_share_bottom_kernel, n_total=N, tn=tn)

    out = pl.pallas_call(
        kernel,
        out_shape=jax.ShapeDtypeStruct((B, 4, C_OUT), jnp.float32),
        grid_spec=pltpu.PrefetchScalarGridSpec(
            num_scalar_prefetch=0,
            grid=(B, num_k),
            in_specs=[pl.BlockSpec((1, tn, C_in), lambda b, k: (b, k, 0))]
                     + weight_specs,
            out_specs=pl.BlockSpec((1, 4, C_OUT), lambda b, k: (b, 0, 0)),
            scratch_shapes=[pltpu.VMEM((4, C_OUT), jnp.float32)],
        ),
        compiler_params=pltpu.CompilerParams(
            dimension_semantics=("parallel", "arbitrary"),
            vmem_limit_bytes=32 * 1024 * 1024),
    )(x, *weight_args)

    # rows: 0=max, 1=mean, 2=min, 3=std
    return out[:, 0, :], out[:, 1, :], out[:, 2, :], out[:, 3, :]


def make_params(key):
    """Deterministic parameters matching the PyTorch module's shapes.

    Conv1d(in, out, 1) weight (out, in, 1) stored transposed as (in, out) and
    pre-multiplied by the folded BN scale (inference mode):
        scale = gamma / sqrt(running_var + eps)
        w_i  <- w_i * scale
        t_i   = beta - running_mean * scale + conv_bias * scale
    conv2/conv3/conv4 weights are stored in bf16 (MXU native); conv1 stays f32.
    """
    dims = [3, 64, 128, 512, 1024]
    eps = 1e-5
    params = {}
    keys = jax.random.split(key, 4 * 6)
    it = iter(keys)
    for i in range(4):
        cin, cout = dims[i], dims[i + 1]
        w = jax.random.normal(next(it), (cin, cout), jnp.float32) * 0.1
        bias = jax.random.normal(next(it), (cout,), jnp.float32) * 0.1
        gamma = 1.0 + 0.1 * jax.random.normal(next(it), (cout,), jnp.float32)
        beta = 0.1 * jax.random.normal(next(it), (cout,), jnp.float32)
        run_mean = 0.1 * jax.random.normal(next(it), (cout,), jnp.float32)
        run_var = 0.5 + jnp.abs(jax.random.normal(next(it), (cout,), jnp.float32))
        scale = gamma / jnp.sqrt(run_var + eps)
        shift = beta - run_mean * scale + bias * scale
        wf = w * scale[None, :]
        if i >= 1:                       # conv2 / conv3 / conv4: bf16 MXU weights
            wf = wf.astype(jnp.bfloat16)
        params[f"w{i+1}"] = wf
        params[f"t{i+1}"] = shift.reshape(1, cout)
    return params


def share_bottom_ref(x, params):
    """Pure-JAX reference with the same numerics as the kernel (for validation)."""
    w1 = params["w1"]
    h = (x[..., 0:1] * w1[0, :]
         + x[..., 1:2] * w1[1, :]
         + x[..., 2:3] * w1[2, :])
    h = jnp.maximum(h + params["t1"], 0.0)
    h = jnp.einsum("bnc,cd->bnd", h.astype(jnp.bfloat16), params["w2"],
                   preferred_element_type=jnp.float32)
    h = jnp.maximum(h + params["t2"], 0.0)
    h = jnp.einsum("bnc,cd->bnd", h.astype(jnp.bfloat16), params["w3"],
                   preferred_element_type=jnp.float32)
    h = jnp.maximum(h + params["t3"], 0.0)
    z = jnp.einsum("bnc,cd->bnd", h.astype(jnp.bfloat16), params["w4"],
                   preferred_element_type=jnp.float32)
    z = z + params["t4"]
    z_max = jnp.max(z, axis=1)
    z_mean = jnp.mean(z, axis=1)
    z_min = jnp.min(z, axis=1)
    n = z.shape[1]
    z_std = jnp.sqrt(jnp.sum((z - z_mean[:, None, :]) ** 2, axis=1) / (n - 1))
    return z_max, z_mean, z_min, z_std


if __name__ == "__main__":
    key = jax.random.PRNGKey(0)
    k_param, k_x, k_x2 = jax.random.split(key, 3)
    params = make_params(k_param)

    # Case 1: small shape, single sequence tile.
    B, N = 2, 16
    x = jax.random.normal(k_x, (B, N, 3), jnp.float32)
    outs = jax.block_until_ready(share_bottom_pallas(x, params))
    refs = share_bottom_ref(x, params)
    for o, r in zip(outs, refs):
        np.testing.assert_allclose(np.asarray(o), np.asarray(r),
                                   rtol=1e-3, atol=2e-3)

    # Case 2: multi-tile with a partial last tile (exercises the gated masking
    # path and the cross-step scratch accumulation) via a tiny tile size.
    N2 = 20
    x2 = jax.random.normal(k_x2, (B, N2, 3), jnp.float32)
    outs2 = jax.block_until_ready(share_bottom_pallas(x2, params, tn_target=8))
    refs2 = share_bottom_ref(x2, params)
    for o, r in zip(outs2, refs2):
        np.testing.assert_allclose(np.asarray(o), np.asarray(r),
                                   rtol=1e-3, atol=2e-3)

    print("KERNEL_OK")
</pallas_src>

<mosaic_0001>
module attributes {stable_mosaic.version = 11 : i64} {
  func.func @_share_bottom_kernel(%arg0: i32, %arg1: i32, %arg2: memref<1x16x3xf32, #tpu.memory_space<vmem>>, %arg3: memref<3x64xf32, #tpu.memory_space<vmem>>, %arg4: memref<1x64xf32, #tpu.memory_space<vmem>>, %arg5: memref<64x128xbf16, #tpu.memory_space<vmem>>, %arg6: memref<1x128xf32, #tpu.memory_space<vmem>>, %arg7: memref<128x512xbf16, #tpu.memory_space<vmem>>, %arg8: memref<1x512xf32, #tpu.memory_space<vmem>>, %arg9: memref<512x1024xbf16, #tpu.memory_space<vmem>>, %arg10: memref<1x1024xf32, #tpu.memory_space<vmem>>, %arg11: memref<1x4x1024xf32, #tpu.memory_space<vmem>>, %arg12: memref<4x1024xf32, #tpu.memory_space<vmem>>) attributes {dimension_semantics = [#tpu.dimension_semantics<parallel>, #tpu.dimension_semantics<arbitrary>], iteration_bounds = array<i64: 2, 1>, scalar_prefetch = 0 : i64, scratch_operands = 1 : i64, tpu.core_type = #tpu.core_type<tc>, window_params = [{transform_indices = @transform_0, window_bounds = array<i64: 1, 16, 3>}, {pipeline_mode = #tpu.pipeline_mode<synchronous>, transform_indices = @transform_1, window_bounds = array<i64: 3, 64>}, {pipeline_mode = #tpu.pipeline_mode<synchronous>, transform_indices = @transform_2, window_bounds = array<i64: 1, 64>}, {pipeline_mode = #tpu.pipeline_mode<synchronous>, transform_indices = @transform_3, window_bounds = array<i64: 64, 128>}, {pipeline_mode = #tpu.pipeline_mode<synchronous>, transform_indices = @transform_4, window_bounds = array<i64: 1, 128>}, {pipeline_mode = #tpu.pipeline_mode<synchronous>, transform_indices = @transform_5, window_bounds = array<i64: 128, 512>}, {pipeline_mode = #tpu.pipeline_mode<synchronous>, transform_indices = @transform_6, window_bounds = array<i64: 1, 512>}, {pipeline_mode = #tpu.pipeline_mode<synchronous>, transform_indices = @transform_7, window_bounds = array<i64: 512, 1024>}, {pipeline_mode = #tpu.pipeline_mode<synchronous>, transform_indices = @transform_8, window_bounds = array<i64: 1, 1024>}, {transform_indices = @transform_9, window_bounds = array<i64: 1, 4, 1024>}]} {
    %c0_i32 = arith.constant 0 : i32
    %0 = arith.cmpi eq, %arg1, %c0_i32 : i32
    %1 = arith.extui %0 : i1 to i32
    %c0_i32_0 = arith.constant 0 : i32
    %2 = arith.cmpi ne, %1, %c0_i32_0 : i32
    scf.if %2 {
      %cst_43 = arith.constant 0xFF800000 : f32
      %74 = vector.broadcast %cst_43 : f32 to vector<1x1024xf32>
      %c0_44 = arith.constant 0 : index
      %c0_45 = arith.constant 0 : index
      %75 = vector.load %arg12[%c0_44, %c0_45] : memref<4x1024xf32, #tpu.memory_space<vmem>>, vector<1x1024xf32>
      tpu.vector_store %arg12[%c0_44, %c0_45], %74 {strides = array<i32>} : memref<4x1024xf32, #tpu.memory_space<vmem>>, vector<1x1024xf32>,
      %cst_46 = arith.constant 0x7F800000 : f32
      %76 = vector.broadcast %cst_46 : f32 to vector<1x1024xf32>
      %c1_47 = arith.constant 1 : index
      %c0_48 = arith.constant 0 : index
      %77 = vector.load %arg12[%c1_47, %c0_48] : memref<4x1024xf32, #tpu.memory_space<vmem>>, vector<1x1024xf32>
      tpu.vector_store %arg12[%c1_47, %c0_48], %76 {strides = array<i32>} : memref<4x1024xf32, #tpu.memory_space<vmem>>, vector<1x1024xf32>,
      %cst_49 = arith.constant 0.000000e+00 : f32
      %78 = vector.broadcast %cst_49 : f32 to vector<2x1024xf32>
      %c2_50 = arith.constant 2 : index
      %c0_51 = arith.constant 0 : index
      %79 = vector.load %arg12[%c2_50, %c0_51] : memref<4x1024xf32, #tpu.memory_space<vmem>>, vector<2x1024xf32>
      tpu.vector_store %arg12[%c2_50, %c0_51], %78 {strides = array<i32>} : memref<4x1024xf32, #tpu.memory_space<vmem>>, vector<2x1024xf32>,
    } else {
    }
    %c0 = arith.constant 0 : index
    %c0_1 = arith.constant 0 : index
    %c0_2 = arith.constant 0 : index
    %3 = vector.load %arg2[%c0, %c0_1, %c0_2] : memref<1x16x3xf32, #tpu.memory_space<vmem>>, vector<1x16x3xf32>
    %4 = vector.shape_cast %3 : vector<1x16x3xf32> to vector<16x3xf32>
    %c0_3 = arith.constant 0 : index
    %c0_4 = arith.constant 0 : index
    %5 = vector.load %arg3[%c0_3, %c0_4] : memref<3x64xf32, #tpu.memory_space<vmem>>, vector<3x64xf32>
    %6 = vector.extract_strided_slice %4 {offsets = [0, 0], sizes = [16, 1], strides = [1, 1]} : vector<16x3xf32> to vector<16x1xf32>
    %7 = vector.extract_strided_slice %5 {offsets = [0, 0], sizes = [1, 64], strides = [1, 1]} : vector<3x64xf32> to vector<1x64xf32>
    %8 = vector.broadcast %6 : vector<16x1xf32> to vector<16x64xf32>
    %9 = vector.broadcast %7 : vector<1x64xf32> to vector<16x64xf32>
    %10 = arith.mulf %8, %9 : vector<16x64xf32>
    %11 = vector.extract_strided_slice %4 {offsets = [0, 1], sizes = [16, 1], strides = [1, 1]} : vector<16x3xf32> to vector<16x1xf32>
    %12 = vector.extract_strided_slice %5 {offsets = [1, 0], sizes = [1, 64], strides = [1, 1]} : vector<3x64xf32> to vector<1x64xf32>
    %13 = vector.broadcast %11 : vector<16x1xf32> to vector<16x64xf32>
    %14 = vector.broadcast %12 : vector<1x64xf32> to vector<16x64xf32>
    %15 = arith.mulf %13, %14 : vector<16x64xf32>
    %16 = arith.addf %10, %15 : vector<16x64xf32>
    %17 = vector.extract_strided_slice %4 {offsets = [0, 2], sizes = [16, 1], strides = [1, 1]} : vector<16x3xf32> to vector<16x1xf32>
    %18 = vector.extract_strided_slice %5 {offsets = [2, 0], sizes = [1, 64], strides = [1, 1]} : vector<3x64xf32> to vector<1x64xf32>
    %19 = vector.broadcast %17 : vector<16x1xf32> to vector<16x64xf32>
    %20 = vector.broadcast %18 : vector<1x64xf32> to vector<16x64xf32>
    %21 = arith.mulf %19, %20 : vector<16x64xf32>
    %22 = arith.addf %16, %21 : vector<16x64xf32>
    %c0_5 = arith.constant 0 : index
    %c0_6 = arith.constant 0 : index
    %23 = vector.load %arg4[%c0_5, %c0_6] : memref<1x64xf32, #tpu.memory_space<vmem>>, vector<1x64xf32>
    %24 = vector.broadcast %23 : vector<1x64xf32> to vector<16x64xf32>
    %25 = arith.addf %22, %24 : vector<16x64xf32>
    %cst = arith.constant 0.000000e+00 : f32
    %26 = vector.broadcast %cst : f32 to vector<16x64xf32>
    %27 = arith.maximumf %25, %26 : vector<16x64xf32>
    %28 = arith.truncf %27 : vector<16x64xf32> to vector<16x64xbf16>
    %c0_7 = arith.constant 0 : index
    %c0_8 = arith.constant 0 : index
    %29 = vector.load %arg5[%c0_7, %c0_8] : memref<64x128xbf16, #tpu.memory_space<vmem>>, vector<64x128xbf16>
    %cst_9 = arith.constant dense<0.000000e+00> : vector<16x128xf32>
    %30 = tpu.matmul %28, %29, %cst_9 {dimension_numbers = #tpu.dot_dimension_numbers<[1], [0], [0], [1], [0, 0, 1, 1], [], []>} : vector<16x64xbf16>, vector<64x128xbf16>, vector<16x128xf32> -> vector<16x128xf32>
    %c0_10 = arith.constant 0 : index
    %c0_11 = arith.constant 0 : index
    %31 = vector.load %arg6[%c0_10, %c0_11] : memref<1x128xf32, #tpu.memory_space<vmem>>, vector<1x128xf32>
    %32 = vector.broadcast %31 : vector<1x128xf32> to vector<16x128xf32>
    %33 = arith.addf %30, %32 : vector<16x128xf32>
    %cst_12 = arith.constant 0.000000e+00 : f32
    %34 = vector.broadcast %cst_12 : f32 to vector<16x128xf32>
    %35 = arith.maximumf %33, %34 : vector<16x128xf32>
    %36 = arith.truncf %35 : vector<16x128xf32> to vector<16x128xbf16>
    %c0_13 = arith.constant 0 : index
    %c0_14 = arith.constant 0 : index
    %37 = vector.load %arg7[%c0_13, %c0_14] : memref<128x512xbf16, #tpu.memory_space<vmem>>, vector<128x512xbf16>
    %cst_15 = arith.constant dense<0.000000e+00> : vector<16x512xf32>
    %38 = tpu.matmul %36, %37, %cst_15 {dimension_numbers = #tpu.dot_dimension_numbers<[1], [0], [0], [1], [0, 0, 1, 1], [], []>} : vector<16x128xbf16>, vector<128x512xbf16>, vector<16x512xf32> -> vector<16x512xf32>
    %c0_16 = arith.constant 0 : index
    %c0_17 = arith.constant 0 : index
    %39 = vector.load %arg8[%c0_16, %c0_17] : memref<1x512xf32, #tpu.memory_space<vmem>>, vector<1x512xf32>
    %40 = vector.broadcast %39 : vector<1x512xf32> to vector<16x512xf32>
    %41 = arith.addf %38, %40 : vector<16x512xf32>
    %cst_18 = arith.constant 0.000000e+00 : f32
    %42 = vector.broadcast %cst_18 : f32 to vector<16x512xf32>
    %43 = arith.maximumf %41, %42 : vector<16x512xf32>
    %44 = arith.truncf %43 : vector<16x512xf32> to vector<16x512xbf16>
    %c0_19 = arith.constant 0 : index
    %c0_20 = arith.constant 0 : index
    %45 = vector.load %arg9[%c0_19, %c0_20] : memref<512x1024xbf16, #tpu.memory_space<vmem>>, vector<512x1024xbf16>
    %cst_21 = arith.constant dense<0.000000e+00> : vector<16x1024xf32>
    %46 = tpu.matmul %44, %45, %cst_21 {dimension_numbers = #tpu.dot_dimension_numbers<[1], [0], [0], [1], [0, 0, 1, 1], [], []>} : vector<16x512xbf16>, vector<512x1024xbf16>, vector<16x1024xf32> -> vector<16x1024xf32>
    %c0_22 = arith.constant 0 : index
    %c0_23 = arith.constant 0 : index
    %47 = vector.load %arg10[%c0_22, %c0_23] : memref<1x1024xf32, #tpu.memory_space<vmem>>, vector<1x1024xf32>
    %48 = vector.broadcast %47 : vector<1x1024xf32> to vector<16x1024xf32>
    %49 = arith.addf %46, %48 : vector<16x1024xf32>
    %c0_24 = arith.constant 0 : index
    %c0_25 = arith.constant 0 : index
    %50 = vector.load %arg12[%c0_24, %c0_25] : memref<4x1024xf32, #tpu.memory_space<vmem>>, vector<1x1024xf32>
    %cst_26 = arith.constant dense<0xFF800000> : vector<1024xf32>
    %51 = vector.multi_reduction <maximumf>, %49, %cst_26 [0] : vector<16x1024xf32> to vector<1024xf32>
    %52 = vector.shape_cast %51 : vector<1024xf32> to vector<1x1024xf32>
    %53 = arith.maximumf %50, %52 : vector<1x1024xf32>
    %c0_27 = arith.constant 0 : index
    %c0_28 = arith.constant 0 : index
    %54 = vector.load %arg12[%c0_27, %c0_28] : memref<4x1024xf32, #tpu.memory_space<vmem>>, vector<1x1024xf32>
    tpu.vector_store %arg12[%c0_27, %c0_28], %53 {strides = array<i32>} : memref<4x1024xf32, #tpu.memory_space<vmem>>, vector<1x1024xf32>,
    %c1 = arith.constant 1 : index
    %c0_29 = arith.constant 0 : index
    %55 = vector.load %arg12[%c1, %c0_29] : memref<4x1024xf32, #tpu.memory_space<vmem>>, vector<1x1024xf32>
    %cst_30 = arith.constant dense<0x7F800000> : vector<1024xf32>
    %56 = vector.multi_reduction <minimumf>, %49, %cst_30 [0] : vector<16x1024xf32> to vector<1024xf32>
    %57 = vector.shape_cast %56 : vector<1024xf32> to vector<1x1024xf32>
    %58 = arith.minimumf %55, %57 : vector<1x1024xf32>
    %c1_31 = arith.constant 1 : index
    %c0_32 = arith.constant 0 : index
    %59 = vector.load %arg12[%c1_31, %c0_32] : memref<4x1024xf32, #tpu.memory_space<vmem>>, vector<1x1024xf32>
    tpu.vector_store %arg12[%c1_31, %c0_32], %58 {strides = array<i32>} : memref<4x1024xf32, #tpu.memory_space<vmem>>, vector<1x1024xf32>,
    %c2 = arith.constant 2 : index
    %c0_33 = arith.constant 0 : index
    %60 = vector.load %arg12[%c2, %c0_33] : memref<4x1024xf32, #tpu.memory_space<vmem>>, vector<1x1024xf32>
    %cst_34 = arith.constant dense<0.000000e+00> : vector<1024xf32>
    %61 = vector.multi_reduction <add>, %49, %cst_34 [0] : vector<16x1024xf32> to vector<1024xf32>
    %62 = vector.shape_cast %61 : vector<1024xf32> to vector<1x1024xf32>
    %63 = arith.addf %60, %62 : vector<1x1024xf32>
    %c2_35 = arith.constant 2 : index
    %c0_36 = arith.constant 0 : index
    %64 = vector.load %arg12[%c2_35, %c0_36] : memref<4x1024xf32, #tpu.memory_space<vmem>>, vector<1x1024xf32>
    tpu.vector_store %arg12[%c2_35, %c0_36], %63 {strides = array<i32>} : memref<4x1024xf32, #tpu.memory_space<vmem>>, vector<1x1024xf32>,
    %c3 = arith.constant 3 : index
    %c0_37 = arith.constant 0 : index
    %65 = vector.load %arg12[%c3, %c0_37] : memref<4x1024xf32, #tpu.memory_space<vmem>>, vector<1x1024xf32>
    %66 = arith.mulf %49, %49 : vector<16x1024xf32>
    %cst_38 = arith.constant dense<0.000000e+00> : vector<1024xf32>
    %67 = vector.multi_reduction <add>, %66, %cst_38 [0] : vector<16x1024xf32> to vector<1024xf32>
    %68 = vector.shape_cast %67 : vector<1024xf32> to vector<1x1024xf32>
    %69 = arith.addf %65, %68 : vector<1x1024xf32>
    %c3_39 = arith.constant 3 : index
    %c0_40 = arith.constant 0 : index
    %70 = vector.load %arg12[%c3_39, %c0_40] : memref<4x1024xf32, #tpu.memory_space<vmem>>, vector<1x1024xf32>
    tpu.vector_store %arg12[%c3_39, %c0_40], %69 {strides = array<i32>} : memref<4x1024xf32, #tpu.memory_space<vmem>>, vector<1x1024xf32>,
    %c0_i32_41 = arith.constant 0 : i32
    %71 = arith.cmpi eq, %arg1, %c0_i32_41 : i32
    %72 = arith.extui %71 : i1 to i32
    %c0_i32_42 = arith.constant 0 : i32
    %73 = arith.cmpi ne, %72, %c0_i32_42 : i32
    scf.if %73 {
      %c2_43 = arith.constant 2 : index
      %c0_44 = arith.constant 0 : index
      %74 = vector.load %arg12[%c2_43, %c0_44] : memref<4x1024xf32, #tpu.memory_space<vmem>>, vector<1x1024xf32>
      %cst_45 = arith.constant 6.250000e-02 : f32
      %75 = vector.broadcast %cst_45 : f32 to vector<1x1024xf32>
      %76 = arith.mulf %74, %75 : vector<1x1024xf32>
      %c3_46 = arith.constant 3 : index
      %c0_47 = arith.constant 0 : index
      %77 = vector.load %arg12[%c3_46, %c0_47] : memref<4x1024xf32, #tpu.memory_space<vmem>>, vector<1x1024xf32>
      %78 = arith.mulf %74, %76 : vector<1x1024xf32>
      %79 = arith.subf %77, %78 : vector<1x1024xf32>
      %cst_48 = arith.constant 0.0666666701 : f32
      %80 = vector.broadcast %cst_48 : f32 to vector<1x1024xf32>
      %81 = arith.mulf %79, %80 : vector<1x1024xf32>
      %cst_49 = arith.constant 0.000000e+00 : f32
      %82 = vector.broadcast %cst_49 : f32 to vector<1x1024xf32>
      %83 = arith.maximumf %81, %82 : vector<1x1024xf32>
      %84 = math.sqrt %83 : vector<1x1024xf32>
      %c0_50 = arith.constant 0 : index
      %c0_51 = arith.constant 0 : index
      %85 = vector.load %arg12[%c0_50, %c0_51] : memref<4x1024xf32, #tpu.memory_space<vmem>>, vector<1x1024xf32>
      %c0_52 = arith.constant 0 : index
      %c0_53 = arith.constant 0 : index
      %c0_54 = arith.constant 0 : index
      %86 = vector.load %arg11[%c0_52, %c0_53, %c0_54] : memref<1x4x1024xf32, #tpu.memory_space<vmem>>, vector<1x1x1024xf32>
      %87 = vector.shape_cast %86 : vector<1x1x1024xf32> to vector<1x1024xf32>
      %88 = vector.shape_cast %85 : vector<1x1024xf32> to vector<1x1x1024xf32>
      tpu.vector_store %arg11[%c0_52, %c0_53, %c0_54], %88 {strides = array<i32>} : memref<1x4x1024xf32, #tpu.memory_space<vmem>>, vector<1x1x1024xf32>,
      %c0_55 = arith.constant 0 : index
      %c1_56 = arith.constant 1 : index
      %c0_57 = arith.constant 0 : index
      %89 = vector.load %arg11[%c0_55, %c1_56, %c0_57] : memref<1x4x1024xf32, #tpu.memory_space<vmem>>, vector<1x1x1024xf32>
      %90 = vector.shape_cast %89 : vector<1x1x1024xf32> to vector<1x1024xf32>
      %91 = vector.shape_cast %76 : vector<1x1024xf32> to vector<1x1x1024xf32>
      tpu.vector_store %arg11[%c0_55, %c1_56, %c0_57], %91 {strides = array<i32>} : memref<1x4x1024xf32, #tpu.memory_space<vmem>>, vector<1x1x1024xf32>,
      %c1_58 = arith.constant 1 : index
      %c0_59 = arith.constant 0 : index
      %92 = vector.load %arg12[%c1_58, %c0_59] : memref<4x1024xf32, #tpu.memory_space<vmem>>, vector<1x1024xf32>
      %c0_60 = arith.constant 0 : index
      %c2_61 = arith.constant 2 : index
      %c0_62 = arith.constant 0 : index
      %93 = vector.load %arg11[%c0_60, %c2_61, %c0_62] : memref<1x4x1024xf32, #tpu.memory_space<vmem>>, vector<1x1x1024xf32>
      %94 = vector.shape_cast %93 : vector<1x1x1024xf32> to vector<1x1024xf32>
      %95 = vector.shape_cast %92 : vector<1x1024xf32> to vector<1x1x1024xf32>
      tpu.vector_store %arg11[%c0_60, %c2_61, %c0_62], %95 {strides = array<i32>} : memref<1x4x1024xf32, #tpu.memory_space<vmem>>, vector<1x1x1024xf32>,
      %c0_63 = arith.constant 0 : index
      %c3_64 = arith.constant 3 : index
      %c0_65 = arith.constant 0 : index
      %96 = vector.load %arg11[%c0_63, %c3_64, %c0_65] : memref<1x4x1024xf32, #tpu.memory_space<vmem>>, vector<1x1x1024xf32>
      %97 = vector.shape_cast %96 : vector<1x1x1024xf32> to vector<1x1024xf32>
      %98 = vector.shape_cast %84 : vector<1x1024xf32> to vector<1x1x1024xf32>
      tpu.vector_store %arg11[%c0_63, %c3_64, %c0_65], %98 {strides = array<i32>} : memref<1x4x1024xf32, #tpu.memory_space<vmem>>, vector<1x1x1024xf32>,
    } else {
    }
    return
  }
  func.func @transform_0(%arg0: i32, %arg1: i32) -> (i32, i32, i32) {
    %c0_i32 = arith.constant 0 : i32
    %c0_i32_0 = arith.constant 0 : i32
    return %arg0, %arg1, %c0_i32 : i32, i32, i32
  }
  func.func @transform_1(%arg0: i32, %arg1: i32) -> (i32, i32) {
    %c0_i32 = arith.constant 0 : i32
    %c0_i32_0 = arith.constant 0 : i32
    %c0_i32_1 = arith.constant 0 : i32
    return %c0_i32, %c0_i32_0 : i32, i32
  }
  func.func @transform_2(%arg0: i32, %arg1: i32) -> (i32, i32) {
    %c0_i32 = arith.constant 0 : i32
    %c0_i32_0 = arith.constant 0 : i32
    %c0_i32_1 = arith.constant 0 : i32
    return %c0_i32, %c0_i32_0 : i32, i32
  }
  func.func @transform_3(%arg0: i32, %arg1: i32) -> (i32, i32) {
    %c0_i32 = arith.constant 0 : i32
    %c0_i32_0 = arith.constant 0 : i32
    %c0_i32_1 = arith.constant 0 : i32
    return %c0_i32, %c0_i32_0 : i32, i32
  }
  func.func @transform_4(%arg0: i32, %arg1: i32) -> (i32, i32) {
    %c0_i32 = arith.constant 0 : i32
    %c0_i32_0 = arith.constant 0 : i32
    %c0_i32_1 = arith.constant 0 : i32
    return %c0_i32, %c0_i32_0 : i32, i32
  }
  func.func @transform_5(%arg0: i32, %arg1: i32) -> (i32, i32) {
    %c0_i32 = arith.constant 0 : i32
    %c0_i32_0 = arith.constant 0 : i32
    %c0_i32_1 = arith.constant 0 : i32
    return %c0_i32, %c0_i32_0 : i32, i32
  }
  func.func @transform_6(%arg0: i32, %arg1: i32) -> (i32, i32) {
    %c0_i32 = arith.constant 0 : i32
    %c0_i32_0 = arith.constant 0 : i32
    %c0_i32_1 = arith.constant 0 : i32
    return %c0_i32, %c0_i32_0 : i32, i32
  }
  func.func @transform_7(%arg0: i32, %arg1: i32) -> (i32, i32) {
    %c0_i32 = arith.constant 0 : i32
    %c0_i32_0 = arith.constant 0 : i32
    %c0_i32_1 = arith.constant 0 : i32
    return %c0_i32, %c0_i32_0 : i32, i32
  }
  func.func @transform_8(%arg0: i32, %arg1: i32) -> (i32, i32) {
    %c0_i32 = arith.constant 0 : i32
    %c0_i32_0 = arith.constant 0 : i32
    %c0_i32_1 = arith.constant 0 : i32
    return %c0_i32, %c0_i32_0 : i32, i32
  }
  func.func @transform_9(%arg0: i32, %arg1: i32) -> (i32, i32, i32) {
    %c0_i32 = arith.constant 0 : i32
    %c0_i32_0 = arith.constant 0 : i32
    %c0_i32_1 = arith.constant 0 : i32
    return %arg0, %c0_i32, %c0_i32_0 : i32, i32, i32
  }
}

</mosaic_0001>

<bundles_post_ra>
// kernel: tpu_custom_call.1
= control target key start
LH: loop header
LB: loop body
LE: loop exit
PB: predicated region body
PF: predicated region fallthrough
CT: control target
= control target key end

     0   :  { %s5654_s0 = inlined_call_operand.vmem [shape: f32[2,16,3], index: 0, kind: input, shape index: {}]   ;;  %s5655_s1 = inlined_call_operand.hbm [shape: f32[3,64], index: 1, kind: input, shape index: {}]   ;;  %s5656_s2 = inlined_call_operand.hbm [shape: f32[1,64], index: 2, kind: input, shape index: {}]   ;;  %s5657_s3 = inlined_call_operand.vmem [shape: bf16[64,128], index: 3, kind: input, shape index: {}]   ;;  %s5658_s4 = inlined_call_operand.vmem [shape: f32[1,128], index: 4, kind: input, shape index: {}]   ;;  %s5659_s5 = inlined_call_operand.hbm [shape: bf16[128,512], index: 5, kind: input, shape index: {}]   ;;  %s5660_s6 = inlined_call_operand.hbm [shape: f32[1,512], index: 6, kind: input, shape index: {}]   ;;  %s5661_s7 = inlined_call_operand.hbm [shape: bf16[512,1024], index: 7, kind: input, shape index: {}]   ;;  %s5662_s8 = inlined_call_operand.vmem [shape: f32[1,1024], index: 8, kind: input, shape index: {}]   ;;  %s5663_s9 = inlined_call_operand.hbm [shape: f32[2,4,1024], index: 9, kind: output, shape index: {}]  }
   0x1   :  { %5666 = sst [smem:[#allocation20_spill]] %s5655_s1 }
   0x2   :  { %5667 = sst [smem:[#allocation21_spill]] %s5656_s2 }
   0x3   :  { %5668 = sst [smem:[#allocation22_spill]] %s5660_s6 }
   0x4   :  { %14 = vsyncpa [#allocation4], 0 }
   0x5   :  { %15 = vsyncpa [#allocation7], 0 }
   0x6   :  { %16 = vsyncpa [#allocation10], 0 }
   0x7   :  { %17 = vsyncpa [#allocation5], 0 }
   0x8   :  { %19 = vsyncpa [#allocation5 + $0x1], 0  ;;  %s5273_s30 = smov 0   ;;  %s5275_s10 = smov 0  }
   0x9   :  { %s5277_s11 = smov 0   ;;  %s5279_s12 = smov 0  }
   0xa   :  { %s5281_s13 = smov 0   ;;  %s5283_s14 = smov 0  }
   0xb LB: > { %5669 = sst [smem:[#allocation17_spill]] %s5202_s13  ;;  %s3353_s15 = sadd.s32 4294967295, %s5206_s14   ;;  %s5206_s14 = sphi %s5283_s14, %s25_s14   ;;  %s5202_s13 = sphi %s5281_s13, %s5682_s13   ;;  %s5198_s12 = sphi %s5279_s12, %s5681_s12   ;;  %s5194_s11 = sphi %s5277_s11, %s5685_s11   ;;  %s5190_s10 = sphi %s5275_s10, %s5684_s10   ;;  %s5186_s30 = sphi %s5273_s30, %s5683_s30  }
   0xc   : > { %s3354_s16 = sadd.s32 4294967294, %s5206_s14   ;;  %s37_s17 = sadd.s32 1, %s5202_s13 }
   0xd   : > { %s240_s18 = sadd.s32 1, %s5194_s11  ;;  %p39_p0 = scmp.ge.s32.totalorder %s37_s17, 2 }
   0xe   : > { %p250_p1 = scmp.ne.s32.totalorder %s5194_s11, %s5190_s10  ;;  %p251_p2 = scmp.eq.s32.totalorder %s3353_s15, 1 }
   0xf   : > { %p256_p3 = scmp.ne.s32.totalorder %s5190_s10, %s5186_s30  ;;  %s5687_s17 = smov (%p39_p0, %s37_s17), 0 }
  0x10   : > { %5670 = sst [smem:[#allocation18_spill]] %s5687_s17  ;;  %p5313_p4 = por %p251_p2, %p250_p1 }
  0x11   : > { %p257_p5 = scmp.eq.s32.totalorder %s3354_s16, 1  ;;  %s237_s20 = ssub.s32 %s5202_s13, %s5687_s17 }
  0x12   : > { %p3355_p6 = scmp.ge.s32.totalorder %s5206_s14, 1  ;;  %p238_p7 = scmp.eq.s32.totalorder %s237_s20, 0 }
  0x13   : > { %p5320_p8 = por %p257_p5, %p256_p3  ;;  %p264_p9 = scmp.lt.s32.totalorder %s5206_s14, 3 }
  0x14   : > { %s5326_s22 = scalar_select %p238_p7, %s5194_s11, %s240_s18  }
  0x15   : > { %p5328_p10 = pnand %p3355_p6, %p264_p9  ;;  %p5332_p11 = scmp.eq.s32.totalorder %s3353_s15, 0 }
  0x16   : > { %5673 = sst [smem:[#allocation19_spill]] %s5326_s22  ;;  %s5208_s28 = smov [#allocation6]  }
  0x17   : > { %s5676_s2 = sld [smem:[#allocation21_spill]]  ;;  %p4864_p12 = pneg %p5328_p10 }
  0x18   : > { %s290_s29 = sshll.u32 %s5208_s28, 4  ;;  %s5677_s6 = sld [smem:[#allocation22_spill]]  ;;  %s291_s29 = int_to_ptr.vmem [resolvable:$true] %s290_s29 }
  0x19   : > { %p5346_p13 = pnand %p5332_p11, %p4864_p12  ;;  %s5209_s25 = smov [#allocation9]  }
  0x1a   : > { %s322_s26 = sshll.u32 %s5209_s25, 4  ;;  %s5679_s1 = sld [smem:[#allocation20_spill]]  ;;  %s323_s26 = int_to_ptr.vmem [resolvable:$true] %s322_s26 }
  0x1b   : > { %s305_s22 = sshll.u32 %s5659_s5, 4  ;;  %s5212_s28 = smov 256   ;;  %s306_s22 = int_to_ptr.hbm [resolvable:$true] %s305_s22 }
  0x1c   : > { %s5213_s16 = smov 16   ;;  %s5215_s17 = smov 512  }
  0x1d   : > { %s288_s27 = sshll.u32 %s5676_s2, 4  ;;  %s5210_s2 = smov [#allocation3]   ;;  %s289_s27 = int_to_ptr.hbm [resolvable:$true] %s288_s27 }
  0x1e   : > { %s320_s20 = sshll.u32 %s5677_s6, 4  ;;  %s278_s6 = sshll.u32 %s5210_s2, 4  ;;  %s321_s20 = int_to_ptr.hbm [resolvable:$true] %s320_s20  ;;  %s279_s6 = int_to_ptr.vmem [resolvable:$true] %s278_s6 }
  0x1f   : > { %4870 = dma.hbm_to_vmem [thread:$0]  (!%p5346_p13), %s289_s27, 16, %s291_s29, [#allocation7]  }
  0x20   : > { %4876 = dma.hbm_to_vmem [thread:$0]  (!%p5346_p13), %s321_s20, 64, %s323_s26, [#allocation10]  }
  0x21   : > { %s276_s18 = sshll.u32 %s5679_s1, 4  ;;  %s5211_s27 = smov [#allocation8]   ;;  %s277_s18 = int_to_ptr.hbm [resolvable:$true] %s276_s18 }
  0x22   : > { %4867 = dma.hbm_to_vmem [thread:$0]  (!%p5346_p13), %s277_s18, 64, %s279_s6, [#allocation4]  }
  0x23   : > { %s307_s29 = sshll.u32 %s5211_s27, 4  ;;  %s331_s26 = sshll.u32 %s5661_s7, 4  ;;  %s308_s29 = int_to_ptr.vmem [resolvable:$true] %s307_s29  ;;  %s332_s26 = int_to_ptr.hbm [resolvable:$true] %s331_s26 }
  0x24   : > { %4873 = dma.hbm_to_vmem [thread:$0]  (!%p5346_p13), %s306_s22, 4096, %s308_s29, [#allocation7], %s5212_s28, %s5212_s28, %s5213_s16  }
  0x25   : > { %s5214_s2 = smov [#allocation11]   ;;  %s5216_s1 = smov 32  }
  0x26   : > { %s333_s13 = sshll.u32 %s5214_s2, 4  ;;  %365 = sbr.rel (%p5328_p10) target bundleno = 879 (0x36f), region = 56  ;;  %s334_s13 = int_to_ptr.vmem [resolvable:$true] %s333_s13 }
  0x27   : > { %4879 = dma.hbm_to_vmem [thread:$0]  (!%p5346_p13), %s332_s26, 32768, %s334_s13, [#allocation10], %s5215_s17, %s5215_s17, %s5216_s1  }
  0x2b   : > { %5169 = dma.done.wait (%p5332_p11), [#allocation4], 64  }
  0x2c   : > { %5171 = vsyncadd (%p5332_p11), [#allocation4], 4294967232 }
  0x2d   : > { %5173 = dma.done.wait (%p5332_p11), [#allocation7], 4112  }
  0x2e   : > { %5175 = vsyncadd (%p5332_p11), [#allocation7], 4294963184 }
  0x2f   : > { %5177 = dma.done.wait (%p5332_p11), [#allocation10], 32832  }
  0x30   : > { %5179 = vsyncadd (%p5332_p11), [#allocation10], 4294934464  ;;  %p427_p0 = scmp.lt.s32.totalorder %s5198_s12, 1  ;;  %v5217_v0 = vmov 1   ;;  %v5218_v1 = vmov 0   ;;  %v5219_v2 = vmov 2  }
  0x31   : > { %4959 = vset.pattern.permute.xlu1 %v5217_v0  ;;  %4958 = vset.pattern.permute.xlu0 %v5218_v1  ;;  %v4552_v5 = vld [vmem:[%s5657_s3 + $0x18] sm:$0xff]  ;;  %v4551_v6 = vld [vmem:[%s5657_s3 + $0x10] sm:$0xff]  ;;  %v4550_v7 = vld [vmem:[%s5657_s3 + $0x8] sm:$0xff]  ;;  %vm535_vm0 = vcmask 523264   ;;  %vm2900_vm1 = vcmask 1040384   ;;  %vm2902_vm2 = vcmask 1042434  }
  0x32   : > { %s428_s1 = scalar_select %p427_p0, %s5198_s12, 1  ;;  %4960 = vset.pattern.permute.xlu2 %v5219_v2  ;;  %543 = vmatpush.bf16.msra.mxu0 %v4552_v5  ;;  %v4549_v8 = vld [vmem:[%s5657_s3] sm:$0xff]  ;;  %v4583_v13 = vld [vmem:[#allocation8 + $0xec] sm:$0xf0]  ;;  %v4581_v14 = vld [vmem:[#allocation8 + $0xe4] sm:$0xf] }
  0x33   : > { %v5400_v9 = vld [vmem:[#allocation3] sm:$0x7]  ;;  %v3502_v12 = vld [vmem:[#allocation8 + $0xe0] sm:$0xf]  ;;  %v3504_v16 = vld [vmem:[#allocation8 + $0xf0] sm:$0xf0] }
  0x34   : > { %s4548_s6 = sshll.u32 %s428_s1, 4  ;;  %v472_v10 = vperm.slane %v5400_v9, 1  ;;  %v461_v11 = vperm.slane %v5400_v9, 0  ;;  %v3503_v15 = vor.u32 %v4583_v13, %v3502_v12  ;;  %v3510_v17 = vld [vmem:[#allocation8 + $0xe8] sm:$0xf]  ;;  %v3507_v19 = vor.u32 %v4581_v14, %v3504_v16  ;;  %s423_s1 = sand.u32 1, %s5190_s10  }
  0x35   : > { %s434_s15 = scalar_lea.vmem %s5654_s0, %s4548_s6  ;;  %v4584_v18 = vld [vmem:[#allocation8 + $0xf4] sm:$0xf0]  ;;  %v4582_v21 = vld [vmem:[#allocation8 + $0xec] sm:$0xf]  ;;  %v3512_v22 = vld [vmem:[#allocation8 + $0xf8] sm:$0xf0] }
  0x36   : > { %v448_v3 = vld [vmem:[%s434_s15] sm:$0xff]  ;;  %v449_v4 = vld [vmem:[%s434_s15 + $0x8] sm:$0xff]  ;;  %544 = vmatpush.bf16.msra.mxu0 %v4551_v6  ;;  %v3511_v20 = vor.u32 %v4584_v18, %v3510_v17  ;;  %758 = vmatpush.bf16.msra.mxu1 %v3503_v15  ;;  %v3515_v24 = vor.u32 %v4582_v21, %v3512_v22  ;;  %v4579_v25 = vld [vmem:[#allocation8 + $0xcc] sm:$0xf0]  ;;  %v485_v61 = vperm.slane %v5400_v9, 2  ;;  %vm2904_vm3 = vcmask 1041408  }
  0x37   : > { %465 = vperm.xlu1 %4959, %v448_v3   ;;  %453 = vperm.xlu0 %4958, %v448_v3   ;;  %v3486_v23 = vld [vmem:[#allocation8 + $0xc0] sm:$0xf]  ;;  %v4577_v26 = vld [vmem:[#allocation8 + $0xc4] sm:$0xf]  ;;  %v3488_v27 = vld [vmem:[#allocation8 + $0xd0] sm:$0xf0] }
  0x38   : > { %478 = vperm.xlu2 %4960, %v448_v3   ;;  %772 = vmatpush.bf16.msra.mxu2 %v3507_v19  ;;  %v3487_v28 = vor.u32 %v4579_v25, %v3486_v23  ;;  %v3491_v29 = vor.u32 %v4577_v26, %v3488_v27  ;;  %v3494_v30 = vld [vmem:[#allocation8 + $0xc8] sm:$0xf]  ;;  %v4580_v31 = vld [vmem:[#allocation8 + $0xd4] sm:$0xf0]  ;;  %v4578_v32 = vld [vmem:[#allocation8 + $0xcc] sm:$0xf] }
  0x39   : > { %786 = vmatpush.bf16.msra.mxu3 %v3511_v20  ;;  %v3495_v33 = vor.u32 %v4580_v31, %v3494_v30  ;;  %v3496_v34 = vld [vmem:[#allocation8 + $0xd8] sm:$0xf0]  ;;  %v3470_v35 = vld [vmem:[#allocation8 + $0xa0] sm:$0xf]  ;;  %v4575_v36 = vld [vmem:[#allocation8 + $0xac] sm:$0xf0] }
  0x3a   : > { %545 = vmatpush.bf16.msra.mxu0 %v4550_v7  ;;  %v3499_v37 = vor.u32 %v4578_v32, %v3496_v34  ;;  %v4573_v38 = vld [vmem:[#allocation8 + $0xa4] sm:$0xf]  ;;  %v3472_v39 = vld [vmem:[#allocation8 + $0xb0] sm:$0xf0]  ;;  %v3478_v40 = vld [vmem:[#allocation8 + $0xa8] sm:$0xf]  ;;  %759 = vmatpush.bf16.msra.mxu1 %v3487_v28  ;;  %v3471_v41 = vor.u32 %v4575_v36, %v3470_v35 }
  0x3b   : > { %v4576_v42 = vld [vmem:[#allocation8 + $0xb4] sm:$0xf0]  ;;  %v4574_v43 = vld [vmem:[#allocation8 + $0xac] sm:$0xf]  ;;  %v3480_v44 = vld [vmem:[#allocation8 + $0xb8] sm:$0xf0]  ;;  %v3475_v46 = vor.u32 %v4573_v38, %v3472_v39 }
  0x3c   : > { %773 = vmatpush.bf16.msra.mxu2 %v3491_v29  ;;  %v3479_v47 = vor.u32 %v4576_v42, %v3478_v40  ;;  %v3454_v48 = vld [vmem:[#allocation8 + $0x80] sm:$0xf]  ;;  %v4571_v49 = vld [vmem:[#allocation8 + $0x8c] sm:$0xf0]  ;;  %v4569_v50 = vld [vmem:[#allocation8 + $0x84] sm:$0xf]  ;;  %v3483_v51 = vor.u32 %v4574_v43, %v3480_v44 }
  0x3d   : > { %787 = vmatpush.bf16.msra.mxu3 %v3495_v33  ;;  %v3456_v52 = vld [vmem:[#allocation8 + $0x90] sm:$0xf0]  ;;  %v3462_v53 = vld [vmem:[#allocation8 + $0x88] sm:$0xf]  ;;  %v4572_v54 = vld [vmem:[#allocation8 + $0x94] sm:$0xf0]  ;;  %v3455_v59 = vor.u32 %v4571_v49, %v3454_v48 }
  0x3e   : > { %546 = vmatpush.bf16.msra.mxu0 %v4549_v8  ;;  %v4570_v55 = vld [vmem:[#allocation8 + $0x8c] sm:$0xf]  ;;  %v3464_v56 = vld [vmem:[#allocation8 + $0x98] sm:$0xf0]  ;;  %760 = vmatpush.bf16.msra.mxu1 %v3471_v41  ;;  %v3459_v60 = vor.u32 %v4569_v50, %v3456_v52  ;;  %v3463_v0 = vor.u32 %v4572_v54, %v3462_v53  ;;  %v3438_v22 = vld [vmem:[#allocation8 + $0x60] sm:$0xf] }
  0x3f   : > { %469 = vperm.xlu1 %4959, %v449_v4   ;;  %458 = vperm.xlu0 %4958, %v449_v4   ;;  %v3467_v1 = vor.u32 %v4570_v55, %v3464_v56  ;;  %v4962_v13 = vld [vmem:[#allocation6] ss:$0 sm:$0xff]  ;;  %v4567_v23 = vld [vmem:[#allocation8 + $0x6c] sm:$0xf0]  ;;  %v3440_v26 = vld [vmem:[#allocation8 + $0x70] sm:$0xf0] }
  0x40   : > { %482 = vperm.xlu2 %4960, %v449_v4   ;;  %774 = vmatpush.bf16.msra.mxu2 %v3475_v46  ;;  %v3439_v25 = vor.u32 %v4567_v23, %v3438_v22  ;;  %v4568_v27 = vld [vmem:[#allocation8 + $0x74] sm:$0xf0]  ;;  %v4566_v28 = vld [vmem:[#allocation8 + $0x6c] sm:$0xf]  ;;  %v3448_v29 = vld [vmem:[#allocation8 + $0x78] sm:$0xf0] }
  0x41   : > { %788 = vmatpush.bf16.msra.mxu3 %v3479_v47  ;;  %v3451_v30 = vor.u32 %v4566_v28, %v3448_v29  ;;  %v3422_v31 = vld [vmem:[#allocation8 + $0x40] sm:$0xf]  ;;  %v4563_v32 = vld [vmem:[#allocation8 + $0x4c] sm:$0xf0]  ;;  %v4561_v33 = vld [vmem:[#allocation8 + $0x44] sm:$0xf] }
  0x42   : > { %800 = vmatpush.bf16.msrb.mxu0 %v3515_v24  ;;  %761 = vmatpush.bf16.msra.mxu1 %v3455_v59  ;;  %v4565_v24 = vld [vmem:[#allocation8 + $0x64] sm:$0xf]  ;;  %v3423_v34 = vor.u32 %v4563_v32, %v3422_v31  ;;  %v3424_v35 = vld [vmem:[#allocation8 + $0x50] sm:$0xf0]  ;;  %v3430_v36 = vld [vmem:[#allocation8 + $0x48] sm:$0xf] }
  0x43   : > { %v3443_v9 = vor.u32 %v4565_v24, %v3440_v26  ;;  %v3427_v38 = vor.u32 %v4561_v33, %v3424_v35  ;;  %v4562_v40 = vld [vmem:[#allocation8 + $0x4c] sm:$0xf]  ;;  %v3432_v41 = vld [vmem:[#allocation8 + $0x58] sm:$0xf0]  ;;  %v3406_v43 = vld [vmem:[#allocation8 + $0x20] sm:$0xf] }
  0x44   : > { %775 = vmatpush.bf16.msra.mxu2 %v3459_v60  ;;  %v3435_v42 = vor.u32 %v4562_v40, %v3432_v41  ;;  %v4559_v44 = vld [vmem:[#allocation8 + $0x2c] sm:$0xf0]  ;;  %v3408_v47 = vld [vmem:[#allocation8 + $0x30] sm:$0xf0]  ;;  %v3414_v48 = vld [vmem:[#allocation8 + $0x28] sm:$0xf] }
  0x45   : > { %789 = vmatpush.bf16.msra.mxu3 %v3463_v0  ;;  %v3407_v46 = vor.u32 %v4559_v44, %v3406_v43  ;;  %v4560_v49 = vld [vmem:[#allocation8 + $0x34] sm:$0xf0]  ;;  %v4558_v52 = vld [vmem:[#allocation8 + $0x2c] sm:$0xf]  ;;  %v3416_v53 = vld [vmem:[#allocation8 + $0x38] sm:$0xf0] }
  0x46   : > { %801 = vmatpush.bf16.msrb.mxu0 %v3499_v37  ;;  %762 = vmatpush.bf16.msra.mxu1 %v3439_v25  ;;  %v4564_v37 = vld [vmem:[#allocation8 + $0x54] sm:$0xf0]  ;;  %v3419_v54 = vor.u32 %v4558_v52, %v3416_v53  ;;  %v3390_v55 = vld [vmem:[#allocation8] sm:$0xf]  ;;  %v4555_v56 = vld [vmem:[#allocation8 + $0xc] sm:$0xf0] }
  0x47   : > { %4961 = vset.pattern.permute.xlu0 %v5219_v2  ;;  %v3431_v39 = vor.u32 %v4564_v37, %v3430_v36  ;;  %v3392_v59 = vld [vmem:[#allocation8 + $0x10] sm:$0xf0]  ;;  %v3398_v60 = vld [vmem:[#allocation8 + $0x8] sm:$0xf]  ;;  %v4554_v0 = vld [vmem:[#allocation8 + $0xc] sm:$0xf] }
  0x48   : > { %776 = vmatpush.bf16.msra.mxu2 %v3443_v9  ;;  %v3678_v24 = vld [vmem:[#allocation11 + $0x140] sm:$0xf]  ;;  %vm2906_vm4 = vcmask 1044484   ;;  %vm2908_vm5 = vcmask 1046534   ;;  %vm2910_vm6 = vcmask 1045508   ;;  %vm2912_vm7 = vcmask 1043456  }
  0x49   : > { %v4629_v25 = vld [vmem:[#allocation11 + $0x15c] sm:$0xf0]  ;;  %s3368_s6 = sshll.u32 %s423_s1, 5  ;;  %s4841_s23 = sshll.u32 %s5198_s12, 5 }
  0x4a   : > { %802 = vmatpush.bf16.msrb.mxu0 %v3483_v51  ;;  %763 = vmatpush.bf16.msra.mxu1 %v3423_v34  ;;  %v3415_v51 = vor.u32 %v4560_v49, %v3414_v48  ;;  %v4446_v26 = vld [vmem:[#allocation11 + $0x740] sm:$0xf]  ;;  %s5609_s22 = scalar_lea.vmem [#allocation12], %s3368_s6  ;;  %s3225_s18 = scalar_lea.hbm %s5663_s9, %s4841_s23 }
  0x4b   : > { %v4701_v9 = vld [vmem:[#allocation11 + $0x39c] sm:$0xf0]  ;;  %s3227_s27 = sshll.u32 %s5609_s22, 4  ;;  %s3229_s29 = sshll.u32 %s3225_s18, 4  ;;  %s3228_s27 = int_to_ptr.vmem [resolvable:$true] %s3227_s27  ;;  %s3230_s29 = int_to_ptr.hbm [resolvable:$true] %s3229_s29 }
  0x4c   : > { %777 = vmatpush.bf16.msra.mxu2 %v3427_v38  ;;  %v4222_v28 = vld [vmem:[#allocation11 + $0x580] sm:$0xf]  ;;  %s3214_s12 = scalar_lea.sflag [#allocation5], %s423_s1  ;;  %s5130_s20 = sshra.s32 %s3230_s29, 4  ;;  %s5131_s20 = int_to_ptr.hbm [resolvable:$true] %s5130_s20 }
  0x4d   : > { %v4765_v29 = vld [vmem:[#allocation11 + $0x59c] sm:$0xf0]  ;;  %s5132_s25 = scalar_lea.hbm %s5131_s20, 32  ;;  %s5136_s16 = scalar_lea.hbm %s5663_s9, 64 }
  0x4e   : > { %803 = vmatpush.bf16.msrb.mxu0 %v3467_v1  ;;  %764 = vmatpush.bf16.msra.mxu1 %v3407_v46  ;;  %v3400_v1 = vld [vmem:[#allocation8 + $0x18] sm:$0xf0]  ;;  %v4223_v31 = vor.u32 %v4765_v29, %v4222_v28  ;;  %v3646_v32 = vld [vmem:[#allocation11 + $0x100] sm:$0xf]  ;;  %p5133_p1 = scmp.ne.s32.totalorder %s5131_s20, %s5132_s25  ;;  %p5137_p5 = scmp.lt.s32.totalorder %s5131_s20, %s5663_s9 }
  0x4f   : > { %v4621_v33 = vld [vmem:[#allocation11 + $0x11c] sm:$0xf0]  ;;  %p5138_p6 = scmp.lt.s32.totalorder %s5136_s16, %s5132_s25 }
  0x50   : > { %v3934_v35 = vld [vmem:[#allocation11 + $0x340] sm:$0xf]  ;;  %v3647_v44 = vor.u32 %v4621_v33, %v3646_v32  ;;  %v4833_v32 = vld [vmem:[#allocation11 + $0x7c4] sm:$0xf]  ;;  %p5134_p2 = pnand %p5133_p1, %p5313_p4 }
  0x51   : > { %v4693_v36 = vld [vmem:[#allocation11 + $0x35c] sm:$0xf0]  ;;  %v4512_v33 = vld [vmem:[#allocation11 + $0x7e0] sm:$0xf0]  ;;  %p5139_p7 = por %p5138_p6, %p5137_p5 }
  0x52   : > { %804 = vmatpush.bf16.msrb.mxu0 %v3451_v30  ;;  %v3679_v30 = vor.u32 %v4629_v25, %v3678_v24  ;;  %v4190_v37 = vld [vmem:[#allocation11 + $0x540] sm:$0xf]  ;;  %v3935_v41 = vor.u32 %v4693_v36, %v3934_v35  ;;  %p5135_p3 = pneg %p5134_p2 }
  0x53   : > { %v4414_v38 = vld [vmem:[#allocation11 + $0x700] sm:$0xf] }
  0x54   : > { %v4757_v40 = vld [vmem:[#allocation11 + $0x55c] sm:$0xf0]  ;;  %p5140_p9 = pnand %p5139_p7, %p5135_p3 }
  0x55   : > { %v3902_v43 = vld [vmem:[#allocation11 + $0x300] sm:$0xf] }
  0x56   : > { %805 = vmatpush.bf16.msrb.mxu0 %v3435_v42  ;;  %v4191_v42 = vor.u32 %v4757_v40, %v4190_v37  ;;  %v4158_v46 = vld [vmem:[#allocation11 + $0x500] sm:$0xf] }
  0x57   : > { %v3614_v49 = vld [vmem:[#allocation11 + $0xc0] sm:$0xf] }
  0x58   : > { %v4805_v52 = vld [vmem:[#allocation11 + $0x6dc] sm:$0xf0] }
  0x59   : > { %v4062_v24 = vld [vmem:[#allocation11 + $0x440] sm:$0xf] }
  0x5a   : > { %806 = vmatpush.bf16.msrb.mxu0 %v3419_v54  ;;  %v4725_v25 = vld [vmem:[#allocation11 + $0x45c] sm:$0xf0] }
  0x5b   : > { %v4286_v28 = vld [vmem:[#allocation11 + $0x600] sm:$0xf]  ;;  %v4063_v35 = vor.u32 %v4725_v25, %v4062_v24  ;;  %v4609_v24 = vld [vmem:[#allocation11 + $0xc4] sm:$0xf] }
  0x5c   : > { %v4781_v29 = vld [vmem:[#allocation11 + $0x61c] sm:$0xf0]  ;;  %v3616_v25 = vld [vmem:[#allocation11 + $0xe0] sm:$0xf0] }
  0x5d   : > { %v4030_v40 = vld [vmem:[#allocation11 + $0x400] sm:$0xf] }
  0x92   : > { %v479_v45 = vpop.permute.xlu2 %478 }
  0x93   : > { %v486_v2 = vmul.f32 %v485_v61, %v479_v45  ;;  %v4557_v45 = vld [vmem:[#allocation8 + $0x24] sm:$0xf] }
  0x94   : > { %v3411_v50 = vor.u32 %v4557_v45, %v3408_v47  ;;  %v4685_v45 = vld [vmem:[#allocation11 + $0x31c] sm:$0xf0] }
  0x95   : > { %v4749_v47 = vld [vmem:[#allocation11 + $0x51c] sm:$0xf0]  ;;  %v3903_v53 = vor.u32 %v4685_v45, %v3902_v43  ;;  %v4287_v45 = vor.u32 %v4781_v29, %v4286_v28  ;;  %v3904_v28 = vld [vmem:[#allocation11 + $0x320] sm:$0xf0] }
  0x96   : > { %778 = vmatpush.bf16.msra.mxu2 %v3411_v50  ;;  %v4613_v50 = vld [vmem:[#allocation11 + $0xdc] sm:$0xf0]  ;;  %v4159_v54 = vor.u32 %v4749_v47, %v4158_v46  ;;  %v4000_v46 = vld [vmem:[#allocation11 + $0x3e0] sm:$0xf0] }
  0x97   : > { %v4769_v47 = vld [vmem:[#allocation11 + $0x5c4] sm:$0xf] }
  0x98   : > { %v4745_v29 = vld [vmem:[#allocation11 + $0x504] sm:$0xf] }
  0x9a   : > { %v483_v4 = vpop.permute.xlu2 %482 }
  0x9b   : > { %v487_v14 = vmul.f32 %v485_v61, %v483_v4  ;;  %v4556_v61 = vld [vmem:[#allocation8 + $0x14] sm:$0xf0]  ;;  %v4645_v4 = vld [vmem:[#allocation11 + $0x1dc] sm:$0xf0] }
  0xa9   : > { %v466_v57 = vpop.permute.xlu1 %465  ;;  %v454_v58 = vpop.permute.xlu0 %453 }
  0xaa   : > { %v473_v62 = vmul.f32 %v472_v10, %v466_v57  ;;  %v462_v63 = vmul.f32 %v461_v11, %v454_v58  ;;  %v4553_v57 = vld [vmem:[#allocation8 + $0x4] sm:$0xf]  ;;  %v3391_v58 = vor.u32 %v4555_v56, %v3390_v55  ;;  %v3615_v56 = vor.u32 %v4613_v50, %v3614_v49 }
  0xab   : > { %v3870_v55 = vld [vmem:[#allocation11 + $0x2c0] sm:$0xf]  ;;  %v4515_v50 = vor.u32 %v4833_v32, %v4512_v33  ;;  %v4601_v33 = vld [vmem:[#allocation11 + $0x84] sm:$0xf] }
  0xac   : > { %v475_v3 = vadd.f32 %v473_v62, %v462_v63  ;;  %v3395_v62 = vor.u32 %v4553_v57, %v3392_v59  ;;  %v3399_v63 = vor.u32 %v4556_v61, %v3398_v60  ;;  %765 = vmatpush.bf16.msra.mxu1 %v3391_v58  ;;  %v4677_v57 = vld [vmem:[#allocation11 + $0x2dc] sm:$0xf0] }
  0xad   : > { %v4126_v58 = vld [vmem:[#allocation11 + $0x4c0] sm:$0xf] }
  0xae   : > { %v488_v7 = vadd.f32 %v486_v2, %v475_v3  ;;  %v3403_v2 = vor.u32 %v4554_v0, %v3400_v1  ;;  %779 = vmatpush.bf16.msra.mxu2 %v3395_v62  ;;  %v3742_v3 = vld [vmem:[#allocation11 + $0x1c0] sm:$0xf] }
  0xaf   : > { %v4741_v59 = vld [vmem:[#allocation11 + $0x4dc] sm:$0xf0] }
  0xb0   : > { %v494_v17 = vadd.f32 %v4962_v13, %v488_v7  ;;  %807 = vmatpush.bf16.msrb.mxu0 %v3403_v2  ;;  %v4837_v7 = vld [vmem:[#allocation11 + $0x7dc] sm:$0xf0]  ;;  %v4963_v2 = vld [vmem:[%s5658_s4] ss:$0 sm:$0xff] }
  0xb1   : > { %v470_v5 = vpop.permute.xlu1 %469  ;;  %v459_v6 = vpop.permute.xlu0 %458  ;;  %v3582_v62 = vld [vmem:[#allocation11 + $0x80] sm:$0xf] }
  0xb2   : > { %v474_v8 = vmul.f32 %v472_v10, %v470_v5  ;;  %v463_v12 = vmul.f32 %v461_v11, %v459_v6  ;;  %v496_v19 = vmax.f32 %v494_v17, 0.0  ;;  %v3446_v10 = vld [vmem:[#allocation8 + $0x68] sm:$0xf]  ;;  %v4510_v5 = vld [vmem:[#allocation11 + $0x7c0] sm:$0xf]  ;;  %v3743_v6 = vor.u32 %v4645_v4, %v3742_v3 }
  0xb3   : > { %v3447_v11 = vor.u32 %v4568_v27, %v3446_v10  ;;  %v4821_v10 = vld [vmem:[#allocation11 + $0x75c] sm:$0xf0]  ;;  %v3871_v3 = vor.u32 %v4677_v57, %v3870_v55  ;;  %v4127_v4 = vor.u32 %v4741_v59, %v4126_v58  ;;  %v4697_v59 = vld [vmem:[#allocation11 + $0x384] sm:$0xf] }
  0xb4   : > { %v476_v15 = vadd.f32 %v474_v8, %v463_v12  ;;  %v3710_v8 = vld [vmem:[#allocation11 + $0x180] sm:$0xf]  ;;  %2380 = vmatpush.bf16.msrb.mxu1 %v3743_v6  ;;  %v4447_v34 = vor.u32 %v4821_v10, %v4446_v26 }
  0xb5   : > { %790 = vmatpush.bf16.msra.mxu3 %v3447_v11  ;;  %v4637_v12 = vld [vmem:[#allocation11 + $0x19c] sm:$0xf0] }
  0xb6   : > { %v489_v16 = vadd.f32 %v487_v14, %v476_v15  ;;  %v4478_v14 = vld [vmem:[#allocation11 + $0x780] sm:$0xf]  ;;  %v3711_v17 = vor.u32 %v4637_v12, %v3710_v8 }
  0xb7   : > { %v4829_v15 = vld [vmem:[#allocation11 + $0x79c] sm:$0xf0] }
  0xb8   : > { %v495_v18 = vadd.f32 %v4962_v13, %v489_v16  ;;  %v4511_v13 = vor.u32 %v4837_v7, %v4510_v5  ;;  %v3998_v16 = vld [vmem:[#allocation11 + $0x3c0] sm:$0xf]  ;;  %2381 = vmatpush.bf16.msrb.mxu1 %v3711_v17 }
  0xb9   : > { %791 = vmatpush.bf16.msra.mxu3 %v3431_v39  ;;  %v3966_v27 = vld [vmem:[#allocation11 + $0x380] sm:$0xf] }
  0xba   : > { %v497_v20 = vmax.f32 %v495_v18, 0.0  ;;  %v4709_v18 = vld [vmem:[#allocation11 + $0x3dc] sm:$0xf0]  ;;  %v3967_v11 = vor.u32 %v4701_v9, %v3966_v27 }
  0xbb   : > { %v3999_v22 = vor.u32 %v4709_v18, %v3998_v16  ;;  %v4813_v39 = vld [vmem:[#allocation11 + $0x71c] sm:$0xf0] }
  0xbc   : > { %v498_v21 = vpack.c.bf16 %v497_v20, %v496_v19  ;;  %v4254_v19 = vld [vmem:[#allocation11 + $0x5c0] sm:$0xf]  ;;  %2382 = vmatpush.bf16.msrb.mxu1 %v3679_v30  ;;  %v4415_v48 = vor.u32 %v4813_v39, %v4414_v38  ;;  %v4641_v30 = vld [vmem:[#allocation11 + $0x1c4] sm:$0xf] }
  0xbd   : > { %792 = vmatpush.bf16.msra.mxu3 %v3415_v51  ;;  %v4773_v20 = vld [vmem:[#allocation11 + $0x5dc] sm:$0xf0]  ;;  %2394 = vmatpush.bf16.msrb.mxu2 %v3999_v22 }
  0xbe   : > { %3387 = vmatmul.msk.bf16.vlgmr.msra.gmra.mxu0 %vm535_vm0, %v498_v21  ;;  %v4479_v21 = vor.u32 %v4829_v15, %v4478_v14  ;;  %v4255_v23 = vor.u32 %v4773_v20, %v4254_v19  ;;  %v4382_v51 = vld [vmem:[#allocation11 + $0x6c0] sm:$0xf] }
  0xbf   : > { %2422 = vmatpush.bf16.msra.mxu0 %v4511_v13  ;;  %v4383_v61 = vor.u32 %v4805_v52, %v4382_v51  ;;  %v4350_v0 = vld [vmem:[#allocation11 + $0x680] sm:$0xf]  ;;  %v4633_v51 = vld [vmem:[#allocation11 + $0x184] sm:$0xf] }
  0xc0   : > { %2383 = vmatpush.bf16.msrb.mxu1 %v3647_v44  ;;  %v4797_v1 = vld [vmem:[#allocation11 + $0x69c] sm:$0xf0]  ;;  %v3712_v52 = vld [vmem:[#allocation11 + $0x1a0] sm:$0xf0] }
  0xc1   : > { %793 = vmatpush.bf16.msra.mxu3 %v3399_v63  ;;  %2395 = vmatpush.bf16.msrb.mxu2 %v3967_v11  ;;  %v4605_v63 = vld [vmem:[#allocation11 + $0x9c] sm:$0xf0]  ;;  %v4351_v13 = vor.u32 %v4797_v1, %v4350_v0  ;;  %v4625_v1 = vld [vmem:[#allocation11 + $0x144] sm:$0xf] }
  0xc2   : > { %v3838_v5 = vld [vmem:[#allocation11 + $0x280] sm:$0xf]  ;;  %v3583_v6 = vor.u32 %v4605_v63, %v3582_v62  ;;  %v4224_v62 = vld [vmem:[#allocation11 + $0x5a0] sm:$0xf0]  ;;  %v3715_v63 = vor.u32 %v4633_v51, %v3712_v52 }
  0xc3   : > { %2423 = vmatpush.bf16.msra.mxu0 %v4479_v21  ;;  %v4669_v7 = vld [vmem:[#allocation11 + $0x29c] sm:$0xf0]  ;;  %v4665_v51 = vld [vmem:[#allocation11 + $0x284] sm:$0xf] }
  0xc4   : > { %2384 = vmatpush.bf16.msrb.mxu1 %v3615_v56  ;;  %v4094_v8 = vld [vmem:[#allocation11 + $0x480] sm:$0xf]  ;;  %v3839_v18 = vor.u32 %v4669_v7, %v3838_v5  ;;  %v3840_v52 = vld [vmem:[#allocation11 + $0x2a0] sm:$0xf0] }
  0xc5   : > { %2408 = vmatpush.bf16.msrb.mxu3 %v4255_v23  ;;  %2396 = vmatpush.bf16.msrb.mxu2 %v3935_v41  ;;  %v4733_v12 = vld [vmem:[#allocation11 + $0x49c] sm:$0xf0] }
  0xc6   : > { %v3550_v14 = vld [vmem:[#allocation11 + $0x40] sm:$0xf]  ;;  %v4095_v19 = vor.u32 %v4733_v12, %v4094_v8  ;;  %v4617_v12 = vld [vmem:[#allocation11 + $0x104] sm:$0xf] }
  0xc7   : > { %2424 = vmatpush.bf16.msra.mxu0 %v4447_v34  ;;  %v4597_v15 = vld [vmem:[#allocation11 + $0x5c] sm:$0xf0] }
  0xc8   : > { %v4318_v16 = vld [vmem:[#allocation11 + $0x640] sm:$0xf]  ;;  %2385 = vmatpush.bf16.msrb.mxu1 %v3583_v6  ;;  %v3551_v22 = vor.u32 %v4597_v15, %v3550_v14  ;;  %v4809_v14 = vld [vmem:[#allocation11 + $0x704] sm:$0xf] }
  0xc9   : > { %2409 = vmatpush.bf16.msrb.mxu3 %v4223_v31  ;;  %2397 = vmatpush.bf16.msrb.mxu2 %v3903_v53  ;;  %v4789_v17 = vld [vmem:[#allocation11 + $0x65c] sm:$0xf0]  ;;  %v3744_v31 = vld [vmem:[#allocation11 + $0x1e0] sm:$0xf0] }
  0xca   : > { %v3806_v20 = vld [vmem:[#allocation11 + $0x240] sm:$0xf]  ;;  %v4319_v10 = vor.u32 %v4789_v17, %v4318_v16  ;;  %v3747_v49 = vor.u32 %v4641_v30, %v3744_v31  ;;  %v4825_v53 = vld [vmem:[#allocation11 + $0x784] sm:$0xf] }
  0xcb   : > { %2425 = vmatpush.bf16.msra.mxu0 %v4415_v48  ;;  %v4661_v23 = vld [vmem:[#allocation11 + $0x25c] sm:$0xf0]  ;;  %v4256_v48 = vld [vmem:[#allocation11 + $0x5e0] sm:$0xf0] }
  0xcc   : > { %v3518_v27 = vld [vmem:[#allocation11] sm:$0xf]  ;;  %v3807_v34 = vor.u32 %v4661_v23, %v3806_v20  ;;  %2386 = vmatpush.bf16.msrb.mxu1 %v3551_v22  ;;  %v4259_v58 = vor.u32 %v4769_v47, %v4256_v48  ;;  %v4416_v15 = vld [vmem:[#allocation11 + $0x720] sm:$0xf0] }
  0xcd   : > { %2410 = vmatpush.bf16.msrb.mxu3 %v4191_v42  ;;  %2398 = vmatpush.bf16.msrb.mxu2 %v3871_v3  ;;  %v4589_v9 = vld [vmem:[#allocation11 + $0x1c] sm:$0xf0]  ;;  %v4705_v42 = vld [vmem:[#allocation11 + $0x3c4] sm:$0xf]  ;;  %v4419_v17 = vor.u32 %v4809_v14, %v4416_v15  ;;  %v588_v14 = vld [vmem:[#allocation9] sm:$0xf] }
  0xce   : > { %v3774_v38 = vld [vmem:[#allocation11 + $0x200] sm:$0xf]  ;;  %v3519_v44 = vor.u32 %v4589_v9, %v3518_v27  ;;  %v4003_v57 = vor.u32 %v4705_v42, %v4000_v46  ;;  %v4817_v3 = vld [vmem:[#allocation11 + $0x744] sm:$0xf] }
  0xcf   : > { %2426 = vmatpush.bf16.msra.mxu0 %v4383_v61  ;;  %v4653_v39 = vld [vmem:[#allocation11 + $0x21c] sm:$0xf0]  ;;  %v4761_v61 = vld [vmem:[#allocation11 + $0x584] sm:$0xf] }
  0xd0   : > { %v4717_v41 = vld [vmem:[#allocation11 + $0x41c] sm:$0xf0]  ;;  %v3775_v55 = vor.u32 %v4653_v39, %v3774_v38  ;;  %2387 = vmatpush.bf16.msrb.mxu1 %v3519_v44  ;;  %v4227_v6 = vor.u32 %v4761_v61, %v4224_v62  ;;  %v4753_v20 = vld [vmem:[#allocation11 + $0x544] sm:$0xf] }
  0xd1   : > { %2411 = vmatpush.bf16.msrb.mxu3 %v4159_v54  ;;  %2399 = vmatpush.bf16.msrb.mxu2 %v3839_v18  ;;  %v4480_v54 = vld [vmem:[#allocation11 + $0x7a0] sm:$0xf0]  ;;  %v4031_v56 = vor.u32 %v4717_v41, %v4030_v40 }
  0xd2   : > { %v4483_v0 = vor.u32 %v4825_v53, %v4480_v54  ;;  %v4689_v18 = vld [vmem:[#allocation11 + $0x344] sm:$0xf]  ;;  %v3843_v54 = vor.u32 %v4665_v51, %v3840_v52  ;;  %v4262_v51 = vld [vmem:[#allocation11 + $0x5c8] sm:$0xf] }
  0xd3   : > { %2427 = vmatpush.bf16.msra.mxu0 %v4351_v13  ;;  %v3648_v13 = vld [vmem:[#allocation11 + $0x120] sm:$0xf0]  ;;  %v4774_v52 = vld [vmem:[#allocation11 + $0x5e4] sm:$0xf0] }
  0xd4   : > { %v3651_v16 = vor.u32 %v4617_v12, %v3648_v13  ;;  %v4192_v22 = vld [vmem:[#allocation11 + $0x560] sm:$0xf0] }
  0xd5   : > { %2412 = vmatpush.bf16.msrb.mxu3 %v4127_v4  ;;  %2400 = vmatpush.bf16.msrb.mxu2 %v3807_v34  ;;  %v4448_v4 = vld [vmem:[#allocation11 + $0x760] sm:$0xf0]  ;;  %v4195_v23 = vor.u32 %v4753_v20, %v4192_v22 }
  0xd6   : > { %v4451_v8 = vor.u32 %v4817_v3, %v4448_v4  ;;  %v4384_v27 = vld [vmem:[#allocation11 + $0x6e0] sm:$0xf0] }
  0xd7   : > { %2428 = vmatpush.bf16.msra.mxu0 %v4319_v10  ;;  %v4801_v10 = vld [vmem:[#allocation11 + $0x6c4] sm:$0xf] }
  0xd8   : > { %v4387_v9 = vor.u32 %v4801_v10, %v4384_v27  ;;  %v4160_v31 = vld [vmem:[#allocation11 + $0x520] sm:$0xf0]  ;;  %v3750_v10 = vld [vmem:[#allocation11 + $0x1c8] sm:$0xf] }
  0xd9   : > { %2413 = vmatpush.bf16.msrb.mxu3 %v4095_v19  ;;  %2401 = vmatpush.bf16.msrb.mxu2 %v3775_v55  ;;  %v3936_v19 = vld [vmem:[#allocation11 + $0x360] sm:$0xf0]  ;;  %v4163_v32 = vor.u32 %v4745_v29, %v4160_v31  ;;  %v4646_v27 = vld [vmem:[#allocation11 + $0x1e4] sm:$0xf0] }
  0xda   : > { %v3584_v34 = vld [vmem:[#allocation11 + $0xa0] sm:$0xf0]  ;;  %v4838_v29 = vld [vmem:[#allocation11 + $0x7e4] sm:$0xf0] }
  0xdb   : > { %2429 = vmatpush.bf16.msra.mxu0 %v4287_v45  ;;  %v4673_v39 = vld [vmem:[#allocation11 + $0x2c4] sm:$0xf] }
  0xdc   : > { %v3872_v40 = vld [vmem:[#allocation11 + $0x2e0] sm:$0xf0] }
  0xdd   : > { %2414 = vmatpush.bf16.msrb.mxu3 %v4063_v35  ;;  %v3587_v35 = vor.u32 %v4601_v33, %v3584_v34  ;;  %v3875_v41 = vor.u32 %v4673_v39, %v3872_v40  ;;  %v4737_v42 = vld [vmem:[#allocation11 + $0x4c4] sm:$0xf]  ;;  %v3751_v34 = vor.u32 %v4646_v27, %v3750_v10  ;;  %v4638_v39 = vld [vmem:[#allocation11 + $0x1a4] sm:$0xf0] }
  0xde   : > { %v4593_v45 = vld [vmem:[#allocation11 + $0x44] sm:$0xf]  ;;  %v4806_v10 = vld [vmem:[#allocation11 + $0x6e4] sm:$0xf0] }
  0xdf   : > { %v3552_v46 = vld [vmem:[#allocation11 + $0x60] sm:$0xf0] }
  0xe0   : > { %v4785_v47 = vld [vmem:[#allocation11 + $0x644] sm:$0xf]  ;;  %v3555_v48 = vor.u32 %v4593_v45, %v3552_v46 }
  0xe1   : > { %2415 = vmatpush.bf16.msrb.mxu3 %v4031_v56  ;;  %v4729_v53 = vld [vmem:[#allocation11 + $0x484] sm:$0xf] }
  0xe2   : > { %v4096_v55 = vld [vmem:[#allocation11 + $0x4a0] sm:$0xf0] }
  0xe3   : > { %v4099_v56 = vor.u32 %v4729_v53, %v4096_v55  ;;  %v4288_v61 = vld [vmem:[#allocation11 + $0x620] sm:$0xf0] }
  0xe4   : > { %v4064_v3 = vld [vmem:[#allocation11 + $0x460] sm:$0xf0] }
  0xe5   : > { %v4032_v12 = vld [vmem:[#allocation11 + $0x420] sm:$0xf0] }
 0x13b   : > { %v548_v60 = vpop.f32.mrf.mxu0 }
 0x13c   : > { %v549_v21 = vadd.f32 %v4963_v2, %v548_v60  ;;  %v3968_v60 = vld [vmem:[#allocation11 + $0x3a0] sm:$0xf0] }
 0x13d   : > { %v3971_v5 = vor.u32 %v4697_v59, %v3968_v60  ;;  %v4777_v59 = vld [vmem:[#allocation11 + $0x604] sm:$0xf] }
 0x13e   : > { %v553_v36 = vmax.f32 %v549_v21, 0.0  ;;  %v3939_v21 = vor.u32 %v4689_v18, %v3936_v19  ;;  %v4291_v62 = vor.u32 %v4777_v59, %v4288_v61  ;;  %v593_v18 = vperm.slane %v588_v14, 3  ;;  %v4454_v61 = vld [vmem:[#allocation11 + $0x748] sm:$0xf] }
 0x143   : > { %v550_v26 = vpop.f32.mrf.mxu0 }
 0x144   : > { %v551_v11 = vadd.f32 %v4963_v2, %v550_v26  ;;  %v3680_v2 = vld [vmem:[#allocation11 + $0x160] sm:$0xf0]  ;;  %v3619_v26 = vor.u32 %v4609_v24, %v3616_v25  ;;  %v591_v24 = vperm.slane %v588_v14, 1 }
 0x145   : > { %v3683_v7 = vor.u32 %v4625_v1, %v3680_v2  ;;  %v4721_v1 = vld [vmem:[#allocation11 + $0x444] sm:$0xf] }
 0x146   : > { %v554_v37 = vmax.f32 %v551_v11, 0.0  ;;  %v4681_v11 = vld [vmem:[#allocation11 + $0x304] sm:$0xf]  ;;  %v4067_v4 = vor.u32 %v4721_v1, %v4064_v3  ;;  %v3974_v1 = vld [vmem:[#allocation11 + $0x388] sm:$0xf] }
 0x147   : > { %v3907_v30 = vor.u32 %v4681_v11, %v3904_v28  ;;  %v4518_v28 = vld [vmem:[#allocation11 + $0x7c8] sm:$0xf] }
 0x148   : > { %v555_v43 = vpack.c.bf16 %v554_v37, %v553_v36  ;;  %v4793_v36 = vld [vmem:[#allocation11 + $0x684] sm:$0xf] }
 0x149   : > { %v4352_v37 = vld [vmem:[#allocation11 + $0x6a0] sm:$0xf0] }
 0x14a   : > { %766 = vmatmul.bf16.vlgmr.msra.gmra.mxu1 %v555_v43  ;;  %780 = vmatmul.bf16.vlgmr.msra.gmra.mxu2 %v555_v43  ;;  %v4355_v38 = vor.u32 %v4793_v36, %v4352_v37  ;;  %v4519_v37 = vor.u32 %v4838_v29, %v4518_v28  ;;  %v4166_v29 = vld [vmem:[#allocation11 + $0x508] sm:$0xf] }
 0x14b   : > { %794 = vmatmul.bf16.vlgmr.msra.gmra.mxu3 %v555_v43  ;;  %808 = vmatmul.bf16.vlgmr.msrb.gmra.mxu0 %v555_v43  ;;  %v4128_v43 = vld [vmem:[#allocation11 + $0x4e0] sm:$0xf0] }
 0x14c   : > { %2436 = vmatpush.bf16.msra.mxu1 %v3747_v49  ;;  %2478 = vmatpush.bf16.msrb.mxu0 %v4515_v50  ;;  %v4131_v44 = vor.u32 %v4737_v42, %v4128_v43  ;;  %v4320_v49 = vld [vmem:[#allocation11 + $0x660] sm:$0xf0]  ;;  %v4486_v43 = vld [vmem:[#allocation11 + $0x788] sm:$0xf] }
 0x14d   : > { %2450 = vmatpush.bf16.msra.mxu2 %v4003_v57  ;;  %2464 = vmatpush.bf16.msra.mxu3 %v4259_v58  ;;  %v4323_v50 = vor.u32 %v4785_v47, %v4320_v49  ;;  %v4585_v57 = vld [vmem:[#allocation11 + $0x4] sm:$0xf]  ;;  %v4006_v47 = vld [vmem:[#allocation11 + $0x3c8] sm:$0xf] }
 0x14e   : > { %v3520_v58 = vld [vmem:[#allocation11 + $0x20] sm:$0xf0] }
 0x14f   : > { %v3523_v60 = vor.u32 %v4585_v57, %v3520_v58  ;;  %v4630_v57 = vld [vmem:[#allocation11 + $0x164] sm:$0xf0] }
 0x150   : > { %2437 = vmatpush.bf16.msra.mxu1 %v3715_v63  ;;  %2479 = vmatpush.bf16.msrb.mxu0 %v4483_v0  ;;  %v4657_v63 = vld [vmem:[#allocation11 + $0x244] sm:$0xf] }
 0x151   : > { %2451 = vmatpush.bf16.msra.mxu2 %v3971_v5  ;;  %2465 = vmatpush.bf16.msra.mxu3 %v4227_v6  ;;  %v3808_v0 = vld [vmem:[#allocation11 + $0x260] sm:$0xf0] }
 0x152   : > { %v3811_v2 = vor.u32 %v4657_v63, %v3808_v0  ;;  %v4649_v5 = vld [vmem:[#allocation11 + $0x204] sm:$0xf]  ;;  %v4263_v0 = vor.u32 %v4774_v52, %v4262_v51  ;;  %v3846_v52 = vld [vmem:[#allocation11 + $0x288] sm:$0xf] }
 0x153   : > { %v3776_v6 = vld [vmem:[#allocation11 + $0x220] sm:$0xf0] }
 0x154   : > { %2438 = vmatpush.bf16.msra.mxu1 %v3683_v7  ;;  %2480 = vmatpush.bf16.msrb.mxu0 %v4451_v8  ;;  %v3779_v7 = vor.u32 %v4649_v5, %v3776_v6  ;;  %v4713_v8 = vld [vmem:[#allocation11 + $0x404] sm:$0xf]  ;;  %v4230_v5 = vld [vmem:[#allocation11 + $0x588] sm:$0xf] }
 0x155   : > { %2452 = vmatpush.bf16.msra.mxu2 %v3939_v21  ;;  %2466 = vmatpush.bf16.msra.mxu3 %v4195_v23  ;;  %v4035_v13 = vor.u32 %v4713_v8, %v4032_v12  ;;  %v4766_v6 = vld [vmem:[#allocation11 + $0x5a4] sm:$0xf0] }
 0x156   : > { %v3654_v8 = vld [vmem:[#allocation11 + $0x108] sm:$0xf] }
 0x157   : > { %v4622_v12 = vld [vmem:[#allocation11 + $0x124] sm:$0xf0] }
 0x158   : > { %2439 = vmatpush.bf16.msra.mxu1 %v3651_v16  ;;  %2481 = vmatpush.bf16.msrb.mxu0 %v4419_v17  ;;  %v590_v17 = vperm.slane %v588_v14, 0 }
 0x159   : > { %2453 = vmatpush.bf16.msra.mxu2 %v3907_v30  ;;  %2467 = vmatpush.bf16.msra.mxu3 %v4163_v32 }
 0x15c   : > { %2440 = vmatpush.bf16.msra.mxu1 %v3619_v26  ;;  %2482 = vmatpush.bf16.msrb.mxu0 %v4387_v9  ;;  %v592_v9 = vperm.slane %v588_v14, 2  ;;  %v4422_v14 = vld [vmem:[#allocation11 + $0x708] sm:$0xf] }
 0x15d   : > { %2454 = vmatpush.bf16.msra.mxu2 %v3875_v41  ;;  %2468 = vmatpush.bf16.msra.mxu3 %v4131_v44  ;;  %v4830_v44 = vld [vmem:[#allocation11 + $0x7a4] sm:$0xf0] }
 0x15e   : > { %v4487_v55 = vor.u32 %v4830_v44, %v4486_v43  ;;  %v4134_v43 = vld [vmem:[#allocation11 + $0x4c8] sm:$0xf] }
 0x15f   : > { %v4742_v44 = vld [vmem:[#allocation11 + $0x4e4] sm:$0xf0] }
 0x160   : > { %2441 = vmatpush.bf16.msra.mxu1 %v3587_v35  ;;  %2483 = vmatpush.bf16.msrb.mxu0 %v4355_v38  ;;  %v3718_v38 = vld [vmem:[#allocation11 + $0x188] sm:$0xf]  ;;  %v4135_v51 = vor.u32 %v4742_v44, %v4134_v43  ;;  %v4762_v43 = vld [vmem:[#allocation11 + $0x58c] sm:$0xf] }
 0x161   : > { %2455 = vmatpush.bf16.msra.mxu2 %v3843_v54  ;;  %2469 = vmatpush.bf16.msra.mxu3 %v4099_v56  ;;  %v3686_v56 = vld [vmem:[#allocation11 + $0x148] sm:$0xf]  ;;  %v4232_v44 = vld [vmem:[#allocation11 + $0x5a8] sm:$0xf0] }
 0x164   : > { %2442 = vmatpush.bf16.msra.mxu1 %v3555_v48  ;;  %2484 = vmatpush.bf16.msrb.mxu0 %v4323_v50  ;;  %v4710_v48 = vld [vmem:[#allocation11 + $0x3e4] sm:$0xf0]  ;;  %v3719_v50 = vor.u32 %v4638_v39, %v3718_v38 }
 0x165   : > { %2456 = vmatpush.bf16.msra.mxu2 %v3811_v2  ;;  %2470 = vmatpush.bf16.msra.mxu3 %v4067_v4  ;;  %v4702_v2 = vld [vmem:[#allocation11 + $0x3a4] sm:$0xf0]  ;;  %v3687_v4 = vor.u32 %v4630_v57, %v3686_v56 }
 0x166   : > { %v3878_v39 = vld [vmem:[#allocation11 + $0x2c8] sm:$0xf] }
 0x167   : > { %v4734_v56 = vld [vmem:[#allocation11 + $0x4a4] sm:$0xf0] }
 0x168   : > { %2443 = vmatpush.bf16.msra.mxu1 %v3523_v60  ;;  %2485 = vmatpush.bf16.msrb.mxu0 %v4291_v62  ;;  %v4007_v60 = vor.u32 %v4710_v48, %v4006_v47  ;;  %v4822_v62 = vld [vmem:[#allocation11 + $0x764] sm:$0xf0] }
 0x169   : > { %2457 = vmatpush.bf16.msra.mxu2 %v3779_v7  ;;  %2471 = vmatpush.bf16.msra.mxu3 %v4035_v13  ;;  %v4455_v7 = vor.u32 %v4822_v62, %v4454_v61  ;;  %v3975_v13 = vor.u32 %v4702_v2, %v3974_v1  ;;  %v4598_v47 = vld [vmem:[#allocation11 + $0x64] sm:$0xf0]  ;;  %v3752_v1 = vld [vmem:[#allocation11 + $0x1e8] sm:$0xf0] }
 0x16a   : > { %v3526_v57 = vld [vmem:[#allocation11 + $0x8] sm:$0xf]  ;;  %v4834_v2 = vld [vmem:[#allocation11 + $0x7cc] sm:$0xf] }
 0x16b   : > { %v4782_v61 = vld [vmem:[#allocation11 + $0x624] sm:$0xf0] }
 0x1c7   : > { %v767_v15 = vpop.f32.mrf.mxu1 }
 0x1c8   : > { %v809_v16 = vpop.f32.mrf.mxu0  ;;  %v768_v20 = vadd.f32 %v767_v15, %v590_v17  ;;  %v4814_v15 = vld [vmem:[#allocation11 + $0x724] sm:$0xf0] }
 0x1c9   : > { %v810_v22 = vadd.f32 %v809_v16, %v593_v18  ;;  %v4231_v16 = vor.u32 %v4766_v6, %v4230_v5  ;;  %v4520_v5 = vld [vmem:[#allocation11 + $0x7e8] sm:$0xf0]  ;;  %v3814_v6 = vld [vmem:[#allocation11 + $0x248] sm:$0xf] }
 0x1ca   : > { %v814_v30 = vmax.f32 %v768_v20, 0.0  ;;  %v4198_v20 = vld [vmem:[#allocation11 + $0x548] sm:$0xf] }
 0x1cb   : > { %v817_v32 = vmax.f32 %v810_v22, 0.0  ;;  %v4423_v22 = vor.u32 %v4814_v15, %v4422_v14 }
 0x1cd   : > { %v781_v19 = vpop.f32.mrf.mxu2 }
 0x1ce   : > { %v795_v21 = vpop.f32.mrf.mxu3  ;;  %v782_v35 = vadd.f32 %v781_v19, %v591_v24  ;;  %v3655_v19 = vor.u32 %v4622_v12, %v3654_v8  ;;  %v4070_v12 = vld [vmem:[#allocation11 + $0x448] sm:$0xf] }
 0x1cf   : > { %v769_v23 = vpop.f32.mrf.mxu1  ;;  %v796_v40 = vadd.f32 %v795_v21, %v592_v9  ;;  %v4758_v21 = vld [vmem:[#allocation11 + $0x564] sm:$0xf0] }
 0x1d0   : > { %v770_v25 = vadd.f32 %v769_v23, %v590_v17  ;;  %v811_v26 = vpop.f32.mrf.mxu0  ;;  %v815_v53 = vmax.f32 %v782_v35, 0.0  ;;  %v3942_v17 = vld [vmem:[#allocation11 + $0x348] sm:$0xf]  ;;  %v4199_v27 = vor.u32 %v4758_v21, %v4198_v20  ;;  %v4826_v20 = vld [vmem:[#allocation11 + $0x78c] sm:$0xf] }
 0x1d1   : > { %v812_v11 = vadd.f32 %v811_v26, %v593_v18  ;;  %v816_v58 = vmax.f32 %v796_v40, 0.0  ;;  %v4694_v18 = vld [vmem:[#allocation11 + $0x364] sm:$0xf0]  ;;  %v4488_v21 = vld [vmem:[#allocation11 + $0x7a8] sm:$0xf0] }
 0x1d2   : > { %v818_v31 = vmax.f32 %v770_v25, 0.0  ;;  %v3622_v23 = vld [vmem:[#allocation11 + $0xc8] sm:$0xf]  ;;  %v3943_v25 = vor.u32 %v4694_v18, %v3942_v17  ;;  %v4523_v17 = vor.u32 %v4834_v2, %v4520_v5  ;;  %v3912_v2 = vld [vmem:[#allocation11 + $0x328] sm:$0xf0] }
 0x1d3   : > { %v821_v33 = vmax.f32 %v812_v11, 0.0  ;;  %v4390_v26 = vld [vmem:[#allocation11 + $0x6c8] sm:$0xf]  ;;  %v4746_v5 = vld [vmem:[#allocation11 + $0x50c] sm:$0xf] }
 0x1d4   : > { %v5416_v36 = vpack.c.bf16 %v818_v31, %v814_v30  ;;  %v4686_v11 = vld [vmem:[#allocation11 + $0x324] sm:$0xf0]  ;;  %v4391_v31 = vor.u32 %v4806_v10, %v4390_v26  ;;  %v4706_v10 = vld [vmem:[#allocation11 + $0x3cc] sm:$0xf] }
 0x1d5   : > { %v5418_v41 = vpack.c.bf16 %v821_v33, %v817_v32  ;;  %v783_v42 = vpop.f32.mrf.mxu2  ;;  %v4750_v30 = vld [vmem:[#allocation11 + $0x524] sm:$0xf0] }
 0x1d6   : > { %v784_v45 = vadd.f32 %v783_v42, %v591_v24  ;;  %v797_v46 = vpop.f32.mrf.mxu3  ;;  %2388 = vmatmul.bf16.vlgmr.msrb.gmra.mxu1 %v5416_v36  ;;  %v4614_v24 = vld [vmem:[#allocation11 + $0xe4] sm:$0xf0]  ;;  %v4167_v38 = vor.u32 %v4750_v30, %v4166_v29  ;;  %v4491_v29 = vor.u32 %v4826_v20, %v4488_v21  ;;  %v4738_v20 = vld [vmem:[#allocation11 + $0x4cc] sm:$0xf] }
 0x1d7   : > { %v798_v49 = vadd.f32 %v797_v46, %v592_v9  ;;  %2430 = vmatmul.bf16.vlgmr.msra.gmra.mxu0 %v5418_v41  ;;  %2492 = vmatpush.bf16.msrb.mxu1 %v3751_v34  ;;  %v3910_v9 = vld [vmem:[#allocation11 + $0x308] sm:$0xf]  ;;  %v3623_v28 = vor.u32 %v4614_v24, %v3622_v23  ;;  %v4136_v21 = vld [vmem:[#allocation11 + $0x4e8] sm:$0xf0] }
 0x1d8   : > { %v819_v54 = vmax.f32 %v784_v45, 0.0  ;;  %2534 = vmatpush.bf16.msra.mxu0 %v4519_v37  ;;  %v3590_v32 = vld [vmem:[#allocation11 + $0x88] sm:$0xf]  ;;  %v3911_v34 = vor.u32 %v4686_v11, %v3910_v9  ;;  %v4770_v11 = vld [vmem:[#allocation11 + $0x5cc] sm:$0xf] }
 0x1d9   : > { %v820_v59 = vmax.f32 %v798_v49, 0.0  ;;  %v4606_v33 = vld [vmem:[#allocation11 + $0xa4] sm:$0xf0] }
 0x1da   : > { %v5422_v63 = vpack.c.bf16 %v819_v54, %v815_v53  ;;  %v4358_v35 = vld [vmem:[#allocation11 + $0x688] sm:$0xf]  ;;  %v3591_v42 = vor.u32 %v4606_v33, %v3590_v32  ;;  %v3688_v32 = vld [vmem:[#allocation11 + $0x168] sm:$0xf0] }
 0x1db   : > { %v5424_v3 = vpack.c.bf16 %v820_v59, %v816_v58  ;;  %2493 = vmatpush.bf16.msrb.mxu1 %v3719_v50  ;;  %v4798_v37 = vld [vmem:[#allocation11 + $0x6a4] sm:$0xf0] }
 0x1dc   : > { %2535 = vmatpush.bf16.msra.mxu0 %v4487_v55  ;;  %2402 = vmatmul.bf16.vlgmr.msrb.gmra.mxu2 %v5422_v63  ;;  %v4678_v40 = vld [vmem:[#allocation11 + $0x2e4] sm:$0xf0]  ;;  %v4359_v45 = vor.u32 %v4798_v37, %v4358_v35  ;;  %v4818_v35 = vld [vmem:[#allocation11 + $0x74c] sm:$0xf] }
 0x1dd   : > { %2416 = vmatmul.bf16.vlgmr.msrb.gmra.mxu3 %v5424_v3  ;;  %2506 = vmatpush.bf16.msrb.mxu2 %v4007_v60  ;;  %v3558_v46 = vld [vmem:[#allocation11 + $0x48] sm:$0xf]  ;;  %v3879_v48 = vor.u32 %v4678_v40, %v3878_v39  ;;  %v4456_v37 = vld [vmem:[#allocation11 + $0x768] sm:$0xf0] }
 0x1de   : > { %2520 = vmatpush.bf16.msrb.mxu3 %v4263_v0  ;;  %v4326_v49 = vld [vmem:[#allocation11 + $0x648] sm:$0xf]  ;;  %v3559_v54 = vor.u32 %v4598_v47, %v3558_v46  ;;  %v4642_v0 = vld [vmem:[#allocation11 + $0x1cc] sm:$0xf] }
 0x1df   : > { %2494 = vmatpush.bf16.msrb.mxu1 %v3687_v4  ;;  %v4790_v50 = vld [vmem:[#allocation11 + $0x664] sm:$0xf0]  ;;  %v3755_v15 = vor.u32 %v4642_v0, %v3752_v1  ;;  %v4698_v39 = vld [vmem:[#allocation11 + $0x38c] sm:$0xf] }
 0x1e0   : > { %2536 = vmatpush.bf16.msra.mxu0 %v4455_v7  ;;  %v4670_v53 = vld [vmem:[#allocation11 + $0x2a4] sm:$0xf0]  ;;  %v4327_v58 = vor.u32 %v4790_v50, %v4326_v49  ;;  %v3976_v40 = vld [vmem:[#allocation11 + $0x3a8] sm:$0xf0] }
 0x1e1   : > { %2507 = vmatpush.bf16.msrb.mxu2 %v3975_v13  ;;  %v4102_v55 = vld [vmem:[#allocation11 + $0x488] sm:$0xf]  ;;  %v3847_v62 = vor.u32 %v4670_v53, %v3846_v52  ;;  %v4618_v46 = vld [vmem:[#allocation11 + $0x10c] sm:$0xf] }
 0x1e2   : > { %2521 = vmatpush.bf16.msrb.mxu3 %v4231_v16  ;;  %v4590_v59 = vld [vmem:[#allocation11 + $0x24] sm:$0xf0]  ;;  %v4103_v4 = vor.u32 %v4734_v56, %v4102_v55  ;;  %v4634_v16 = vld [vmem:[#allocation11 + $0x18c] sm:$0xf] }
 0x1e3   : > { %2495 = vmatpush.bf16.msrb.mxu1 %v3655_v19  ;;  %v4294_v60 = vld [vmem:[#allocation11 + $0x608] sm:$0xf]  ;;  %v3527_v8 = vor.u32 %v4590_v59, %v3526_v57  ;;  %v3720_v19 = vld [vmem:[#allocation11 + $0x1a8] sm:$0xf0] }
 0x1e4   : > { %2537 = vmatpush.bf16.msra.mxu0 %v4423_v22  ;;  %v4662_v7 = vld [vmem:[#allocation11 + $0x264] sm:$0xf0]  ;;  %v4295_v14 = vor.u32 %v4782_v61, %v4294_v60  ;;  %v3723_v9 = vor.u32 %v4634_v16, %v3720_v19  ;;  %v3656_v47 = vld [vmem:[#allocation11 + $0x128] sm:$0xf0] }
 0x1e5   : > { %2508 = vmatpush.bf16.msrb.mxu2 %v3943_v25  ;;  %v4726_v13 = vld [vmem:[#allocation11 + $0x464] sm:$0xf0]  ;;  %v3815_v18 = vor.u32 %v4662_v7, %v3814_v6  ;;  %v4810_v49 = vld [vmem:[#allocation11 + $0x70c] sm:$0xf] }
 0x1e6   : > { %2522 = vmatpush.bf16.msrb.mxu3 %v4199_v27  ;;  %2444 = vmatmul.bf16.vlgmr.msra.gmra.mxu1 %v5416_v36  ;;  %v4071_v22 = vor.u32 %v4726_v13, %v4070_v12  ;;  %v3782_v23 = vld [vmem:[#allocation11 + $0x208] sm:$0xf]  ;;  %v4008_v27 = vld [vmem:[#allocation11 + $0x3e8] sm:$0xf0] }
 0x1e7   : > { %2486 = vmatmul.bf16.vlgmr.msrb.gmra.mxu0 %v5418_v41  ;;  %2496 = vmatpush.bf16.msrb.mxu1 %v3623_v28  ;;  %v4654_v24 = vld [vmem:[#allocation11 + $0x224] sm:$0xf0]  ;;  %v4264_v28 = vld [vmem:[#allocation11 + $0x5e8] sm:$0xf0] }
 0x1e8   : > { %2538 = vmatpush.bf16.msra.mxu0 %v4391_v31  ;;  %v4038_v25 = vld [vmem:[#allocation11 + $0x408] sm:$0xf]  ;;  %v3783_v30 = vor.u32 %v4654_v24, %v3782_v23  ;;  %v4626_v31 = vld [vmem:[#allocation11 + $0x14c] sm:$0xf] }
 0x1e9   : > { %2509 = vmatpush.bf16.msrb.mxu2 %v3911_v34  ;;  %v4718_v26 = vld [vmem:[#allocation11 + $0x424] sm:$0xf0]  ;;  %v4011_v34 = vor.u32 %v4706_v10, %v4008_v27  ;;  %v4424_v50 = vld [vmem:[#allocation11 + $0x728] sm:$0xf0]  ;;  %v4139_v27 = vor.u32 %v4738_v20, %v4136_v21  ;;  %v4238_v20 = vld [vmem:[#allocation11 + $0x590] sm:$0xf] }
 0x1ea   : > { %2523 = vmatpush.bf16.msrb.mxu3 %v4167_v38  ;;  %v4039_v33 = vor.u32 %v4718_v26, %v4038_v25  ;;  %v4267_v38 = vor.u32 %v4770_v11, %v4264_v28  ;;  %v4690_v52 = vld [vmem:[#allocation11 + $0x34c] sm:$0xf]  ;;  %v4427_v57 = vor.u32 %v4810_v49, %v4424_v50  ;;  %v4767_v21 = vld [vmem:[#allocation11 + $0x5ac] sm:$0xf0] }
 0x1eb   : > { %2497 = vmatpush.bf16.msrb.mxu1 %v3591_v42  ;;  %v3691_v42 = vor.u32 %v4626_v31, %v3688_v32  ;;  %v3944_v53 = vld [vmem:[#allocation11 + $0x368] sm:$0xf0] }
 0x1ec   : > { %2539 = vmatpush.bf16.msra.mxu0 %v4359_v45  ;;  %2458 = vmatmul.bf16.vlgmr.msra.gmra.mxu2 %v5422_v63  ;;  %v4459_v45 = vor.u32 %v4818_v35, %v4456_v37  ;;  %v4754_v55 = vld [vmem:[#allocation11 + $0x54c] sm:$0xf]  ;;  %v3947_v60 = vor.u32 %v4690_v52, %v3944_v53 }
 0x1ed   : > { %2472 = vmatmul.bf16.vlgmr.msra.gmra.mxu3 %v5424_v3  ;;  %2510 = vmatpush.bf16.msrb.mxu2 %v3879_v48  ;;  %v3979_v48 = vor.u32 %v4698_v39, %v3976_v40  ;;  %v4200_v56 = vld [vmem:[#allocation11 + $0x568] sm:$0xf0]  ;;  %v4647_v39 = vld [vmem:[#allocation11 + $0x1ec] sm:$0xf0] }
 0x1ee   : > { %2524 = vmatpush.bf16.msrb.mxu3 %v4135_v51  ;;  %v4235_v51 = vor.u32 %v4762_v43, %v4232_v44  ;;  %v3624_v59 = vld [vmem:[#allocation11 + $0xe8] sm:$0xf0]  ;;  %v4203_v0 = vor.u32 %v4754_v55, %v4200_v56  ;;  %v4526_v40 = vld [vmem:[#allocation11 + $0x7d0] sm:$0xf] }
 0x1ef   : > { %2498 = vmatpush.bf16.msrb.mxu1 %v3559_v54  ;;  %v3659_v54 = vor.u32 %v4618_v46, %v3656_v47  ;;  %v4802_v61 = vld [vmem:[#allocation11 + $0x6cc] sm:$0xf]  ;;  %v4839_v43 = vld [vmem:[#allocation11 + $0x7ec] sm:$0xf0] }
 0x1f0   : > { %2540 = vmatpush.bf16.msra.mxu0 %v4327_v58  ;;  %v4610_v58 = vld [vmem:[#allocation11 + $0xcc] sm:$0xf]  ;;  %v4527_v52 = vor.u32 %v4839_v43, %v4526_v40  ;;  %v4494_v55 = vld [vmem:[#allocation11 + $0x790] sm:$0xf] }
 0x1f1   : > { %2511 = vmatpush.bf16.msrb.mxu2 %v3847_v62  ;;  %v4392_v62 = vld [vmem:[#allocation11 + $0x6e8] sm:$0xf0]  ;;  %v4831_v56 = vld [vmem:[#allocation11 + $0x7ac] sm:$0xf0] }
 0x1f2   : > { %2525 = vmatpush.bf16.msrb.mxu3 %v4103_v4  ;;  %v4682_v1 = vld [vmem:[#allocation11 + $0x30c] sm:$0xf]  ;;  %v3627_v4 = vor.u32 %v4610_v58, %v3624_v59  ;;  %v4395_v7 = vor.u32 %v4802_v61, %v4392_v62  ;;  %v4014_v62 = vld [vmem:[#allocation11 + $0x3d0] sm:$0xf] }
 0x1f3   : > { %2499 = vmatpush.bf16.msrb.mxu1 %v3527_v8  ;;  %v4168_v6 = vld [vmem:[#allocation11 + $0x528] sm:$0xf0]  ;;  %v3915_v13 = vor.u32 %v4682_v1, %v3912_v2  ;;  %v4270_v2 = vld [vmem:[#allocation11 + $0x5d0] sm:$0xf] }
 0x1f4   : > { %2541 = vmatpush.bf16.msra.mxu0 %v4295_v14  ;;  %v4602_v8 = vld [vmem:[#allocation11 + $0x8c] sm:$0xf]  ;;  %v4171_v16 = vor.u32 %v4746_v5, %v4168_v6  ;;  %v4495_v5 = vor.u32 %v4831_v56, %v4494_v55  ;;  %v4687_v40 = vld [vmem:[#allocation11 + $0x32c] sm:$0xf0] }
 0x1f5   : > { %2512 = vmatpush.bf16.msrb.mxu2 %v3815_v18  ;;  %v3592_v12 = vld [vmem:[#allocation11 + $0xa8] sm:$0xf0]  ;;  %v4174_v43 = vld [vmem:[#allocation11 + $0x510] sm:$0xf] }
 0x1f6   : > { %2526 = vmatpush.bf16.msrb.mxu3 %v4071_v22  ;;  %2500 = vmatmul.bf16.vlgmr.msrb.gmra.mxu1 %v5416_v36  ;;  %v4794_v14 = vld [vmem:[#allocation11 + $0x68c] sm:$0xf]  ;;  %v3595_v19 = vor.u32 %v4602_v8, %v3592_v12  ;;  %v4631_v8 = vld [vmem:[#allocation11 + $0x16c] sm:$0xf0] }
 0x1f7   : > { %2548 = vmatpush.bf16.msra.mxu1 %v3755_v15  ;;  %2542 = vmatmul.bf16.vlgmr.msra.gmra.mxu0 %v5418_v41  ;;  %v4360_v15 = vld [vmem:[#allocation11 + $0x6a8] sm:$0xf0]  ;;  %v4142_v55 = vld [vmem:[#allocation11 + $0x4d0] sm:$0xf] }
 0x1f8   : > { %2590 = vmatpush.bf16.msrb.mxu0 %v4523_v17  ;;  %v4674_v17 = vld [vmem:[#allocation11 + $0x2cc] sm:$0xf]  ;;  %v4363_v22 = vor.u32 %v4794_v14, %v4360_v15  ;;  %v4462_v14 = vld [vmem:[#allocation11 + $0x750] sm:$0xf] }
 0x1f9   : > { %2513 = vmatpush.bf16.msrb.mxu2 %v3783_v30  ;;  %v3880_v18 = vld [vmem:[#allocation11 + $0x2e8] sm:$0xf0]  ;;  %v4823_v15 = vld [vmem:[#allocation11 + $0x76c] sm:$0xf0] }
 0x1fa   : > { %2527 = vmatpush.bf16.msrb.mxu3 %v4039_v33  ;;  %v4594_v23 = vld [vmem:[#allocation11 + $0x4c] sm:$0xf]  ;;  %v3883_v25 = vor.u32 %v4674_v17, %v3880_v18  ;;  %v3982_v17 = vld [vmem:[#allocation11 + $0x390] sm:$0xf] }
 0x1fb   : > { %2549 = vmatpush.bf16.msra.mxu1 %v3723_v9  ;;  %v3560_v24 = vld [vmem:[#allocation11 + $0x68] sm:$0xf0]  ;;  %v4703_v18 = vld [vmem:[#allocation11 + $0x3ac] sm:$0xf0] }
 0x1fc   : > { %2591 = vmatpush.bf16.msrb.mxu0 %v4491_v29  ;;  %2514 = vmatmul.bf16.vlgmr.msrb.gmra.mxu2 %v5422_v63  ;;  %v4786_v26 = vld [vmem:[#allocation11 + $0x64c] sm:$0xf]  ;;  %v3563_v28 = vor.u32 %v4594_v23, %v3560_v24  ;;  %v3662_v23 = vld [vmem:[#allocation11 + $0x110] sm:$0xf] }
 0x1fd   : > { %2562 = vmatpush.bf16.msra.mxu2 %v4011_v34  ;;  %2528 = vmatmul.bf16.vlgmr.msrb.gmra.mxu3 %v5424_v3  ;;  %v4328_v10 = vld [vmem:[#allocation11 + $0x668] sm:$0xf0]  ;;  %v4623_v24 = vld [vmem:[#allocation11 + $0x12c] sm:$0xf0] }
 0x1fe   : > { %2576 = vmatpush.bf16.msra.mxu3 %v4267_v38  ;;  %v4666_v9 = vld [vmem:[#allocation11 + $0x28c] sm:$0xf]  ;;  %v4331_v32 = vor.u32 %v4786_v26, %v4328_v10  ;;  %v3758_v38 = vld [vmem:[#allocation11 + $0x1d0] sm:$0xf] }
 0x1ff   : > { %2550 = vmatpush.bf16.msra.mxu1 %v3691_v42  ;;  %v3848_v11 = vld [vmem:[#allocation11 + $0x2a8] sm:$0xf0]  ;;  %v3759_v50 = vor.u32 %v4647_v39, %v3758_v38  ;;  %v4430_v26 = vld [vmem:[#allocation11 + $0x710] sm:$0xf] }
 0x200   : > { %2592 = vmatpush.bf16.msrb.mxu0 %v4459_v45  ;;  %v4730_v29 = vld [vmem:[#allocation11 + $0x48c] sm:$0xf]  ;;  %v3851_v37 = vor.u32 %v4666_v9, %v3848_v11  ;;  %v4815_v10 = vld [vmem:[#allocation11 + $0x72c] sm:$0xf0] }
 0x201   : > { %2563 = vmatpush.bf16.msra.mxu2 %v3979_v48  ;;  %v4104_v30 = vld [vmem:[#allocation11 + $0x4a8] sm:$0xf0]  ;;  %v3950_v9 = vld [vmem:[#allocation11 + $0x350] sm:$0xf] }
 0x202   : > { %2577 = vmatpush.bf16.msra.mxu3 %v4235_v51  ;;  %v4586_v31 = vld [vmem:[#allocation11 + $0xc] sm:$0xf]  ;;  %v4107_v42 = vor.u32 %v4730_v29, %v4104_v30  ;;  %v3726_v51 = vld [vmem:[#allocation11 + $0x190] sm:$0xf] }
 0x203   : > { %2551 = vmatpush.bf16.msra.mxu1 %v3659_v54  ;;  %v3528_v33 = vld [vmem:[#allocation11 + $0x28] sm:$0xf0]  ;;  %v4639_v54 = vld [vmem:[#allocation11 + $0x1ac] sm:$0xf0] }
 0x204   : > { %2593 = vmatpush.bf16.msrb.mxu0 %v4427_v57  ;;  %v4778_v34 = vld [vmem:[#allocation11 + $0x60c] sm:$0xf]  ;;  %v3531_v46 = vor.u32 %v4586_v31, %v3528_v33  ;;  %v3727_v1 = vor.u32 %v4639_v54, %v3726_v51  ;;  %v4695_v11 = vld [vmem:[#allocation11 + $0x36c] sm:$0xf0]  ;;  %v4431_v31 = vor.u32 %v4815_v10, %v4430_v26 }
 0x205   : > { %2564 = vmatpush.bf16.msra.mxu2 %v3947_v60  ;;  %v4296_v35 = vld [vmem:[#allocation11 + $0x628] sm:$0xf0]  ;;  %v4206_v29 = vld [vmem:[#allocation11 + $0x550] sm:$0xf] }
 0x206   : > { %2578 = vmatpush.bf16.msra.mxu3 %v4203_v0  ;;  %v4658_v44 = vld [vmem:[#allocation11 + $0x24c] sm:$0xf]  ;;  %v4299_v49 = vor.u32 %v4778_v34, %v4296_v35  ;;  %v4711_v0 = vld [vmem:[#allocation11 + $0x3ec] sm:$0xf0]  ;;  %v3951_v34 = vor.u32 %v4695_v11, %v3950_v9 }
 0x207   : > { %2552 = vmatpush.bf16.msra.mxu1 %v3627_v4  ;;  %v3816_v45 = vld [vmem:[#allocation11 + $0x268] sm:$0xf0]  ;;  %v4775_v4 = vld [vmem:[#allocation11 + $0x5ec] sm:$0xf0] }
 0x208   : > { %2594 = vmatpush.bf16.msrb.mxu0 %v4395_v7  ;;  %v4722_v47 = vld [vmem:[#allocation11 + $0x44c] sm:$0xf]  ;;  %v3819_v53 = vor.u32 %v4658_v44, %v3816_v45  ;;  %v3694_v7 = vld [vmem:[#allocation11 + $0x150] sm:$0xf] }
 0x209   : > { %2565 = vmatpush.bf16.msra.mxu2 %v3915_v13  ;;  %v4072_v48 = vld [vmem:[#allocation11 + $0x468] sm:$0xf0]  ;;  %v4015_v13 = vor.u32 %v4711_v0, %v4014_v62  ;;  %v4759_v30 = vld [vmem:[#allocation11 + $0x56c] sm:$0xf0] }
 0x20a   : > { %2579 = vmatpush.bf16.msra.mxu3 %v4171_v16  ;;  %v4075_v57 = vor.u32 %v4722_v47, %v4072_v48  ;;  %v4650_v58 = vld [vmem:[#allocation11 + $0x20c] sm:$0xf]  ;;  %v4271_v16 = vor.u32 %v4775_v4, %v4270_v2  ;;  %v4615_v33 = vld [vmem:[#allocation11 + $0xec] sm:$0xf0]  ;;  %v4207_v38 = vor.u32 %v4759_v30, %v4206_v29  ;;  %v4827_v29 = vld [vmem:[#allocation11 + $0x794] sm:$0xf] }
 0x20b   : > { %2553 = vmatpush.bf16.msra.mxu1 %v3595_v19  ;;  %v3784_v59 = vld [vmem:[#allocation11 + $0x228] sm:$0xf0]  ;;  %v3695_v19 = vor.u32 %v4631_v8, %v3694_v7  ;;  %v4398_v35 = vld [vmem:[#allocation11 + $0x6d0] sm:$0xf]  ;;  %v4496_v30 = vld [vmem:[#allocation11 + $0x7b0] sm:$0xf0] }
 0x20c   : > { %2595 = vmatpush.bf16.msrb.mxu0 %v4363_v22  ;;  %v4714_v60 = vld [vmem:[#allocation11 + $0x40c] sm:$0xf]  ;;  %v3787_v6 = vor.u32 %v4650_v58, %v3784_v59  ;;  %v4463_v22 = vor.u32 %v4823_v15, %v4462_v14  ;;  %v3918_v39 = vld [vmem:[#allocation11 + $0x310] sm:$0xf] }
 0x20d   : > { %2566 = vmatpush.bf16.msra.mxu2 %v3883_v25  ;;  %v4040_v61 = vld [vmem:[#allocation11 + $0x428] sm:$0xf0]  ;;  %v3983_v25 = vor.u32 %v4703_v18, %v3982_v17  ;;  %v4751_v44 = vld [vmem:[#allocation11 + $0x52c] sm:$0xf0]  ;;  %v3919_v48 = vor.u32 %v4687_v40, %v3918_v39  ;;  %v3760_v17 = vld [vmem:[#allocation11 + $0x1f0] sm:$0xf0] }
 0x20e   : > { %2580 = vmatpush.bf16.msra.mxu3 %v4139_v27  ;;  %v4043_v12 = vor.u32 %v4714_v60, %v4040_v61  ;;  %v4239_v27 = vor.u32 %v4767_v21, %v4238_v20  ;;  %v4607_v47 = vld [vmem:[#allocation11 + $0xac] sm:$0xf0]  ;;  %v4175_v51 = vor.u32 %v4751_v44, %v4174_v43  ;;  %v4835_v18 = vld [vmem:[#allocation11 + $0x7d4] sm:$0xf]  ;;  %v4499_v43 = vor.u32 %v4827_v29, %v4496_v30 }
 0x20f   : > { %2554 = vmatpush.bf16.msra.mxu1 %v3563_v28  ;;  %v3663_v28 = vor.u32 %v4623_v24, %v3662_v23  ;;  %v4743_v56 = vld [vmem:[#allocation11 + $0x4ec] sm:$0xf0]  ;;  %v4528_v20 = vld [vmem:[#allocation11 + $0x7f0] sm:$0xf0] }
 0x210   : > { %2596 = vmatpush.bf16.msrb.mxu0 %v4331_v32  ;;  %v3630_v32 = vld [vmem:[#allocation11 + $0xd0] sm:$0xf]  ;;  %v4143_v0 = vor.u32 %v4743_v56, %v4142_v55  ;;  %v4531_v9 = vor.u32 %v4835_v18, %v4528_v20  ;;  %v4771_v40 = vld [vmem:[#allocation11 + $0x5d4] sm:$0xf] }
 0x211   : > { %2567 = vmatpush.bf16.msra.mxu2 %v3851_v37  ;;  %v4807_v37 = vld [vmem:[#allocation11 + $0x6ec] sm:$0xf0]  ;;  %v4763_v55 = vld [vmem:[#allocation11 + $0x594] sm:$0xf] }
 0x212   : > { %2581 = vmatpush.bf16.msra.mxu3 %v4107_v42  ;;  %v3631_v42 = vor.u32 %v4615_v33, %v3630_v32  ;;  %v4399_v45 = vor.u32 %v4807_v37, %v4398_v35  ;;  %v3566_v58 = vld [vmem:[#allocation11 + $0x50] sm:$0xf]  ;;  %v4707_v37 = vld [vmem:[#allocation11 + $0x3d4] sm:$0xf] }
 0x213   : > { %2555 = vmatpush.bf16.msra.mxu1 %v3531_v46  ;;  %v3598_v46 = vld [vmem:[#allocation11 + $0x90] sm:$0xf]  ;;  %v4240_v56 = vld [vmem:[#allocation11 + $0x5b0] sm:$0xf0] }
 0x214   : > { %2597 = vmatpush.bf16.msrb.mxu0 %v4299_v49  ;;  %v4366_v49 = vld [vmem:[#allocation11 + $0x690] sm:$0xf]  ;;  %v3599_v54 = vor.u32 %v4607_v47, %v3598_v46  ;;  %v3696_v46 = vld [vmem:[#allocation11 + $0x170] sm:$0xf0] }
 0x215   : > { %2568 = vmatpush.bf16.msra.mxu2 %v3819_v53  ;;  %v4679_v53 = vld [vmem:[#allocation11 + $0x2ec] sm:$0xf0]  ;;  %v3920_v18 = vld [vmem:[#allocation11 + $0x330] sm:$0xf0] }
 0x216   : > { %2582 = vmatpush.bf16.msra.mxu3 %v4075_v57  ;;  %2556 = vmatmul.bf16.vlgmr.msra.gmra.mxu1 %v5416_v36  ;;  %v4599_v59 = vld [vmem:[#allocation11 + $0x6c] sm:$0xf0]  ;;  %v4747_v20 = vld [vmem:[#allocation11 + $0x514] sm:$0xf] }
 0x217   : > { %2604 = vmatpush.bf16.msrb.mxu1 %v3759_v50  ;;  %2598 = vmatmul.bf16.vlgmr.msrb.gmra.mxu0 %v5418_v41  ;;  %v4799_v50 = vld [vmem:[#allocation11 + $0x6ac] sm:$0xf0]  ;;  %v3567_v4 = vor.u32 %v4599_v59, %v3566_v58  ;;  %v4619_v58 = vld [vmem:[#allocation11 + $0x114] sm:$0xf] }
 0x218   : > { %2646 = vmatpush.bf16.msra.mxu0 %v4527_v52  ;;  %v3886_v52 = vld [vmem:[#allocation11 + $0x2d0] sm:$0xf]  ;;  %v4367_v57 = vor.u32 %v4799_v50, %v4366_v49  ;;  %v4819_v49 = vld [vmem:[#allocation11 + $0x754] sm:$0xf] }
 0x219   : > { %2569 = vmatpush.bf16.msra.mxu2 %v3787_v6  ;;  %v3887_v60 = vor.u32 %v4679_v53, %v3886_v52  ;;  %v4334_v61 = vld [vmem:[#allocation11 + $0x650] sm:$0xf]  ;;  %v4464_v50 = vld [vmem:[#allocation11 + $0x770] sm:$0xf0] }
 0x21a   : > { %2583 = vmatpush.bf16.msra.mxu3 %v4043_v12  ;;  %v4791_v62 = vld [vmem:[#allocation11 + $0x66c] sm:$0xf0]  ;;  %v4699_v52 = vld [vmem:[#allocation11 + $0x394] sm:$0xf] }
 0x21b   : > { %2605 = vmatpush.bf16.msrb.mxu1 %v3727_v1  ;;  %v3854_v1 = vld [vmem:[#allocation11 + $0x290] sm:$0xf]  ;;  %v4335_v8 = vor.u32 %v4791_v62, %v4334_v61  ;;  %v3984_v53 = vld [vmem:[#allocation11 + $0x3b0] sm:$0xf0] }
 0x21c   : > { %2647 = vmatpush.bf16.msra.mxu0 %v4495_v5  ;;  %2570 = vmatmul.bf16.vlgmr.msra.gmra.mxu2 %v5422_v63  ;;  %v4671_v2 = vld [vmem:[#allocation11 + $0x2ac] sm:$0xf0]  ;;  %v3664_v59 = vld [vmem:[#allocation11 + $0x130] sm:$0xf0] }
 0x21d   : > { %2618 = vmatpush.bf16.msrb.mxu2 %v4015_v13  ;;  %2584 = vmatmul.bf16.vlgmr.msra.gmra.mxu3 %v5424_v3  ;;  %v4110_v5 = vld [vmem:[#allocation11 + $0x490] sm:$0xf]  ;;  %v3855_v15 = vor.u32 %v4671_v2, %v3854_v1  ;;  %v4811_v61 = vld [vmem:[#allocation11 + $0x714] sm:$0xf] }
 0x21e   : > { %2632 = vmatpush.bf16.msrb.mxu3 %v4271_v16  ;;  %v4735_v6 = vld [vmem:[#allocation11 + $0x4ac] sm:$0xf0]  ;;  %v4643_v16 = vld [vmem:[#allocation11 + $0x1d4] sm:$0xf] }
 0x21f   : > { %2606 = vmatpush.bf16.msrb.mxu1 %v3695_v19  ;;  %v3534_v7 = vld [vmem:[#allocation11 + $0x10] sm:$0xf]  ;;  %v4111_v19 = vor.u32 %v4735_v6, %v4110_v5  ;;  %v3763_v10 = vor.u32 %v4643_v16, %v3760_v17  ;;  %v4432_v62 = vld [vmem:[#allocation11 + $0x730] sm:$0xf0] }
 0x220   : > { %2648 = vmatpush.bf16.msra.mxu0 %v4463_v22  ;;  %v4591_v12 = vld [vmem:[#allocation11 + $0x2c] sm:$0xf0]  ;;  %v4691_v1 = vld [vmem:[#allocation11 + $0x354] sm:$0xf] }
 0x221   : > { %2619 = vmatpush.bf16.msrb.mxu2 %v3983_v25  ;;  %v4302_v13 = vld [vmem:[#allocation11 + $0x610] sm:$0xf]  ;;  %v3535_v23 = vor.u32 %v4591_v12, %v3534_v7  ;;  %v3952_v2 = vld [vmem:[#allocation11 + $0x370] sm:$0xf0]  ;;  %v4435_v7 = vor.u32 %v4811_v61, %v4432_v62 }
 0x222   : > { %2633 = vmatpush.bf16.msrb.mxu3 %v4239_v27  ;;  %v4783_v14 = vld [vmem:[#allocation11 + $0x62c] sm:$0xf0]  ;;  %v4635_v27 = vld [vmem:[#allocation11 + $0x194] sm:$0xf] }
 0x223   : > { %2607 = vmatpush.bf16.msrb.mxu1 %v3663_v28  ;;  %v3822_v21 = vld [vmem:[#allocation11 + $0x250] sm:$0xf]  ;;  %v4303_v26 = vor.u32 %v4783_v14, %v4302_v13  ;;  %v3728_v28 = vld [vmem:[#allocation11 + $0x1b0] sm:$0xf0]  ;;  %v3955_v13 = vor.u32 %v4691_v1, %v3952_v2 }
 0x224   : > { %2649 = vmatpush.bf16.msra.mxu0 %v4431_v31  ;;  %v4663_v22 = vld [vmem:[#allocation11 + $0x26c] sm:$0xf0]  ;;  %v3731_v39 = vor.u32 %v4635_v27, %v3728_v28  ;;  %v4755_v5 = vld [vmem:[#allocation11 + $0x554] sm:$0xf] }
 0x225   : > { %2620 = vmatpush.bf16.msrb.mxu2 %v3951_v34  ;;  %v4078_v24 = vld [vmem:[#allocation11 + $0x450] sm:$0xf]  ;;  %v3823_v11 = vor.u32 %v4663_v22, %v3822_v21  ;;  %v4208_v6 = vld [vmem:[#allocation11 + $0x570] sm:$0xf0] }
 0x226   : > { %2634 = vmatpush.bf16.msrb.mxu3 %v4207_v38  ;;  %v4727_v25 = vld [vmem:[#allocation11 + $0x46c] sm:$0xf0]  ;;  %v4016_v38 = vld [vmem:[#allocation11 + $0x3f0] sm:$0xf0]  ;;  %v4211_v16 = vor.u32 %v4755_v5, %v4208_v6  ;;  %v4502_v5 = vld [vmem:[#allocation11 + $0x798] sm:$0xf] }
 0x227   : > { %2608 = vmatpush.bf16.msrb.mxu1 %v3631_v42  ;;  %v4079_v31 = vor.u32 %v4727_v25, %v4078_v24  ;;  %v3790_v32 = vld [vmem:[#allocation11 + $0x210] sm:$0xf]  ;;  %v4272_v42 = vld [vmem:[#allocation11 + $0x5f0] sm:$0xf0]  ;;  %v4832_v6 = vld [vmem:[#allocation11 + $0x7b4] sm:$0xf0] }
 0x228   : > { %2650 = vmatpush.bf16.msra.mxu0 %v4399_v45  ;;  %v4655_v33 = vld [vmem:[#allocation11 + $0x22c] sm:$0xf0]  ;;  %v4627_v45 = vld [vmem:[#allocation11 + $0x154] sm:$0xf] }
 0x229   : > { %2621 = vmatpush.bf16.msrb.mxu2 %v3919_v48  ;;  %v4046_v34 = vld [vmem:[#allocation11 + $0x410] sm:$0xf]  ;;  %v3791_v44 = vor.u32 %v4655_v33, %v3790_v32  ;;  %v4019_v48 = vor.u32 %v4707_v37, %v4016_v38  ;;  %v3632_v12 = vld [vmem:[#allocation11 + $0xf0] sm:$0xf0] }
 0x22a   : > { %2635 = vmatpush.bf16.msrb.mxu3 %v4175_v51  ;;  %v4719_v35 = vld [vmem:[#allocation11 + $0x42c] sm:$0xf0]  ;;  %v4275_v51 = vor.u32 %v4771_v40, %v4272_v42  ;;  %v4803_v14 = vld [vmem:[#allocation11 + $0x6d4] sm:$0xf] }
 0x22b   : > { %2609 = vmatpush.bf16.msrb.mxu1 %v3599_v54  ;;  %v4047_v47 = vor.u32 %v4719_v35, %v4046_v34  ;;  %v3699_v54 = vor.u32 %v4627_v45, %v3696_v46  ;;  %v4683_v17 = vld [vmem:[#allocation11 + $0x314] sm:$0xf] }
 0x22c   : > { %2651 = vmatpush.bf16.msra.mxu0 %v4367_v57  ;;  %v4467_v57 = vor.u32 %v4819_v49, %v4464_v50  ;;  %v4176_v21 = vld [vmem:[#allocation11 + $0x530] sm:$0xf0]  ;;  %v3923_v25 = vor.u32 %v4683_v17, %v3920_v18  ;;  %v4278_v18 = vld [vmem:[#allocation11 + $0x5d8] sm:$0xf] }
 0x22d   : > { %2622 = vmatpush.bf16.msrb.mxu2 %v3887_v60  ;;  %v3987_v60 = vor.u32 %v4699_v52, %v3984_v53  ;;  %v3600_v24 = vld [vmem:[#allocation11 + $0xb0] sm:$0xf0]  ;;  %v4179_v27 = vor.u32 %v4747_v20, %v4176_v21  ;;  %v4648_v52 = vld [vmem:[#allocation11 + $0x1f4] sm:$0xf0]  ;;  %v4503_v20 = vor.u32 %v4832_v6, %v4502_v5 }
 0x22e   : > { %2636 = vmatpush.bf16.msrb.mxu3 %v4143_v0  ;;  %v4243_v0 = vor.u32 %v4763_v55, %v4240_v56  ;;  %v4739_v29 = vld [vmem:[#allocation11 + $0x4d4] sm:$0xf]  ;;  %v4534_v53 = vld [vmem:[#allocation11 + $0x7d8] sm:$0xf] }
 0x22f   : > { %2610 = vmatpush.bf16.msrb.mxu1 %v3567_v4  ;;  %v3667_v4 = vor.u32 %v4619_v58, %v3664_v59  ;;  %v4144_v30 = vld [vmem:[#allocation11 + $0x4f0] sm:$0xf0]  ;;  %v4840_v55 = vld [vmem:[#allocation11 + $0x7f4] sm:$0xf0] }
 0x230   : > { %2652 = vmatpush.bf16.msra.mxu0 %v4335_v8  ;;  %v4611_v8 = vld [vmem:[#allocation11 + $0xd4] sm:$0xf]  ;;  %v4147_v38 = vor.u32 %v4739_v29, %v4144_v30  ;;  %v4535_v1 = vor.u32 %v4840_v55, %v4534_v53  ;;  %v4246_v29 = vld [vmem:[#allocation11 + $0x598] sm:$0xf] }
 0x231   : > { %2623 = vmatpush.bf16.msrb.mxu2 %v3855_v15  ;;  %v4400_v15 = vld [vmem:[#allocation11 + $0x6f0] sm:$0xf0]  ;;  %v4768_v30 = vld [vmem:[#allocation11 + $0x5b4] sm:$0xf0] }
 0x232   : > { %2637 = vmatpush.bf16.msrb.mxu3 %v4111_v19  ;;  %v3635_v19 = vor.u32 %v4611_v8, %v3632_v12  ;;  %v4403_v22 = vor.u32 %v4803_v14, %v4400_v15  ;;  %v4595_v32 = vld [vmem:[#allocation11 + $0x54] sm:$0xf]  ;;  %v4022_v15 = vld [vmem:[#allocation11 + $0x3d8] sm:$0xf] }
 0x233   : > { %2611 = vmatpush.bf16.msrb.mxu1 %v3535_v23  ;;  %v4603_v23 = vld [vmem:[#allocation11 + $0x94] sm:$0xf]  ;;  %v3926_v53 = vld [vmem:[#allocation11 + $0x318] sm:$0xf] }
 0x234   : > { %2653 = vmatpush.bf16.msra.mxu0 %v4303_v26  ;;  %v4795_v26 = vld [vmem:[#allocation11 + $0x694] sm:$0xf]  ;;  %v3603_v28 = vor.u32 %v4603_v23, %v3600_v24  ;;  %v4632_v23 = vld [vmem:[#allocation11 + $0x174] sm:$0xf0] }
 0x235   : > { %2624 = vmatpush.bf16.msrb.mxu2 %v3823_v11  ;;  %v3888_v11 = vld [vmem:[#allocation11 + $0x2f0] sm:$0xf0]  ;;  %v3894_v6 = vld [vmem:[#allocation11 + $0x2d8] sm:$0xf] }
 0x236   : > { %2638 = vmatpush.bf16.msrb.mxu3 %v4079_v31  ;;  %2612 = vmatmul.bf16.vlgmr.msrb.gmra.mxu1 %v5416_v36  ;;  %v3568_v33 = vld [vmem:[#allocation11 + $0x70] sm:$0xf0] }
 0x237   : > { %2660 = vmatpush.bf16.msra.mxu1 %v3763_v10  ;;  %2654 = vmatmul.bf16.vlgmr.msra.gmra.mxu0 %v5418_v41  ;;  %v4368_v10 = vld [vmem:[#allocation11 + $0x6b0] sm:$0xf0]  ;;  %v3571_v42 = vor.u32 %v4595_v32, %v3568_v33  ;;  %v3670_v32 = vld [vmem:[#allocation11 + $0x118] sm:$0xf] }
 0x238   : > { %2702 = vmatpush.bf16.msrb.mxu0 %v4531_v9  ;;  %v4675_v9 = vld [vmem:[#allocation11 + $0x2d4] sm:$0xf]  ;;  %v4371_v31 = vor.u32 %v4795_v26, %v4368_v10  ;;  %v4470_v26 = vld [vmem:[#allocation11 + $0x758] sm:$0xf] }
 0x239   : > { %2625 = vmatpush.bf16.msrb.mxu2 %v3791_v44  ;;  %v3891_v34 = vor.u32 %v4675_v9, %v3888_v11  ;;  %v4787_v35 = vld [vmem:[#allocation11 + $0x654] sm:$0xf]  ;;  %v4824_v10 = vld [vmem:[#allocation11 + $0x774] sm:$0xf0] }
 0x23a   : > { %2639 = vmatpush.bf16.msrb.mxu3 %v4047_v47  ;;  %v4336_v37 = vld [vmem:[#allocation11 + $0x670] sm:$0xf0]  ;;  %v3990_v9 = vld [vmem:[#allocation11 + $0x398] sm:$0xf] }
 0x23b   : > { %2661 = vmatpush.bf16.msra.mxu1 %v3731_v39  ;;  %v4667_v39 = vld [vmem:[#allocation11 + $0x294] sm:$0xf]  ;;  %v4339_v46 = vor.u32 %v4787_v35, %v4336_v37  ;;  %v4704_v11 = vld [vmem:[#allocation11 + $0x3b4] sm:$0xf0] }
 0x23c   : > { %2703 = vmatpush.bf16.msrb.mxu0 %v4499_v43  ;;  %2626 = vmatmul.bf16.vlgmr.msrb.gmra.mxu2 %v5422_v63  ;;  %v3856_v40 = vld [vmem:[#allocation11 + $0x2b0] sm:$0xf0]  ;;  %v4624_v33 = vld [vmem:[#allocation11 + $0x134] sm:$0xf0] }
 0x23d   : > { %2674 = vmatpush.bf16.msra.mxu2 %v4019_v48  ;;  %2640 = vmatmul.bf16.vlgmr.msrb.gmra.mxu3 %v5424_v3  ;;  %v4731_v43 = vld [vmem:[#allocation11 + $0x494] sm:$0xf]  ;;  %v3859_v50 = vor.u32 %v4667_v39, %v3856_v40  ;;  %v4438_v35 = vld [vmem:[#allocation11 + $0x718] sm:$0xf] }
 0x23e   : > { %2688 = vmatpush.bf16.msra.mxu3 %v4275_v51  ;;  %v4112_v44 = vld [vmem:[#allocation11 + $0x4b0] sm:$0xf0]  ;;  %v3766_v51 = vld [vmem:[#allocation11 + $0x1d8] sm:$0xf] }
 0x23f   : > { %2662 = vmatpush.bf16.msra.mxu1 %v3699_v54  ;;  %v4587_v45 = vld [vmem:[#allocation11 + $0x14] sm:$0xf]  ;;  %v4115_v54 = vor.u32 %v4731_v43, %v4112_v44  ;;  %v3767_v62 = vor.u32 %v4648_v52, %v3766_v51  ;;  %v4816_v37 = vld [vmem:[#allocation11 + $0x734] sm:$0xf0]  ;;  %v3671_v43 = vor.u32 %v4624_v33, %v3670_v32 }
 0x240   : > { %2704 = vmatpush.bf16.msrb.mxu0 %v4467_v57  ;;  %v3536_v47 = vld [vmem:[#allocation11 + $0x30] sm:$0xf0]  ;;  %v3958_v39 = vld [vmem:[#allocation11 + $0x358] sm:$0xf] }
 0x241   : > { %2675 = vmatpush.bf16.msra.mxu2 %v3987_v60  ;;  %v4779_v48 = vld [vmem:[#allocation11 + $0x614] sm:$0xf]  ;;  %v3539_v58 = vor.u32 %v4587_v45, %v3536_v47  ;;  %v4696_v40 = vld [vmem:[#allocation11 + $0x374] sm:$0xf0] }
 0x242   : > { %2689 = vmatpush.bf16.msra.mxu3 %v4243_v0  ;;  %v4304_v49 = vld [vmem:[#allocation11 + $0x630] sm:$0xf0]  ;;  %v3734_v0 = vld [vmem:[#allocation11 + $0x198] sm:$0xf] }
 0x243   : > { %2663 = vmatpush.bf16.msra.mxu1 %v3667_v4  ;;  %v4659_v56 = vld [vmem:[#allocation11 + $0x254] sm:$0xf]  ;;  %v4307_v61 = vor.u32 %v4779_v48, %v4304_v49  ;;  %v4640_v4 = vld [vmem:[#allocation11 + $0x1b4] sm:$0xf0]  ;;  %v3959_v49 = vor.u32 %v4696_v40, %v3958_v39  ;;  %v4536_v40 = vld [vmem:[#allocation11 + $0x7f8] sm:$0xf0] }
 0x244   : > { %2705 = vmatpush.bf16.msrb.mxu0 %v4435_v7  ;;  %v3824_v57 = vld [vmem:[#allocation11 + $0x270] sm:$0xf0]  ;;  %v3735_v17 = vor.u32 %v4640_v4, %v3734_v0  ;;  %v4214_v44 = vld [vmem:[#allocation11 + $0x558] sm:$0xf] }
 0x245   : > { %2676 = vmatpush.bf16.msra.mxu2 %v3955_v13  ;;  %v4723_v59 = vld [vmem:[#allocation11 + $0x454] sm:$0xf]  ;;  %v3827_v2 = vor.u32 %v4659_v56, %v3824_v57  ;;  %v4760_v45 = vld [vmem:[#allocation11 + $0x574] sm:$0xf0] }
 0x246   : > { %2690 = vmatpush.bf16.msra.mxu3 %v4211_v16  ;;  %v4080_v60 = vld [vmem:[#allocation11 + $0x470] sm:$0xf0]  ;;  %v4712_v16 = vld [vmem:[#allocation11 + $0x3f4] sm:$0xf0]  ;;  %v4215_v52 = vor.u32 %v4760_v45, %v4214_v44 }
 0x247   : > { %2664 = vmatpush.bf16.msra.mxu1 %v3635_v19  ;;  %v4083_v7 = vor.u32 %v4723_v59, %v4080_v60  ;;  %v4651_v8 = vld [vmem:[#allocation11 + $0x214] sm:$0xf]  ;;  %v4776_v19 = vld [vmem:[#allocation11 + $0x5f4] sm:$0xf0] }
 0x248   : > { %2706 = vmatpush.bf16.msrb.mxu0 %v4403_v22  ;;  %v3792_v12 = vld [vmem:[#allocation11 + $0x230] sm:$0xf0]  ;;  %v3702_v22 = vld [vmem:[#allocation11 + $0x158] sm:$0xf] }
 0x249   : > { %2677 = vmatpush.bf16.msra.mxu2 %v3923_v25  ;;  %v4715_v13 = vld [vmem:[#allocation11 + $0x414] sm:$0xf]  ;;  %v3795_v21 = vor.u32 %v4651_v8, %v3792_v12  ;;  %v4023_v25 = vor.u32 %v4712_v16, %v4022_v15  ;;  %v3638_v47 = vld [vmem:[#allocation11 + $0xd8] sm:$0xf] }
 0x24a   : > { %2691 = vmatpush.bf16.msra.mxu3 %v4179_v27  ;;  %v4048_v14 = vld [vmem:[#allocation11 + $0x430] sm:$0xf0]  ;;  %v4279_v27 = vor.u32 %v4776_v19, %v4278_v18  ;;  %v4616_v48 = vld [vmem:[#allocation11 + $0xf4] sm:$0xf0] }
 0x24b   : > { %2665 = vmatpush.bf16.msra.mxu1 %v3603_v28  ;;  %v4051_v24 = vor.u32 %v4715_v13, %v4048_v14  ;;  %v3703_v28 = vor.u32 %v4632_v23, %v3702_v22  ;;  %v4808_v51 = vld [vmem:[#allocation11 + $0x6f4] sm:$0xf0]  ;;  %v3639_v56 = vor.u32 %v4616_v48, %v3638_v47 }
 0x24c   : > { %2707 = vmatpush.bf16.msrb.mxu0 %v4371_v31  ;;  %v4471_v31 = vor.u32 %v4824_v10, %v4470_v26  ;;  %v5451_v55 = vld [vmem:[%s5662_s8] sm:$0xff] }
 0x24d   : > { %2678 = vmatpush.bf16.msra.mxu2 %v3891_v34  ;;  %v3991_v34 = vor.u32 %v4704_v11, %v3990_v9  ;;  %v4182_v57 = vld [vmem:[#allocation11 + $0x518] sm:$0xf]  ;;  %v1084_v4 = vperm.slane %v5451_v55, 0 }
 0x24e   : > { %2692 = vmatpush.bf16.msra.mxu3 %v4147_v38  ;;  %v4247_v38 = vor.u32 %v4768_v30, %v4246_v29  ;;  %v3606_v60 = vld [vmem:[#allocation11 + $0x98] sm:$0xf] }
 0x24f   : > { %2666 = vmatpush.bf16.msra.mxu1 %v3571_v42  ;;  %v4150_v13 = vld [vmem:[#allocation11 + $0x4d8] sm:$0xf] }
 0x250   : > { %2708 = vmatpush.bf16.msrb.mxu0 %v4339_v46  ;;  %v4439_v46 = vor.u32 %v4816_v37, %v4438_v35  ;;  %v4744_v14 = vld [vmem:[#allocation11 + $0x4f4] sm:$0xf0]  ;;  %v3768_v35 = vld [vmem:[#allocation11 + $0x1f8] sm:$0xf0] }
 0x251   : > { %2679 = vmatpush.bf16.msra.mxu2 %v3859_v50  ;;  %v4406_v50 = vld [vmem:[#allocation11 + $0x6d8] sm:$0xf]  ;;  %v4151_v22 = vor.u32 %v4744_v14, %v4150_v13  ;;  %v4836_v37 = vld [vmem:[#allocation11 + $0x7dc] sm:$0xf] }
 0x252   : > { %2693 = vmatpush.bf16.msra.mxu3 %v4115_v54  ;;  %v4688_v54 = vld [vmem:[#allocation11 + $0x334] sm:$0xf0]  ;;  %v4407_v59 = vor.u32 %v4808_v51, %v4406_v50  ;;  %v4024_v13 = vld [vmem:[#allocation11 + $0x3f8] sm:$0xf0] }
 0x253   : > { %2667 = vmatpush.bf16.msra.mxu1 %v3539_v58  ;;  %v2389_v42 = vpop.f32.mrf.mxu1  ;;  %v4752_v58 = vld [vmem:[#allocation11 + $0x534] sm:$0xf0]  ;;  %v3927_v0 = vor.u32 %v4688_v54, %v3926_v53  ;;  %v4636_v54 = vld [vmem:[#allocation11 + $0x19c] sm:$0xf] }
 0x254   : > { %2709 = vmatpush.bf16.msrb.mxu0 %v4307_v61  ;;  %v4608_v61 = vld [vmem:[#allocation11 + $0xb4] sm:$0xf0]  ;;  %v4183_v5 = vor.u32 %v4752_v58, %v4182_v57  ;;  %v4828_v57 = vld [vmem:[#allocation11 + $0x79c] sm:$0xf] }
 0x255   : > { %2680 = vmatpush.bf16.msra.mxu2 %v3827_v2  ;;  %v4800_v2 = vld [vmem:[#allocation11 + $0x6b4] sm:$0xf0]  ;;  %v3607_v12 = vor.u32 %v4608_v61, %v3606_v60  ;;  %v4504_v60 = vld [vmem:[#allocation11 + $0x7b8] sm:$0xf0] }
 0x256   : > { %2694 = vmatpush.bf16.msra.mxu3 %v4083_v7  ;;  %2668 = vmatmul.bf16.vlgmr.msra.gmra.mxu1 %v5416_v36  ;;  %v4680_v7 = vld [vmem:[#allocation11 + $0x2f4] sm:$0xf0]  ;;  %v4772_v14 = vld [vmem:[#allocation11 + $0x5dc] sm:$0xf] }
 0x257   : > { %2716 = vmatpush.bf16.msrb.mxu1 %v3767_v62  ;;  %2710 = vmatmul.bf16.vlgmr.msrb.gmra.mxu0 %v5418_v41  ;;  %v2431_v62 = vpop.f32.mrf.mxu0  ;;  %v3574_v16 = vld [vmem:[#allocation11 + $0x58] sm:$0xf]  ;;  %v3895_v18 = vor.u32 %v4680_v7, %v3894_v6 }
 0x258   : > { %2758 = vmatpush.bf16.msra.mxu0 %v4535_v1  ;;  %v4374_v1 = vld [vmem:[#allocation11 + $0x698] sm:$0xf] }
 0x259   : > { %2681 = vmatpush.bf16.msra.mxu2 %v3795_v21  ;;  %v4375_v15 = vor.u32 %v4800_v2, %v4374_v1  ;;  %v4342_v19 = vld [vmem:[#allocation11 + $0x658] sm:$0xf]  ;;  %v2390_v21 = vadd.f32 %v2389_v42, %v1084_v4 }
 0x25a   : > { %2695 = vmatpush.bf16.msra.mxu3 %v4051_v24  ;;  %v3862_v23 = vld [vmem:[#allocation11 + $0x298] sm:$0xf] }
 0x25b   : > { %2717 = vmatpush.bf16.msrb.mxu1 %v3735_v17  ;;  %v2391_v8 = vpop.f32.mrf.mxu1  ;;  %v4600_v17 = vld [vmem:[#allocation11 + $0x74] sm:$0xf0] }
 0x25c   : > { %2759 = vmatpush.bf16.msra.mxu0 %v4503_v20  ;;  %2682 = vmatmul.bf16.vlgmr.msra.gmra.mxu2 %v5422_v63  ;;  %v4792_v20 = vld [vmem:[#allocation11 + $0x674] sm:$0xf0]  ;;  %v3575_v26 = vor.u32 %v4600_v17, %v3574_v16  ;;  %v2392_v58 = vadd.f32 %v2391_v8, %v1084_v4  ;;  %v4507_v4 = vor.u32 %v4828_v57, %v4504_v60  ;;  %v4628_v16 = vld [vmem:[#allocation11 + $0x15c] sm:$0xf] }
 0x25d   : > { %2730 = vmatpush.bf16.msrb.mxu2 %v4023_v25  ;;  %2696 = vmatmul.bf16.vlgmr.msra.gmra.mxu3 %v5424_v3  ;;  %v4672_v24 = vld [vmem:[#allocation11 + $0x2b4] sm:$0xf0]  ;;  %v4343_v29 = vor.u32 %v4792_v20, %v4342_v19  ;;  %v3704_v17 = vld [vmem:[#allocation11 + $0x178] sm:$0xf0] }
 0x25e   : > { %2744 = vmatpush.bf16.msrb.mxu3 %v4279_v27  ;;  %v4118_v10 = vld [vmem:[#allocation11 + $0x498] sm:$0xf]  ;;  %v3863_v33 = vor.u32 %v4672_v24, %v3862_v23  ;;  %v4820_v20 = vld [vmem:[#allocation11 + $0x75c] sm:$0xf] }
 0x25f   : > { %2718 = vmatpush.bf16.msrb.mxu1 %v3703_v28  ;;  %v2403_v25 = vpop.f32.mrf.mxu2  ;;  %v4736_v27 = vld [vmem:[#allocation11 + $0x4b4] sm:$0xf0]  ;;  %v2433_v44 = vpop.f32.mrf.mxu0  ;;  %v4612_v57 = vld [vmem:[#allocation11 + $0xdc] sm:$0xf] }
 0x260   : > { %2760 = vmatpush.bf16.msra.mxu0 %v4471_v31  ;;  %v3542_v9 = vld [vmem:[#allocation11 + $0x18] sm:$0xf]  ;;  %v2404_v11 = vadd.f32 %v2403_v25, %v2390_v21  ;;  %v2417_v28 = vpop.f32.mrf.mxu3  ;;  %v4119_v39 = vor.u32 %v4736_v27, %v4118_v10  ;;  %v4472_v21 = vld [vmem:[#allocation11 + $0x778] sm:$0xf0]  ;;  %v3707_v10 = vor.u32 %v4628_v16, %v3704_v17 }
 0x261   : > { %2731 = vmatpush.bf16.msrb.mxu2 %v3991_v34  ;;  %v4592_v30 = vld [vmem:[#allocation11 + $0x34] sm:$0xf0]  ;;  %v4644_v34 = vld [vmem:[#allocation11 + $0x1dc] sm:$0xf] }
 0x262   : > { %2745 = vmatpush.bf16.msrb.mxu3 %v4247_v38  ;;  %v4310_v31 = vld [vmem:[#allocation11 + $0x618] sm:$0xf]  ;;  %v2418_v38 = vadd.f32 %v2417_v28, %v2404_v11  ;;  %v3543_v45 = vor.u32 %v4592_v30, %v3542_v9  ;;  %v3771_v50 = vor.u32 %v4644_v34, %v3768_v35  ;;  %v4700_v25 = vld [vmem:[#allocation11 + $0x39c] sm:$0xf]  ;;  %v4475_v30 = vor.u32 %v4820_v20, %v4472_v21 }
 0x263   : > { %2719 = vmatpush.bf16.msrb.mxu1 %v3671_v43  ;;  %v4784_v32 = vld [vmem:[#allocation11 + $0x634] sm:$0xf0]  ;;  %v5456_v51 = vpop.f32.mrf.mxu1  ;;  %v3992_v27 = vld [vmem:[#allocation11 + $0x3b8] sm:$0xf0] }
 0x264   : > { %2761 = vmatpush.bf16.msra.mxu0 %v4439_v46  ;;  %v3830_v42 = vld [vmem:[#allocation11 + $0x258] sm:$0xf]  ;;  %v2432_v48 = vadd.f32 %v2431_v62, %v2418_v38  ;;  %v4764_v9 = vld [vmem:[#allocation11 + $0x59c] sm:$0xf] }
 0x265   : > { %2732 = vmatpush.bf16.msrb.mxu2 %v3959_v49  ;;  %v4664_v43 = vld [vmem:[#allocation11 + $0x274] sm:$0xf0]  ;;  %v4311_v49 = vor.u32 %v4784_v32, %v4310_v31  ;;  %v4248_v11 = vld [vmem:[#allocation11 + $0x5b8] sm:$0xf0] }
 0x266   : > { %2746 = vmatpush.bf16.msrb.mxu3 %v4215_v52  ;;  %v4086_v46 = vld [vmem:[#allocation11 + $0x458] sm:$0xf]  ;;  %v4539_v52 = vor.u32 %v4836_v37, %v4536_v40  ;;  %v3831_v53 = vor.u32 %v4664_v43, %v3830_v42  ;;  %v3085_v28 = vmul.f32 %v2432_v48, %v2432_v48  ;;  %v4620_v31 = vld [vmem:[#allocation11 + $0x11c] sm:$0xf] }
 0x267   : > { %2720 = vmatpush.bf16.msrb.mxu1 %v3639_v56  ;;  %v4728_v47 = vld [vmem:[#allocation11 + $0x474] sm:$0xf0]  ;;  %v3736_v56 = vld [vmem:[#allocation11 + $0x1b8] sm:$0xf0]  ;;  %v2405_v62 = vpop.f32.mrf.mxu2 }
 0x268   : > { %2762 = vmatpush.bf16.msra.mxu0 %v4407_v59  ;;  %v4087_v59 = vor.u32 %v4728_v47, %v4086_v46  ;;  %v3798_v61 = vld [vmem:[#allocation11 + $0x218] sm:$0xf]  ;;  %v2406_v6 = vadd.f32 %v2405_v62, %v2392_v58  ;;  %v2419_v7 = vpop.f32.mrf.mxu3  ;;  %v3672_v32 = vld [vmem:[#allocation11 + $0x138] sm:$0xf0] }
 0x269   : > { %2733 = vmatpush.bf16.msrb.mxu2 %v3927_v0  ;;  %v4656_v0 = vld [vmem:[#allocation11 + $0x234] sm:$0xf0]  ;;  %v4812_v38 = vld [vmem:[#allocation11 + $0x71c] sm:$0xf] }
 0x26a   : > { %2747 = vmatpush.bf16.msrb.mxu3 %v4183_v5  ;;  %v4054_v1 = vld [vmem:[#allocation11 + $0x418] sm:$0xf]  ;;  %v4708_v5 = vld [vmem:[#allocation11 + $0x3dc] sm:$0xf]  ;;  %v3799_v8 = vor.u32 %v4656_v0, %v3798_v61 }
 0x26b   : > { %2721 = vmatpush.bf16.msrb.mxu1 %v3607_v12  ;;  %v4720_v2 = vld [vmem:[#allocation11 + $0x434] sm:$0xf0]  ;;  %v3739_v12 = vor.u32 %v4636_v54, %v3736_v56  ;;  %v4027_v23 = vor.u32 %v4708_v5, %v4024_v13  ;;  %v2447_v42 = vpop.f32.mrf.mxu1  ;;  %v4692_v46 = vld [vmem:[#allocation11 + $0x35c] sm:$0xf] }
 0x26c   : > { %2763 = vmatpush.bf16.msra.mxu0 %v4375_v15  ;;  %v4280_v15 = vld [vmem:[#allocation11 + $0x5f8] sm:$0xf0]  ;;  %v4055_v19 = vor.u32 %v4720_v2, %v4054_v1 }
 0x26d   : > { %2734 = vmatpush.bf16.msrb.mxu2 %v3895_v18  ;;  %v2420_v18 = vadd.f32 %v2419_v7, %v2406_v6  ;;  %v4283_v24 = vor.u32 %v4772_v14, %v4280_v15  ;;  %v3640_v58 = vld [vmem:[#allocation11 + $0xf8] sm:$0xf0] }
 0x26e   : > { %2748 = vmatpush.bf16.msrb.mxu3 %v4151_v22  ;;  %v1085_v22 = vperm.slane %v5451_v55, 1  ;;  %v4408_v60 = vld [vmem:[#allocation11 + $0x6f8] sm:$0xf0]  ;;  %v3643_v7 = vor.u32 %v4612_v57, %v3640_v58 }
 0x26f   : > { %2722 = vmatpush.bf16.msrb.mxu1 %v3575_v26  ;;  %v2434_v26 = vadd.f32 %v2433_v44, %v2420_v18  ;;  %v2459_v43 = vpop.f32.mrf.mxu2  ;;  %v3995_v44 = vor.u32 %v4700_v25, %v3992_v27  ;;  %v4684_v61 = vld [vmem:[#allocation11 + $0x31c] sm:$0xf] }
 0x270   : > { %2764 = vmatpush.bf16.msra.mxu0 %v4343_v29  ;;  %v2487_v29 = vpop.f32.mrf.mxu0  ;;  %v2446_v40 = vadd.f32 %v5456_v51, %v1085_v22  ;;  %v1086_v51 = vperm.slane %v5451_v55, 2  ;;  %v3928_v2 = vld [vmem:[#allocation11 + $0x338] sm:$0xf0] }
 0x271   : > { %2735 = vmatpush.bf16.msrb.mxu2 %v3863_v33  ;;  %v5463_v33 = vmax.f32 %v2432_v48, %v2434_v26  ;;  %v5465_v34 = vmin.f32 %v2432_v48, %v2434_v26  ;;  %v5467_v35 = vadd.f32 %v2434_v26, %v2432_v48  ;;  %v3093_v37 = vmul.f32 %v2434_v26, %v2434_v26  ;;  %v4748_v5 = vld [vmem:[#allocation11 + $0x51c] sm:$0xf] }
 0x272   : > { %2749 = vmatpush.bf16.msrb.mxu3 %v4119_v39  ;;  %v4440_v39 = vld [vmem:[#allocation11 + $0x738] sm:$0xf0]  ;;  %v3675_v48 = vor.u32 %v4620_v31, %v3672_v32  ;;  %v2460_v54 = vadd.f32 %v2459_v43, %v2446_v40 }
 0x273   : > { %2723 = vmatpush.bf16.msrb.mxu1 %v3543_v45  ;;  %v4251_v45 = vor.u32 %v4764_v9, %v4248_v11  ;;  %v5472_v47 = vadd.f32 %v3093_v37, %v3085_v28  ;;  %v4443_v56 = vor.u32 %v4812_v38, %v4440_v39  ;;  %v4184_v6 = vld [vmem:[#allocation11 + $0x538] sm:$0xf0]  ;;  %v2830_v18 = vrot.slane %v5463_v33, 4  ;;  %v2501_v38 = vpop.f32.mrf.mxu1 }
 0x274   : > { %2765 = vmatpush.bf16.msra.mxu0 %v4311_v49  ;;  %v2473_v49 = vpop.f32.mrf.mxu3  ;;  %v3608_v13 = vld [vmem:[#allocation11 + $0xb8] sm:$0xf0]  ;;  %v4187_v27 = vor.u32 %v4748_v5, %v4184_v6  ;;  %v2502_v5 = vadd.f32 %v2501_v38, %v1086_v51 }
 0x275   : > { %2736 = vmatpush.bf16.msrb.mxu2 %v3831_v53  ;;  %v4216_v53 = vld [vmem:[#allocation11 + $0x578] sm:$0xf0]  ;;  %v2474_v0 = vadd.f32 %v2473_v49, %v2460_v54 }
 0x276   : > { %2750 = vmatpush.bf16.msrb.mxu3 %v4087_v59  ;;  %2724 = vmatmul.bf16.vlgmr.msrb.gmra.mxu1 %v5416_v36  ;;  %v4804_v59 = vld [vmem:[#allocation11 + $0x6dc] sm:$0xf] }
 0x277   : > { %2772 = vmatpush.bf16.msra.mxu1 %v3771_v50  ;;  %2766 = vmatmul.bf16.vlgmr.msra.gmra.mxu0 %v5418_v41  ;;  %v3960_v50 = vld [vmem:[#allocation11 + $0x378] sm:$0xf0]  ;;  %v5477_v15 = vadd.f32 %v2487_v29, %v2474_v0  ;;  %v2461_v26 = vpop.f32.mrf.mxu2  ;;  %v3003_v29 = vrot.slane %v5467_v35, 4 }
 0x278   : > { %2814 = vmatpush.bf16.msrb.mxu0 %v4539_v52  ;;  %v4756_v52 = vld [vmem:[#allocation11 + $0x55c] sm:$0xf]  ;;  %v3963_v62 = vor.u32 %v4692_v46, %v3960_v50  ;;  %v2489_v25 = vpop.f32.mrf.mxu0 }
 0x279   : > { %2737 = vmatpush.bf16.msrb.mxu2 %v3799_v8  ;;  %v4219_v1 = vor.u32 %v4756_v52, %v4216_v53  ;;  %v4796_v14 = vld [vmem:[#allocation11 + $0x69c] sm:$0xf]  ;;  %v3004_v57 = vadd.f32 %v3003_v29, %v5467_v35 }
 0x27a   : > { %2751 = vmatpush.bf16.msrb.mxu3 %v4055_v19  ;;  %v4376_v8 = vld [vmem:[#allocation11 + $0x6b8] sm:$0xf0]  ;;  %v2920_v19 = vrot.slane %v5465_v34, 4 }
 0x27b   : > { %2773 = vmatpush.bf16.msra.mxu1 %v3739_v12  ;;  %v4604_v12 = vld [vmem:[#allocation11 + $0x9c] sm:$0xf]  ;;  %v4379_v40 = vor.u32 %v4796_v14, %v4376_v8 }
 0x27c   : > { %2815 = vmatpush.bf16.msrb.mxu0 %v4507_v4  ;;  %2738 = vmatmul.bf16.vlgmr.msrb.gmra.mxu2 %v5422_v63  ;;  %v4411_v4 = vor.u32 %v4804_v59, %v4408_v60  ;;  %v4676_v16 = vld [vmem:[#allocation11 + $0x2dc] sm:$0xf]  ;;  %v2475_v31 = vpop.f32.mrf.mxu3  ;;  %v3611_v32 = vor.u32 %v4604_v12, %v3608_v13  ;;  %v2921_v46 = vmin.f32 %v5465_v34, %v2920_v19 }
 0x27d   : > { %2786 = vmatpush.bf16.msra.mxu2 %v4027_v23  ;;  %2752 = vmatmul.bf16.vlgmr.msrb.gmra.mxu3 %v5424_v3  ;;  %v3896_v17 = vld [vmem:[#allocation11 + $0x2f8] sm:$0xf0] }
 0x27e   : > { %2800 = vmatpush.bf16.msra.mxu3 %v4283_v24  ;;  %v5481_v20 = vld [vmem:[#allocation11 + $0x4dc] sm:$0xf]  ;;  %v2448_v24 = vadd.f32 %v2447_v42, %v1085_v22  ;;  %v3899_v49 = vor.u32 %v4676_v16, %v3896_v17  ;;  %v3005_v16 = vrot.slane %v3004_v57, 2 }
 0x27f   : > { %2774 = vmatpush.bf16.msra.mxu1 %v3707_v10  ;;  %v5483_v21 = vld [vmem:[#allocation11 + $0x4f8] sm:$0xf0]  ;;  %v3931_v10 = vor.u32 %v4684_v61, %v3928_v2  ;;  %v3086_v2 = vmul.f32 %v5477_v15, %v5477_v15  ;;  %v2515_v14 = vpop.f32.mrf.mxu2 }
 0x280   : > { %2816 = vmatpush.bf16.msrb.mxu0 %v4475_v30  ;;  %v5485_v23 = vld [vmem:[#allocation11 + $0x5c] sm:$0xf]  ;;  %v3102_v30 = vrot.slane %v5472_v47, 4  ;;  %v2462_v39 = vadd.f32 %v2461_v26, %v2448_v24  ;;  %v4155_v54 = vor.u32 %v5481_v20, %v5483_v21  ;;  %v2543_v21 = vpop.f32.mrf.mxu0 }
 0x281   : > { %2787 = vmatpush.bf16.msra.mxu2 %v3995_v44  ;;  %v3576_v9 = vld [vmem:[#allocation11 + $0x78] sm:$0xf0] }
 0x282   : > { %2801 = vmatpush.bf16.msra.mxu3 %v4251_v45  ;;  %v5489_v11 = vld [vmem:[#allocation11 + $0x65c] sm:$0xf]  ;;  %v2831_v45 = vmax.f32 %v5463_v33, %v2830_v18  ;;  %v2476_v53 = vadd.f32 %v2475_v31, %v2462_v39  ;;  %v3103_v33 = vadd.f32 %v3102_v30, %v5472_v47  ;;  %v2922_v47 = vrot.slane %v2921_v46, 2  ;;  %v2503_v31 = vpop.f32.mrf.mxu1 }
 0x283   : > { %2775 = vmatpush.bf16.msra.mxu1 %v3675_v48  ;;  %v4344_v28 = vld [vmem:[#allocation11 + $0x678] sm:$0xf0]  ;;  %v2516_v18 = vadd.f32 %v2515_v14, %v2502_v5 }
 0x284   : > { %2817 = vmatpush.bf16.msrb.mxu0 %v4443_v56  ;;  %v5493_v37 = vld [vmem:[#allocation11 + $0x29c] sm:$0xf]  ;;  %v3579_v56 = vor.u32 %v5485_v23, %v3576_v9  ;;  %v4347_v34 = vor.u32 %v5489_v11, %v4344_v28  ;;  %v2490_v59 = vadd.f32 %v2489_v25, %v2476_v53  ;;  %v3104_v17 = vrot.slane %v3103_v33, 2  ;;  %v2529_v19 = vpop.f32.mrf.mxu3 }
 0x285   : > { %2788 = vmatpush.bf16.msra.mxu2 %v3963_v62  ;;  %v5495_v22 = vld [vmem:[#allocation11 + $0x2b8] sm:$0xf0] }
 0x286   : > { %2802 = vmatpush.bf16.msra.mxu3 %v4219_v1  ;;  %v5497_v42 = vld [vmem:[#allocation11 + $0x49c] sm:$0xf]  ;;  %v3867_v58 = vor.u32 %v5493_v37, %v5495_v22  ;;  %v2832_v1 = vrot.slane %v2831_v45, 2  ;;  %v2836_v6 = vmax.f32 %v5477_v15, %v2490_v59  ;;  %v3009_v12 = vadd.f32 %v2490_v59, %v5477_v15 }
 0x287   : > { %2776 = vmatpush.bf16.msra.mxu1 %v3643_v7  ;;  %v5499_v43 = vld [vmem:[#allocation11 + $0x4b8] sm:$0xf0]  ;;  %v2926_v7 = vmin.f32 %v5477_v15, %v2490_v59  ;;  %v3094_v13 = vmul.f32 %v2490_v59, %v2490_v59  ;;  %v2923_v15 = vmin.f32 %v2921_v46, %v2922_v47  ;;  %v3006_v22 = vadd.f32 %v3005_v16, %v3004_v57 }
 0x288   : > { %2818 = vmatpush.bf16.msrb.mxu0 %v4411_v4  ;;  %v5501_v44 = vld [vmem:[#allocation11 + $0x1c] sm:$0xf]  ;;  %v4123_v60 = vor.u32 %v5497_v42, %v5499_v43  ;;  %v2837_v23 = vrot.slane %v2836_v6, 4  ;;  %v3010_v25 = vrot.slane %v3009_v12, 4  ;;  %v3105_v38 = vadd.f32 %v3104_v17, %v3103_v33  ;;  %v2517_v33 = vpop.f32.mrf.mxu2 }
 0x289   : > { %v3544_v48 = vld [vmem:[#allocation11 + $0x38] sm:$0xf0]  ;;  %2789 = vmatpush.bf16.msra.mxu2 %v3931_v10  ;;  %v2927_v24 = vrot.slane %v2926_v7, 4  ;;  %v3108_v26 = vadd.f32 %v3094_v13, %v3086_v2  ;;  %v2833_v10 = vmax.f32 %v2831_v45, %v2832_v1 }
 0x28a   : > { %v5505_v50 = vld [vmem:[#allocation11 + $0x61c] sm:$0xf]  ;;  %2803 = vmatpush.bf16.msra.mxu3 %v4187_v27  ;;  %v3547_v61 = vor.u32 %v5501_v44, %v3544_v48  ;;  %v2530_v27 = vadd.f32 %v2529_v19, %v2516_v18  ;;  %v2838_v11 = vmax.f32 %v2836_v6, %v2837_v23  ;;  %v3011_v29 = vadd.f32 %v3010_v25, %v3009_v12  ;;  %v2545_v12 = vpop.f32.mrf.mxu0 }
 0x28b   : > { %v5507_v52 = vld [vmem:[#allocation11 + $0x638] sm:$0xf0]  ;;  %2777 = vmatpush.bf16.msra.mxu1 %v3611_v32  ;;  %v2928_v28 = vmin.f32 %v2926_v7, %v2927_v24  ;;  %v3109_v30 = vrot.slane %v3108_v26, 4  ;;  %v2924_v48 = vrot.slane %v2923_v15, 1 }
 0x28c   : > { %2819 = vmatpush.bf16.msrb.mxu0 %v4379_v40  ;;  %v4315_v0 = vor.u32 %v5505_v50, %v5507_v52  ;;  %v4660_v62 = vld [vmem:[#allocation11 + $0x25c] sm:$0xf]  ;;  %v2544_v39 = vadd.f32 %v2543_v21, %v2530_v27  ;;  %v2839_v42 = vrot.slane %v2838_v11, 2  ;;  %v3012_v44 = vrot.slane %v3011_v29, 2 }
 0x28d   : > { %v3832_v35 = vld [vmem:[#allocation11 + $0x278] sm:$0xf0]  ;;  %2790 = vmatpush.bf16.msra.mxu2 %v3899_v49  ;;  %v2929_v43 = vrot.slane %v2928_v28, 2  ;;  %v3110_v45 = vadd.f32 %v3109_v30, %v3108_v26  ;;  %v2834_v49 = vrot.slane %v2833_v10, 1  ;;  %v2504_v50 = vadd.f32 %v2503_v31, %v1086_v51 }
 0x28e   : > { %v4724_v4 = vld [vmem:[#allocation11 + $0x45c] sm:$0xf]  ;;  %2804 = vmatpush.bf16.msra.mxu3 %v4155_v54  ;;  %v3835_v20 = vor.u32 %v4660_v62, %v3832_v35  ;;  %v2840_v53 = vmax.f32 %v2838_v11, %v2839_v42  ;;  %v2531_v35 = vpop.f32.mrf.mxu3  ;;  %v2925_v47 = vmin.f32 %v2923_v15, %v2924_v48  ;;  %v1087_v11 = vperm.slane %v5451_v55, 3 }
 0x28f   : > { %v4088_v8 = vld [vmem:[#allocation11 + $0x478] sm:$0xf0]  ;;  %2778 = vmatpush.bf16.msra.mxu1 %v3579_v56  ;;  %v2930_v54 = vmin.f32 %v2928_v28, %v2929_v43  ;;  %v3013_v56 = vadd.f32 %v3012_v44, %v3011_v29  ;;  %v3111_v57 = vrot.slane %v3110_v45, 2  ;;  %v2518_v59 = vadd.f32 %v2517_v33, %v2504_v50 }
 0x290   : > { %2820 = vmatpush.bf16.msrb.mxu0 %v4347_v34  ;;  %v4091_v9 = vor.u32 %v4724_v4, %v4088_v8  ;;  %v4652_v32 = vld [vmem:[#allocation11 + $0x21c] sm:$0xf]  ;;  %v3007_v34 = vrot.slane %v3006_v22, 1  ;;  %v2835_v1 = vmax.f32 %v2833_v10, %v2834_v49 }
 0x291   : > { %2791 = vmatpush.bf16.msra.mxu2 %v3867_v58  ;;  %v3800_v37 = vld [vmem:[#allocation11 + $0x238] sm:$0xf0]  ;;  %v3106_v58 = vrot.slane %v3105_v38, 1  ;;  %v3014_v62 = vrot.slane %v3013_v56, 1  ;;  %v3112_v51 = vadd.f32 %v3111_v57, %v3110_v45  ;;  %v2532_v2 = vadd.f32 %v2531_v35, %v2518_v59 }
 0x292   : > { %2805 = vmatpush.bf16.msra.mxu3 %v4123_v60  ;;  %v4716_v40 = vld [vmem:[#allocation11 + $0x41c] sm:$0xf]  ;;  %v3803_v52 = vor.u32 %v4652_v32, %v3800_v37  ;;  %v3008_v13 = vadd.f32 %v3007_v34, %v3006_v22 }
 0x293   : > { %2779 = vmatpush.bf16.msra.mxu1 %v3547_v61  ;;  %v4056_v46 = vld [vmem:[#allocation11 + $0x438] sm:$0xf0]  ;;  %v2841_v61 = vrot.slane %v2840_v53, 1  ;;  %v3113_v7 = vrot.slane %v3112_v51, 1  ;;  %v3107_v14 = vadd.f32 %v3106_v58, %v3105_v38  ;;  %v2546_v4 = vadd.f32 %v2545_v12, %v2532_v2 }
 0x294   : > { %2821 = vmatpush.bf16.msrb.mxu0 %v4315_v0  ;;  %v4059_v60 = vor.u32 %v4716_v40, %v4056_v46  ;;  %v2931_v0 = vrot.slane %v2930_v54, 1  ;;  %v2599_v31 = vpop.f32.mrf.mxu0 }
 0x295   : > { %2792 = vmatpush.bf16.msra.mxu2 %v3835_v20  ;;  %v2842_v5 = vmax.f32 %v2840_v53, %v2841_v61  ;;  %v3114_v18 = vadd.f32 %v3113_v7, %v3112_v51  ;;  %v2843_v19 = vmax.f32 %v2544_v39, %v2546_v4  ;;  %v2933_v20 = vmin.f32 %v2544_v39, %v2546_v4 }
 0x296   : > { %2780 = vmatmul.bf16.vlgmr.msra.gmra.mxu1 %v5416_v36  ;;  %2806 = vmatpush.bf16.msra.mxu3 %v4091_v9  ;;  %v2932_v6 = vmin.f32 %v2930_v54, %v2931_v0  ;;  %v3015_v36 = vadd.f32 %v3014_v62, %v3013_v56  ;;  %v3016_v21 = vadd.f32 %v2546_v4, %v2544_v39  ;;  %v2557_v9 = vpop.f32.mrf.mxu1 }
 0x297   : > { %2822 = vmatmul.bf16.vlgmr.msrb.gmra.mxu0 %v5418_v41  ;;  %v3087_v41 = vmul.f32 %v2544_v39, %v2544_v39  ;;  %v2893_v8 = vrot.slane %v2842_v5, 7  ;;  %v3095_v23 = vmul.f32 %v2546_v4, %v2546_v4  ;;  %v3165_v10 = vrot.slane %v3114_v18, 7 }
 0x298   : > { %v2983_v16 = vrot.slane %v2932_v6, 7  ;;  %v3066_v17 = vrot.slane %v3015_v36, 7  ;;  %v2844_v37 = vrot.slane %v2843_v19, 4  ;;  %v2934_v22 = vrot.slane %v2933_v20, 4 }
 0x299   : > { %2793 = vmatpush.bf16.msra.mxu2 %v3803_v52  ;;  %v5535_v24 = vsel %vm2900_vm1, %v2835_v1, %v2893_v8  ;;  %v3115_v15 = vadd.f32 %v3095_v23, %v3087_v41  ;;  %v5545_v27 = vsel %vm2900_vm1, %v3107_v14, %v3165_v10  ;;  %v3017_v38 = vrot.slane %v3016_v21, 4 }
 0x29a   : > { %2807 = vmatpush.bf16.msra.mxu3 %v4059_v60  ;;  %v5538_v25 = vsel %vm2900_vm1, %v2925_v47, %v2983_v16  ;;  %v5541_v26 = vsel %vm2900_vm1, %v3008_v13, %v3066_v17  ;;  %v2845_v43 = vmax.f32 %v2843_v19, %v2844_v37  ;;  %v2935_v44 = vmin.f32 %v2933_v20, %v2934_v22 }
 0x29b   : > { %v3116_v42 = vrot.slane %v3115_v15, 4  ;;  %v3018_v45 = vadd.f32 %v3017_v38, %v3016_v21 }
 0x29c   : > { %2794 = vmatmul.bf16.vlgmr.msra.gmra.mxu2 %v5422_v63  ;;  %v2558_v63 = vadd.f32 %v2557_v9, %v1087_v11  ;;  %v2846_v53 = vrot.slane %v2845_v43, 2  ;;  %v2936_v54 = vrot.slane %v2935_v44, 2  ;;  %v2601_v57 = vpop.f32.mrf.mxu0 }
 0x29d   : > { %2808 = vmatmul.bf16.vlgmr.msra.gmra.mxu3 %v5424_v3  ;;  %v3117_v48 = vadd.f32 %v3116_v42, %v3115_v15  ;;  %v3019_v56 = vrot.slane %v3018_v45, 2 }
 0x29e   : > { %v2559_v39 = vpop.f32.mrf.mxu1  ;;  %v2847_v62 = vmax.f32 %v2845_v43, %v2846_v53  ;;  %v2937_v51 = vmin.f32 %v2935_v44, %v2936_v54 }
 0x29f   : > { %v2571_v28 = vpop.f32.mrf.mxu2  ;;  %v2560_v3 = vadd.f32 %v2559_v39, %v1087_v11  ;;  %v3118_v34 = vrot.slane %v3117_v48, 2  ;;  %v3020_v35 = vadd.f32 %v3019_v56, %v3018_v45 }
 0x2a0   : > { %v2572_v29 = vadd.f32 %v2571_v28, %v2558_v63  ;;  %v2585_v30 = vpop.f32.mrf.mxu3  ;;  %v2848_v14 = vrot.slane %v2847_v62, 1  ;;  %v2938_v41 = vrot.slane %v2937_v51, 1 }
 0x2a1   : > { %v3119_v6 = vadd.f32 %v3118_v34, %v3117_v48  ;;  %v3021_v4 = vrot.slane %v3020_v35, 1 }
 0x2a2   : > { %v2586_v32 = vadd.f32 %v2585_v30, %v2572_v29  ;;  %v2849_v15 = vmax.f32 %v2847_v62, %v2848_v14  ;;  %v2939_v9 = vmin.f32 %v2937_v51, %v2938_v41 }
 0x2a3   : > { %v3120_v19 = vrot.slane %v3119_v6, 1  ;;  %v3022_v11 = vadd.f32 %v3021_v4, %v3020_v35 }
 0x2a4   : > { %v2600_v40 = vadd.f32 %v2599_v31, %v2586_v32  ;;  %v2894_v39 = vrot.slane %v2849_v15, 6 }
 0x2a5   : > { %v3121_v31 = vadd.f32 %v3120_v19, %v3119_v6  ;;  %v3067_v42 = vrot.slane %v3022_v11, 6  ;;  %v1090_v11 = vperm.slane %v5451_v55, 6 }
 0x2a6   : > { %v3088_v58 = vmul.f32 %v2600_v40, %v2600_v40 }
 0x2a7   : > { %v2573_v46 = vpop.f32.mrf.mxu2 }
 0x2a8   : > { %v2574_v49 = vadd.f32 %v2573_v46, %v2560_v3  ;;  %v2587_v50 = vpop.f32.mrf.mxu3  ;;  %v3166_v46 = vrot.slane %v3121_v31, 6 }
 0x2aa   : > { %v2588_v52 = vadd.f32 %v2587_v50, %v2574_v49 }
 0x2ac   : > { %v2602_v33 = vadd.f32 %v2601_v57, %v2588_v52 }
 0x2ae   : > { %v2850_v59 = vmax.f32 %v2600_v40, %v2602_v33  ;;  %v2940_v60 = vmin.f32 %v2600_v40, %v2602_v33  ;;  %v3023_v61 = vadd.f32 %v2602_v33, %v2600_v40  ;;  %v3096_v0 = vmul.f32 %v2602_v33, %v2602_v33 }
 0x2af   : > { %v2984_v40 = vrot.slane %v2939_v9, 6 }
 0x2b0   : > { %v2851_v1 = vrot.slane %v2850_v59, 4  ;;  %v2941_v47 = vrot.slane %v2940_v60, 4  ;;  %v3024_v2 = vrot.slane %v3023_v61, 4  ;;  %v3122_v5 = vadd.f32 %v3096_v0, %v3088_v58 }
 0x2b2   : > { %v2852_v36 = vmax.f32 %v2850_v59, %v2851_v1  ;;  %v2942_v7 = vmin.f32 %v2940_v60, %v2941_v47  ;;  %v3025_v12 = vadd.f32 %v3024_v2, %v3023_v61  ;;  %v3123_v13 = vrot.slane %v3122_v5, 4 }
 0x2b3   : > { %v2613_v34 = vpop.f32.mrf.mxu1 }
 0x2b4   : > { %v2853_v8 = vrot.slane %v2852_v36, 2  ;;  %v2943_v16 = vrot.slane %v2942_v7, 2  ;;  %v3026_v17 = vrot.slane %v3025_v12, 2  ;;  %v3124_v18 = vadd.f32 %v3123_v13, %v3122_v5  ;;  %v2655_v61 = vpop.f32.mrf.mxu0 }
 0x2b6   : > { %v2854_v20 = vmax.f32 %v2852_v36, %v2853_v8  ;;  %v2944_v21 = vmin.f32 %v2942_v7, %v2943_v16  ;;  %v3027_v23 = vadd.f32 %v3026_v17, %v3025_v12  ;;  %v3125_v10 = vrot.slane %v3124_v18, 2 }
 0x2b7   : > { %v1089_v8 = vperm.slane %v5451_v55, 5  ;;  %v5220_v17 = vmov -inf  }
 0x2b8   : > { %v2855_v63 = vrot.slane %v2854_v20, 1  ;;  %v2945_v28 = vrot.slane %v2944_v21, 1  ;;  %v3028_v29 = vrot.slane %v3027_v23, 1  ;;  %v3126_v30 = vadd.f32 %v3125_v10, %v3124_v18  ;;  %441 = vst [vmem:[#allocation2] ss:$4 sm:$0xff] %v5220_v17 }
 0x2ba   : > { %v2856_v32 = vmax.f32 %v2854_v20, %v2855_v63  ;;  %v2946_v37 = vmin.f32 %v2944_v21, %v2945_v28  ;;  %v3029_v22 = vadd.f32 %v3028_v29, %v3027_v23  ;;  %v3127_v38 = vrot.slane %v3126_v30, 1 }
 0x2bb   : > { %v2615_v60 = vpop.f32.mrf.mxu1  ;;  %v5221_v21 = vmov inf   ;;  %v5222_v23 = vmov 0.0  }
 0x2bc   : > { %v2895_v3 = vrot.slane %v2856_v32, 5  ;;  %v2985_v43 = vrot.slane %v2946_v37, 5  ;;  %v3068_v44 = vrot.slane %v3029_v22, 5  ;;  %v3128_v45 = vadd.f32 %v3127_v38, %v3126_v30  ;;  %v2657_v35 = vpop.f32.mrf.mxu0  ;;  %443 = vst [vmem:[#allocation2 + $0x1] ss:$4 sm:$0xff] %v5221_v21 }
 0x2bd   : > { %444 = vst [vmem:[#allocation2] sm:$0xcc] %v5222_v23 }
 0x2be   : > { %v2903_v49 = vsel %vm2902_vm2, %v2894_v39, %v2895_v3  ;;  %v2991_v48 = vsel %vm2902_vm2, %v2984_v40, %v2985_v43  ;;  %v3074_v50 = vsel %vm2902_vm2, %v3067_v42, %v3068_v44  ;;  %v3167_v52 = vrot.slane %v3128_v45, 5  ;;  %445 = vst [vmem:[#allocation2 + $0x8] sm:$0xcc] %v5222_v23 }
 0x2bf   : > { %v5552_v53 = vsel %vm2904_vm3, %v5535_v24, %v2903_v49  ;;  %v5555_v54 = vsel %vm2904_vm3, %v5538_v25, %v2991_v48  ;;  %v5558_v56 = vsel %vm2904_vm3, %v5541_v26, %v3074_v50  ;;  %v2627_v58 = vpop.f32.mrf.mxu2  ;;  %v1088_v26 = vperm.slane %v5451_v55, 4  ;;  %446 = vst [vmem:[#allocation2 + $0x10] sm:$0xcc] %v5222_v23 }
 0x2c0   : > { %v3173_v57 = vsel %vm2902_vm2, %v3166_v46, %v3167_v52  ;;  %v2641_v59 = vpop.f32.mrf.mxu3  ;;  %447 = vst [vmem:[#allocation2 + $0x18] sm:$0xcc] %v5222_v23 }
 0x2c1   : > { %v5562_v33 = vsel %vm2904_vm3, %v5545_v27, %v3173_v57  ;;  %v2616_v5 = vadd.f32 %v2615_v60, %v1088_v26  ;;  %v2614_v6 = vadd.f32 %v2613_v34, %v1088_v26 }
 0x2c3   : > { %v2628_v36 = vadd.f32 %v2627_v58, %v2614_v6 }
 0x2c5   : > { %v2642_v41 = vadd.f32 %v2641_v59, %v2628_v36  ;;  %v1091_v36 = vperm.slane %v5451_v55, 7 }
 0x2c7   : > { %v2629_v0 = vpop.f32.mrf.mxu2  ;;  %v2656_v18 = vadd.f32 %v2655_v61, %v2642_v41 }
 0x2c8   : > { %v2643_v62 = vpop.f32.mrf.mxu3  ;;  %v2630_v27 = vadd.f32 %v2629_v0, %v2616_v5 }
 0x2c9   : > { %v3089_v28 = vmul.f32 %v2656_v18, %v2656_v18 }
 0x2ca   : > { %v2644_v13 = vadd.f32 %v2643_v62, %v2630_v27 }
 0x2cc   : > { %v2658_v16 = vadd.f32 %v2657_v35, %v2644_v13 }
 0x2ce   : > { %v3097_v10 = vmul.f32 %v2658_v16, %v2658_v16  ;;  %v2857_v29 = vmax.f32 %v2656_v18, %v2658_v16  ;;  %v2947_v30 = vmin.f32 %v2656_v18, %v2658_v16  ;;  %v3030_v38 = vadd.f32 %v2658_v16, %v2656_v18 }
 0x2d0   : > { %v3129_v39 = vadd.f32 %v3097_v10, %v3089_v28  ;;  %v2858_v43 = vrot.slane %v2857_v29, 4  ;;  %v2948_v44 = vrot.slane %v2947_v30, 4  ;;  %v3031_v49 = vrot.slane %v3030_v38, 4 }
 0x2d2   : > { %v3130_v48 = vrot.slane %v3129_v39, 4  ;;  %v2859_v34 = vmax.f32 %v2857_v29, %v2858_v43  ;;  %v2949_v58 = vmin.f32 %v2947_v30, %v2948_v44  ;;  %v3032_v61 = vadd.f32 %v3031_v49, %v3030_v38 }
 0x2d3   : > { %v2669_v24 = vpop.f32.mrf.mxu1 }
 0x2d4   : > { %v2711_v47 = vpop.f32.mrf.mxu0  ;;  %v2670_v15 = vadd.f32 %v2669_v24, %v1089_v8  ;;  %v3131_v0 = vadd.f32 %v3130_v48, %v3129_v39 }
 0x2db   : > { %v2671_v1 = vpop.f32.mrf.mxu1 }
 0x2dc   : > { %v2713_v4 = vpop.f32.mrf.mxu0  ;;  %v2672_v19 = vadd.f32 %v2671_v1, %v1089_v8 }
 0x2df   : > { %v2683_v51 = vpop.f32.mrf.mxu2 }
 0x2e0   : > { %v2697_v25 = vpop.f32.mrf.mxu3  ;;  %v2684_v31 = vadd.f32 %v2683_v51, %v2670_v15 }
 0x2e2   : > { %v2698_v45 = vadd.f32 %v2697_v25, %v2684_v31  ;;  %v2950_v25 = vrot.slane %v2949_v58, 2 }
 0x2e4   : > { %v2712_v59 = vadd.f32 %v2711_v47, %v2698_v45  ;;  %v2951_v8 = vmin.f32 %v2949_v58, %v2950_v25 }
 0x2e6   : > { %v3090_v27 = vmul.f32 %v2712_v59, %v2712_v59 }
 0x2e7   : > { %v2685_v2 = vpop.f32.mrf.mxu2 }
 0x2e8   : > { %v2699_v7 = vpop.f32.mrf.mxu3  ;;  %v2686_v9 = vadd.f32 %v2685_v2, %v2672_v19  ;;  %v2860_v2 = vrot.slane %v2859_v34, 2 }
 0x2ea   : > { %v2700_v40 = vadd.f32 %v2699_v7, %v2686_v9  ;;  %v3033_v7 = vrot.slane %v3032_v61, 2 }
 0x2ec   : > { %v2714_v50 = vadd.f32 %v2713_v4, %v2700_v40  ;;  %v2861_v4 = vmax.f32 %v2859_v34, %v2860_v2  ;;  %v3034_v10 = vadd.f32 %v3033_v7, %v3032_v61 }
 0x2ee   : > { %v2864_v62 = vmax.f32 %v2712_v59, %v2714_v50  ;;  %v2954_v51 = vmin.f32 %v2712_v59, %v2714_v50  ;;  %v3098_v35 = vmul.f32 %v2714_v50, %v2714_v50  ;;  %v3037_v5 = vadd.f32 %v2714_v50, %v2712_v59 }
 0x2ef   : > { %v2862_v31 = vrot.slane %v2861_v4, 1 }
 0x2f0   : > { %v2865_v13 = vrot.slane %v2864_v62, 4  ;;  %v2955_v47 = vrot.slane %v2954_v51, 4  ;;  %v3038_v16 = vrot.slane %v3037_v5, 4 }
 0x2f1   : > { %v5568_v48 = vmax.f32 %v2861_v4, %v2862_v31 }
 0x2f2   : > { %v2866_v9 = vmax.f32 %v2864_v62, %v2865_v13  ;;  %v2956_v55 = vmin.f32 %v2954_v51, %v2955_v47 }
 0x2f3   : > { %v2725_v12 = vpop.f32.mrf.mxu1  ;;  %v2896_v25 = vrot.slane %v5568_v48, 4 }
 0x2f4   : > { %v2767_v32 = vpop.f32.mrf.mxu0  ;;  %v2726_v42 = vadd.f32 %v2725_v12, %v1090_v11  ;;  %v3132_v12 = vrot.slane %v3131_v0, 2  ;;  %v2867_v43 = vrot.slane %v2866_v9, 2  ;;  %v2957_v44 = vrot.slane %v2956_v55, 2 }
 0x2f6   : > { %v3133_v15 = vadd.f32 %v3132_v12, %v3131_v0  ;;  %v2868_v62 = vmax.f32 %v2866_v9, %v2867_v43  ;;  %v2958_v51 = vmin.f32 %v2956_v55, %v2957_v44 }
 0x2fb   : > { %v2727_v63 = vpop.f32.mrf.mxu1 }
 0x2fc   : > { %v2728_v22 = vadd.f32 %v2727_v63, %v1090_v11  ;;  %v2769_v24 = vpop.f32.mrf.mxu0 }
 0x2ff   : > { %v2739_v14 = vpop.f32.mrf.mxu2 }
 0x300   : > { %v2753_v20 = vpop.f32.mrf.mxu3  ;;  %v2740_v46 = vadd.f32 %v2739_v14, %v2726_v42  ;;  %v3136_v14 = vadd.f32 %v3098_v35, %v3090_v27  ;;  %v3035_v42 = vrot.slane %v3034_v10, 1 }
 0x302   : > { %v2754_v60 = vadd.f32 %v2753_v20, %v2740_v46  ;;  %v3137_v63 = vrot.slane %v3136_v14, 4  ;;  %v5572_v61 = vadd.f32 %v3035_v42, %v3034_v10 }
 0x304   : > { %v2768_v6 = vadd.f32 %v2767_v32, %v2754_v60  ;;  %v2952_v32 = vrot.slane %v2951_v8, 1  ;;  %v3138_v45 = vadd.f32 %v3137_v63, %v3136_v14  ;;  %v3069_v47 = vrot.slane %v5572_v61, 4 }
 0x306   : > { %v3091_v17 = vmul.f32 %v2768_v6, %v2768_v6  ;;  %v5570_v50 = vmin.f32 %v2951_v8, %v2952_v32  ;;  %v3139_v35 = vrot.slane %v3138_v45, 2  ;;  %v2959_v8 = vrot.slane %v2958_v51, 1 }
 0x307   : > { %v2741_v37 = vpop.f32.mrf.mxu2 }
 0x308   : > { %v2742_v3 = vadd.f32 %v2741_v37, %v2728_v22  ;;  %v2755_v52 = vpop.f32.mrf.mxu3  ;;  %v3039_v37 = vadd.f32 %v3038_v16, %v3037_v5  ;;  %v2986_v5 = vrot.slane %v5570_v50, 4  ;;  %v3140_v16 = vadd.f32 %v3139_v35, %v3138_v45 }
 0x309   : > { %v2960_v31 = vmin.f32 %v2958_v51, %v2959_v8 }
 0x30a   : > { %v2756_v57 = vadd.f32 %v2755_v52, %v2742_v3  ;;  %v3134_v3 = vrot.slane %v3133_v15, 1  ;;  %v3141_v32 = vrot.slane %v3140_v16, 1 }
 0x30c   : > { %v2770_v1 = vadd.f32 %v2769_v24, %v2756_v57  ;;  %v3040_v57 = vrot.slane %v3039_v37, 2  ;;  %v5574_v0 = vadd.f32 %v3134_v3, %v3133_v15 }
 0x30e   : > { %v3099_v41 = vmul.f32 %v2770_v1, %v2770_v1  ;;  %v2871_v18 = vmax.f32 %v2768_v6, %v2770_v1  ;;  %v2961_v19 = vmin.f32 %v2768_v6, %v2770_v1  ;;  %v3044_v20 = vadd.f32 %v2770_v1, %v2768_v6 }
 0x30f   : > { %v3041_v27 = vadd.f32 %v3040_v57, %v3039_v37  ;;  %v3168_v14 = vrot.slane %v5574_v0, 4  ;;  %v2987_v57 = vrot.slane %v2960_v31, 3 }
 0x310   : > { %v3143_v28 = vadd.f32 %v3099_v41, %v3091_v17  ;;  %v2872_v22 = vrot.slane %v2871_v18, 4  ;;  %v2962_v38 = vrot.slane %v2961_v19, 4  ;;  %v3045_v39 = vrot.slane %v3044_v20, 4 }
 0x311   : > { %v2869_v41 = vrot.slane %v2868_v62, 1  ;;  %v3042_v10 = vrot.slane %v3041_v27, 1 }
 0x312   : > { %v3144_v46 = vrot.slane %v3143_v28, 4  ;;  %v2873_v34 = vmax.f32 %v2871_v18, %v2872_v22  ;;  %v2963_v58 = vmin.f32 %v2961_v19, %v2962_v38  ;;  %v3046_v59 = vadd.f32 %v3045_v39, %v3044_v20 }
 0x313   : > { %v2781_v26 = vpop.f32.mrf.mxu1  ;;  %v3043_v42 = vadd.f32 %v3042_v10, %v3041_v27 }
 0x314   : > { %v2782_v21 = vadd.f32 %v2781_v26, %v1091_v36  ;;  %v2823_v29 = vpop.f32.mrf.mxu0  ;;  %v3145_v1 = vadd.f32 %v3144_v46, %v3143_v28  ;;  %v2964_v7 = vrot.slane %v2963_v58, 2  ;;  %v3047_v12 = vrot.slane %v3046_v59, 2 }
 0x315   : > { %v3070_v51 = vrot.slane %v3043_v42, 3 }
 0x316   : > { %v3146_v17 = vrot.slane %v3145_v1, 2  ;;  %v2965_v9 = vmin.f32 %v2963_v58, %v2964_v7 }
 0x318   : > { %v3147_v37 = vadd.f32 %v3146_v17, %v3145_v1  ;;  %v2966_v43 = vrot.slane %v2965_v9, 1 }
 0x31a   : > { %v3148_v58 = vrot.slane %v3147_v37, 1  ;;  %v2967_v1 = vmin.f32 %v2965_v9, %v2966_v43 }
 0x31b   : > { %v2783_v40 = vpop.f32.mrf.mxu1 }
 0x31c   : > { %v2784_v52 = vadd.f32 %v2783_v40, %v1091_v36  ;;  %v2874_v36 = vrot.slane %v2873_v34, 2  ;;  %v2825_v13 = vpop.f32.mrf.mxu0 }
 0x31e   : > { %v2875_v15 = vmax.f32 %v2873_v34, %v2874_v36  ;;  %v3142_v34 = vadd.f32 %v3141_v32, %v3140_v16 }
 0x31f   : > { %v2795_v23 = vpop.f32.mrf.mxu2 }
 0x320   : > { %v2809_v11 = vpop.f32.mrf.mxu3  ;;  %v2796_v30 = vadd.f32 %v2795_v23, %v2782_v21  ;;  %v2876_v3 = vrot.slane %v2875_v15, 1 }
 0x322   : > { %v2810_v49 = vadd.f32 %v2809_v11, %v2796_v30  ;;  %v3048_v11 = vadd.f32 %v3047_v12, %v3046_v59  ;;  %v2870_v30 = vmax.f32 %v2868_v62, %v2869_v41  ;;  %v2877_v35 = vmax.f32 %v2875_v15, %v2876_v3 }
 0x323   : > { %v3169_v12 = vrot.slane %v3142_v34, 3  ;;  %v2993_v15 = vsel %vm2906_vm4, %v2986_v5, %v2987_v57 }
 0x324   : > { %v2824_v26 = vadd.f32 %v2823_v29, %v2810_v49  ;;  %v3049_v44 = vrot.slane %v3048_v11, 1  ;;  %v2898_v17 = vrot.slane %v2877_v35, 2 }
 0x325   : > { %v3175_v50 = vsel %vm2906_vm4, %v3168_v14, %v3169_v12 }
 0x326   : > { %v3092_v18 = vmul.f32 %v2824_v26, %v2824_v26 }
 0x327   : > { %v2797_v60 = vpop.f32.mrf.mxu2 }
 0x328   : > { %v2798_v24 = vadd.f32 %v2797_v60, %v2784_v52  ;;  %v2811_v2 = vpop.f32.mrf.mxu3  ;;  %v2897_v52 = vrot.slane %v2870_v30, 3 }
 0x32a   : > { %v2812_v6 = vadd.f32 %v2811_v2, %v2798_v24  ;;  %v2907_v7 = vsel %vm2906_vm4, %v2896_v25, %v2897_v52  ;;  %v3076_v25 = vsel %vm2906_vm4, %v3069_v47, %v3070_v51 }
 0x32c   : > { %v2826_v4 = vadd.f32 %v2825_v13, %v2812_v6  ;;  %v3149_v13 = vadd.f32 %v3148_v58, %v3147_v37 }
 0x32e   : > { %v2878_v19 = vmax.f32 %v2824_v26, %v2826_v4  ;;  %v2968_v20 = vmin.f32 %v2824_v26, %v2826_v4  ;;  %v3051_v21 = vadd.f32 %v2826_v4, %v2824_v26  ;;  %v3100_v23 = vmul.f32 %v2826_v4, %v2826_v4 }
 0x32f   : > { %v3050_v26 = vadd.f32 %v3049_v44, %v3048_v11  ;;  %v3170_v9 = vrot.slane %v3149_v13, 2  ;;  %v2828_v11 = vld [vmem:[#allocation2] ss:$4 sm:$0xff] }
 0x330   : > { %v2879_v55 = vrot.slane %v2878_v19, 4  ;;  %v2969_v63 = vrot.slane %v2968_v20, 4  ;;  %v3052_v28 = vrot.slane %v3051_v21, 4  ;;  %v3150_v29 = vadd.f32 %v3100_v23, %v3092_v18 }
 0x331   : > { %v2988_v18 = vrot.slane %v2967_v1, 2 }
 0x332   : > { %v2880_v22 = vmax.f32 %v2878_v19, %v2879_v55  ;;  %v2970_v38 = vmin.f32 %v2968_v20, %v2969_v63  ;;  %v3053_v39 = vadd.f32 %v3052_v28, %v3051_v21  ;;  %v3151_v40 = vrot.slane %v3150_v29, 4  ;;  %v2918_v63 = vld [vmem:[#allocation2 + $0x1] ss:$4 sm:$0xff] }
 0x333   : > { %v3071_v19 = vrot.slane %v3050_v26, 2 }
 0x334   : > { %v2881_v45 = vrot.slane %v2880_v22, 2  ;;  %v2971_v46 = vrot.slane %v2970_v38, 2  ;;  %v3054_v49 = vrot.slane %v3053_v39, 2  ;;  %v3152_v48 = vadd.f32 %v3151_v40, %v3150_v29  ;;  %v3001_v29 = vld [vmem:[#allocation2 + $0x2] ss:$4 sm:$0xff] }
 0x336   : > { %v2882_v59 = vmax.f32 %v2880_v22, %v2881_v45  ;;  %v2972_v60 = vmin.f32 %v2970_v38, %v2971_v46  ;;  %v3055_v62 = vadd.f32 %v3054_v49, %v3053_v39  ;;  %v3153_v24 = vrot.slane %v3152_v48, 2  ;;  %v3084_v38 = vld [vmem:[#allocation2 + $0x3] ss:$4 sm:$0xff] }
 0x338   : > { %v2883_v2 = vrot.slane %v2882_v59, 1  ;;  %v2973_v6 = vrot.slane %v2972_v60, 1  ;;  %v3056_v27 = vrot.slane %v3055_v62, 1  ;;  %v3154_v36 = vadd.f32 %v3153_v24, %v3152_v48 }
 0x33a   : > { %v2884_v41 = vmax.f32 %v2882_v59, %v2883_v2  ;;  %v2974_v4 = vmin.f32 %v2972_v60, %v2973_v6  ;;  %v3057_v8 = vadd.f32 %v3056_v27, %v3055_v62  ;;  %v3155_v16 = vrot.slane %v3154_v36, 1 }
 0x33c   : > { %v2899_v20 = vrot.slane %v2884_v41, 1  ;;  %v2989_v21 = vrot.slane %v2974_v4, 1  ;;  %v3072_v23 = vrot.slane %v3057_v8, 1  ;;  %v3156_v10 = vadd.f32 %v3155_v16, %v3154_v36 }
 0x33e   : > { %v2909_v55 = vsel %vm2908_vm5, %v2898_v17, %v2899_v20  ;;  %v2994_v28 = vsel %vm2908_vm5, %v2988_v18, %v2989_v21  ;;  %v3077_v30 = vsel %vm2908_vm5, %v3071_v19, %v3072_v23  ;;  %v3171_v31 = vrot.slane %v3156_v10, 1 }
 0x33f   : > { %v2911_v61 = vsel %vm2910_vm6, %v2907_v7, %v2909_v55  ;;  %v2995_v5 = vsel %vm2910_vm6, %v2993_v15, %v2994_v28  ;;  %v3078_v47 = vsel %vm2910_vm6, %v3076_v25, %v3077_v30 }
 0x340   : > { %v2913_v32 = vsel %vm2912_vm7, %v5552_v53, %v2911_v61  ;;  %v2996_v37 = vsel %vm2912_vm7, %v5555_v54, %v2995_v5  ;;  %v3079_v22 = vsel %vm2912_vm7, %v5558_v56, %v3078_v47  ;;  %v3176_v0 = vsel %vm2908_vm5, %v3170_v9, %v3171_v31 }
 0x341   : > { %v2915_v14 = vmax.f32 %v2828_v11, %v2913_v32  ;;  %v2998_v39 = vmin.f32 %v2918_v63, %v2996_v37  ;;  %v3081_v40 = vadd.f32 %v3079_v22, %v3001_v29  ;;  %v3177_v42 = vsel %vm2910_vm6, %v3175_v50, %v3176_v0 }
 0x342   : > { %v3178_v3 = vsel %vm2912_vm7, %v5562_v33, %v3177_v42 }
 0x343   : > { %2916 = vst [vmem:[#allocation2] ss:$4 sm:$0xff] %v2915_v14  ;;  %v3180_v53 = vadd.f32 %v3178_v3, %v3084_v38 }
 0x344   : > { %2999 = vst [vmem:[#allocation2 + $0x1] ss:$4 sm:$0xff] %v2998_v39 }
 0x345   : > { %3082 = vst [vmem:[#allocation2 + $0x2] ss:$4 sm:$0xff] %v3081_v40 }
 0x346   : > { %3181 = vst [vmem:[#allocation2 + $0x3] ss:$4 sm:$0xff] %v3180_v53 }
 0x34a   : > { %v3204_v54 = vld [vmem:[#allocation2] ss:$4 sm:$0xff] }
 0x34b   : > { %3205 = vst [vmem:[%s5609_s22] ss:$4 sm:$0xff] %v3204_v54  ;;  %v3208_v56 = vld [vmem:[#allocation2 + $0x1] ss:$4 sm:$0xff] }
 0x34c   : > { %v3185_v43 = vld [vmem:[#allocation2 + $0x2] ss:$4 sm:$0xff]  ;;  %4541 = vst [vmem:[%s5609_s22 + $0x2] ss:$4 sm:$0xff] %v3208_v56 }
 0x34d   : > { %v3186_v33 = vmul.f32 0.0625, %v3185_v43  ;;  %v3187_v45 = vld [vmem:[#allocation2 + $0x3] ss:$4 sm:$0xff] }
 0x34f   : > { %v3188_v44 = vmul.f32 %v3186_v33, %v3185_v43  ;;  %4540 = vst [vmem:[%s5609_s22 + $0x1] ss:$4 sm:$0xff] %v3186_v33 }
 0x351   : > { %v3189_v46 = vsub.f32 %v3187_v45, %v3188_v44 }
 0x353   : > { %v3190_v49 = vmul.f32 0.06666667, %v3189_v46 }
 0x355   : > { %v3191_v48 = vmax.f32 %v3190_v49, 0.0 }
 0x357   : > { %4964 = vrsqrt.f32 %v3191_v48  ;;  %vm3199_vm8 = vcmp.eq.f32.partialorder %v3191_v48, inf  ;;  %v3202_v24 = vand.u32 2147483648, %v3191_v48  ;;  %vm3201_vm9 = vcmp.eq.f32.partialorder %v3191_v48, 0.0 }
 0x35d   : > { %v4965_v52 = vpop.eup %4964 }
 0x35e   : > { %v3193_v57 = vmul.f32 %v4965_v52, %v3191_v48 }
 0x360   : > { %v3194_v34 = vmul.f32 %v4965_v52, %v3193_v57 }
 0x362   : > { %v3195_v58 = vmul.f32 0.5, %v3194_v34 }
 0x364   : > { %v3196_v59 = vsub.f32 1.5, %v3195_v58 }
 0x366   : > { %v3197_v60 = vmul.f32 %v4965_v52, %v3196_v59 }
 0x368   : > { %v3198_v62 = vmul.f32 %v3197_v60, %v3191_v48 }
 0x36a   : > { %v3200_v51 = vsel %vm3199_vm8, %v3191_v48, %v3198_v62 }
 0x36b   : > { %v3203_v35 = vsel %vm3201_vm9, %v3202_v24, %v3200_v51 }
 0x36c   : > { %4542 = vst [vmem:[%s5609_s22 + $0x3] ss:$4 sm:$0xff] %v3203_v35 }
 0x36d   : > { %5143 = shalt.err (!%p5140_p9)
}
 0x36e   : > { %4862 = dma.vmem_to_hbm [thread:$0]  (%p5313_p4), %s3228_s27, 512, %s3230_s29, %s3214_s12  }
 0x36f PF: > { %p4894_p10 = scmp.ge.s32.totalorder %s5206_s14, 2  ;;  %s3241_s17 = sand.u32 1, %s5186_s30  }
 0x370   : > { %s3242_s1 = scalar_lea.sflag [#allocation5], %s3241_s17 }
 0x371   : > { %p4881_p11 = pnand %p4894_p10, %p5320_p8 }
 0x373   : > { %p4882_p12 = pneg %p4881_p11 }
 0x375   : > { %5181 = dma.done.wait (%p4882_p12), %s3242_s1, 512  }
 0x376   : > { %5183 = vsyncadd (%p4882_p12), %s3242_s1, 4294966784  ;;  %s25_s14 = sadd.s32 1, %s5206_s14   ;;  %s5680_s6 = sld [smem:[#allocation19_spill]] }
 0x377   : > { %p22_p13 = scmp.ge.s32.totalorder %s25_s14, 4   ;;  %s5681_s12 = sld [smem:[#allocation17_spill]] }
 0x378   : > { %s5682_s13 = sld [smem:[#allocation18_spill]]  ;;  %s5683_s30 = smov %s5190_s10 }
 0x379   : > { %s5684_s10 = smov %s5194_s11  ;;  %24 = sbr.rel (!%p22_p13) target bundleno = 11 (0xb), region = 127 }
 0x37c   : > { %s5685_s11 = smov %s5680_s6 }
 0x37e   :  { %3248 = vsyncpa [#allocation4], 1 }
 0x37f   :  { %3250 = vsyncpa [#allocation4 + $0x1], 1 }
 0x380   :  { %3251 = vsyncpa [#allocation7], 1 }
 0x381   :  { %3252 = vsyncpa [#allocation10], 1 }
 0x382   :  { %3253 = vsyncpa [#allocation5], 1 }
 0x383   :  { %3255 = vsyncpa [#allocation5 + $0x1], 1 }

</bundles_post_ra>
